<compile_context>
chip_gen: v7x
topology: tpu7x:2x2x1
jax: 0.10.0
libtpu: 0.0.40
codegen_flags: <defaults>
</compile_context>

<pallas_src>
import functools

import jax
import jax.numpy as jnp
from jax.experimental import pallas as pl
from jax.experimental.pallas import tpu as pltpu

VMEM_LIMIT = 48 * 1024 * 1024   # leaves headroom on v7x (64 MiB phys per TC)


def _pick_row_tile(n, c):
    # Multiples of 128 that divide n; prefer >= 2 tiles (v7x megacore),
    # cap at 512 for large C (v7x VMEM budget).
    cap = 512 if c >= 1024 else 1024
    for t in (1024, 512, 256, 128):
        if t <= cap and n % t == 0 and n // t >= 2:
            return t
    for t in (1024, 512, 256, 128):
        if t <= cap and n % t == 0:
            return t
    return n


def _pick_kv_group(b, hw, target=256, cap_rows=2048):
    # Smallest divisor G of B with G*HW >= target (MXU fill), capped by VMEM.
    best = 1
    for g in range(1, b + 1):
        if b % g == 0 and g * hw <= cap_rows:
            best = g
            if g * hw >= target:
                break
    return best


# ----------------------------------------------------------------------------
# Kernel A: fused residual 1x1 conv + query / key transforms (single pass).
#   y = x @ Wc + bc + x (f32),  q = y @ Wq + bq (bf16),  k = y @ Wk + bk (bf16)
# ----------------------------------------------------------------------------
def conv_qk_kernel(x_ref, wc_ref, bc_ref, wq_ref, bq_ref, wk_ref, bk_ref,
                   y_ref, q_ref, k_ref):
    x = x_ref[...]                                                   # (TM, C) f32
    y = (jnp.dot(x.astype(jnp.bfloat16), wc_ref[...],
                 preferred_element_type=jnp.float32)
         + bc_ref[...] + x)
    y_ref[...] = y
    yb = y.astype(jnp.bfloat16)
    q_ref[...] = (jnp.dot(yb, wq_ref[...], preferred_element_type=jnp.float32)
                  + bq_ref[...]).astype(jnp.bfloat16)
    k_ref[...] = (jnp.dot(yb, wk_ref[...], preferred_element_type=jnp.float32)
                  + bk_ref[...]).astype(jnp.bfloat16)


# ----------------------------------------------------------------------------
# Kernel B: attention logits, grid = (num_q_tiles, B // G).
#   Each step: scores^T (G*HW, TM) = K_group @ q_tile^T, per-kv-batch max over
#   its HW rows (static unroll over G), accumulated; last step writes mean/B.
# ----------------------------------------------------------------------------
def attn_logits_kernel(q_ref, k_ref, logits_ref, acc_s, *, hw, g, scale, inv_b):
    j = pl.program_id(1)

    @pl.when(j == 0)
    def _init():
        acc_s[...] = jnp.zeros_like(acc_s)

    s_t = jax.lax.dot_general(k_ref[...], q_ref[...],
                              (((1,), (1,)), ((), ())),
                              preferred_element_type=jnp.float32) * scale   # (G*HW, TM)
    for gg in range(g):                                   # static unroll, tile-aligned slices
        acc_s[...] += jnp.max(s_t[gg * hw:(gg + 1) * hw, :], axis=0, keepdims=True)

    @pl.when(j == pl.num_programs(1) - 1)
    def _finalize():
        logits_ref[...] = acc_s[...] * inv_b              # lane-dense (1, TM)


# ----------------------------------------------------------------------------
# Kernel C: channel L2-normalize + seeds accumulation (seeds = sel @ norm0).
# ----------------------------------------------------------------------------
def seeds_kernel(y_ref, sel_ref, seeds_ref):
    i = pl.program_id(0)

    @pl.when(i == 0)
    def _init():
        seeds_ref[...] = jnp.zeros_like(seeds_ref)

    y = y_ref[...]
    norm0 = y * jax.lax.rsqrt(jnp.maximum(jnp.sum(y * y, axis=-1, keepdims=True), 1e-24))
    seeds_ref[...] += jnp.dot(sel_ref[...], norm0, preferred_element_type=jnp.float32)


# ----------------------------------------------------------------------------
# Kernel D: correlation map (per row) + per-batch partial sums for proto.
#   training: cm = norm0 @ mean(seeds)       (mean folded into the dot)
#   eval:     cm = mean_s relu(norm0 @ seeds[s])
#   S0[b] = sum_{rows in b} y_row,  S1[b] = sum_{rows in b} cm_row * y_row
# ----------------------------------------------------------------------------
def cormap_stats_kernel(y_ref, ind_ref, seeds_ref, cm_ref, s0_ref, s1_ref, *, training):
    i = pl.program_id(0)

    @pl.when(i == 0)
    def _init():
        s0_ref[...] = jnp.zeros_like(s0_ref)
        s1_ref[...] = jnp.zeros_like(s1_ref)

    y = y_ref[...]                                                   # (TM, C)
    norm0 = y * jax.lax.rsqrt(jnp.maximum(jnp.sum(y * y, axis=-1, keepdims=True), 1e-24))
    seeds = seeds_ref[...]                                           # (B, C)
    if training:
        seed_mean = jnp.mean(seeds, axis=0, keepdims=True)           # (1, C)
        cm = jax.lax.dot_general(norm0, seed_mean, (((1,), (1,)), ((), ())),
                                 preferred_element_type=jnp.float32)  # (TM, 1)
    else:
        corr = jax.lax.dot_general(norm0, seeds, (((1,), (1,)), ((), ())),
                                   preferred_element_type=jnp.float32)  # (TM, B)
        corr = jnp.maximum(corr, 0.0)
        cm = jnp.mean(corr, axis=-1, keepdims=True)
    cm_ref[...] = cm

    ind = ind_ref[...]                                               # (TM, B) indicator
    s0_ref[...] += jax.lax.dot_general(ind, y, (((0,), (0,)), ((), ())),
                                       preferred_element_type=jnp.float32)
    s1_ref[...] += jax.lax.dot_general(ind * cm, y, (((0,), (0,)), ((), ())),
                                       preferred_element_type=jnp.float32)


# ----------------------------------------------------------------------------
# Kernel E: apply cormap and proto ->  out3 = y * proto + y * cormap
# ----------------------------------------------------------------------------
def apply_kernel(y_ref, cmap_ref, proto_ref, out3_ref):
    y = y_ref[...]
    out3_ref[...] = y * proto_ref[...] + y * cmap_ref[...]


# ----------------------------------------------------------------------------
# Parameter init (deterministic, Conv2d-like shapes (C_out, C_in, 1, 1)).
# ----------------------------------------------------------------------------
def init_params(key, C):
    ks = jax.random.split(key, 6)
    bound = 1.0 / (C ** 0.5)

    def conv_init(kw, kb):
        w = jax.random.uniform(kw, (C, C, 1, 1), jnp.float32, -bound, bound)
        b = jax.random.uniform(kb, (C,), jnp.float32, -bound, bound)
        return w, b

    wc, bc = conv_init(ks[0], ks[1])   # self.conv
    wq, bq = conv_init(ks[2], ks[3])   # self.query_transform
    wk, bk = conv_init(ks[4], ks[5])   # self.key_transform
    return dict(wc=wc, bc=bc, wq=wq, bq=bq, wk=wk, bk=bk)


# ----------------------------------------------------------------------------
# Forward wrapper.  Fresh nn.Module defaults to training=True (no ReLU in the
# correlation); set training=False for eval semantics.
# ----------------------------------------------------------------------------
@functools.partial(jax.jit, static_argnames=("training",))
def att_layer_forward(x_nchw, params, training=True):
    B, C, H, W = x_nchw.shape
    HW = H * W
    N = B * HW
    assert HW % 8 == 0, "HW must be a multiple of 8"
    # TODO(synk): pad HW to a multiple of 8 (masking padded rows in the max /
    # softmax / mean reductions) to support arbitrary spatial sizes.
    scale = 1.0 / (C ** 0.5)
    TM = _pick_row_tile(N, C)
    G = _pick_kv_group(B, HW)
    KVR = G * HW

    x_nc = jnp.transpose(x_nchw, (0, 2, 3, 1)).reshape(N, C).astype(jnp.float32)

    # (C_in, C_out) bf16 weights for the MXU; f32 biases.
    wc_t = params["wc"].reshape(C, C).T.astype(jnp.bfloat16)
    wq_t = params["wq"].reshape(C, C).T.astype(jnp.bfloat16)
    wk_t = params["wk"].reshape(C, C).T.astype(jnp.bfloat16)
    bc = params["bc"].reshape(1, C).astype(jnp.float32)
    bq = params["bq"].reshape(1, C).astype(jnp.float32)
    bk = params["bk"].reshape(1, C).astype(jnp.float32)

    const1 = lambda i: (0, 0)
    row1 = lambda i: (i, 0)

    # ---- Kernel A: conv+residual, q, k (single pass; q/k emitted bf16) ----
    y_nc, q_nc, k_nc = pl.pallas_call(
        conv_qk_kernel,
        out_shape=(jax.ShapeDtypeStruct((N, C), jnp.float32),
                   jax.ShapeDtypeStruct((N, C), jnp.bfloat16),
                   jax.ShapeDtypeStruct((N, C), jnp.bfloat16)),
        grid_spec=pltpu.PrefetchScalarGridSpec(
            num_scalar_prefetch=0,
            grid=(N // TM,),
            in_specs=[pl.BlockSpec((TM, C), row1),
                      pl.BlockSpec((C, C), const1),   # Wc (VMEM resident)
                      pl.BlockSpec((1, C), const1),   # bc
                      pl.BlockSpec((C, C), const1),   # Wq
                      pl.BlockSpec((1, C), const1),   # bq
                      pl.BlockSpec((C, C), const1),   # Wk
                      pl.BlockSpec((1, C), const1)],  # bk
            out_specs=(pl.BlockSpec((TM, C), row1),
                       pl.BlockSpec((TM, C), row1),
                       pl.BlockSpec((TM, C), row1))),
        compiler_params=pltpu.CompilerParams(
            dimension_semantics=("parallel",),
            vmem_limit_bytes=VMEM_LIMIT),
    )(x_nc, wc_t, bc, wq_t, bq, wk_t, bk)

    # ---- Kernel B: attention logits (streamed per-batch max, kv batched) ----
    logits_1n = pl.pallas_call(
        functools.partial(attn_logits_kernel, hw=HW, g=G, scale=scale, inv_b=1.0 / B),
        out_shape=jax.ShapeDtypeStruct((1, N), jnp.float32),
        grid_spec=pltpu.PrefetchScalarGridSpec(
            num_scalar_prefetch=0,
            grid=(N // TM, B // G),
            in_specs=[pl.BlockSpec((TM, C), lambda i, j: (i, 0)),    # q tile (bf16)
                      pl.BlockSpec((KVR, C), lambda i, j: (j, 0))],  # K group (bf16)
            out_specs=pl.BlockSpec((1, TM), lambda i, j: (0, i)),    # lane-dense logits
            scratch_shapes=[pltpu.VMEM((1, TM), jnp.float32)]),
        compiler_params=pltpu.CompilerParams(
            dimension_semantics=("parallel", "arbitrary"),
            vmem_limit_bytes=VMEM_LIMIT),
    )(q_nc, k_nc)

    # ---- Glue 1: tiny (B, HW) softmax + tie mask + selector / indicator ----
    logits = logits_1n.reshape(B, HW)
    xw = jax.nn.softmax(logits, axis=-1)
    mask_bhw = (xw == jnp.max(xw, axis=-1, keepdims=True)).astype(jnp.float32)
    eye_b = jnp.eye(B, dtype=jnp.float32)
    sel = (eye_b[:, :, None] * mask_bhw[None, :, :]).reshape(B, N)   # (B, N)
    ind = jnp.repeat(eye_b, HW, axis=0)                              # (N, B)

    # ---- Kernel C: seeds = sel @ normalize(y) (accumulated over row tiles) ----
    seeds = pl.pallas_call(
        seeds_kernel,
        out_shape=jax.ShapeDtypeStruct((B, C), jnp.float32),
        grid_spec=pltpu.PrefetchScalarGridSpec(
            num_scalar_prefetch=0,
            grid=(N // TM,),
            in_specs=[pl.BlockSpec((TM, C), row1),
                      pl.BlockSpec((B, TM), lambda i: (0, i))],
            out_specs=pl.BlockSpec((B, C), const1)),
        compiler_params=pltpu.CompilerParams(
            dimension_semantics=("arbitrary",),
            vmem_limit_bytes=VMEM_LIMIT),
    )(y_nc, sel)

    # ---- Kernel D: correlation map + per-batch partial sums ----
    cm_n1, s0, s1 = pl.pallas_call(
        functools.partial(cormap_stats_kernel, training=training),
        out_shape=(jax.ShapeDtypeStruct((N, 1), jnp.float32),
                   jax.ShapeDtypeStruct((B, C), jnp.float32),
                   jax.ShapeDtypeStruct((B, C), jnp.float32)),
        grid_spec=pltpu.PrefetchScalarGridSpec(
            num_scalar_prefetch=0,
            grid=(N // TM,),
            in_specs=[pl.BlockSpec((TM, C), row1),
                      pl.BlockSpec((TM, B), row1),
                      pl.BlockSpec((B, C), const1)],
            out_specs=(pl.BlockSpec((TM, 1), row1),
                       pl.BlockSpec((B, C), const1),
                       pl.BlockSpec((B, C), const1))),
        compiler_params=pltpu.CompilerParams(
            dimension_semantics=("arbitrary",),
            vmem_limit_bytes=VMEM_LIMIT),
    )(y_nc, ind, seeds)

    # ---- Glue 2: per-batch min-max normalization (exact division) + proto ----
    cm_bhw = cm_n1.reshape(B, HW)
    mn = jnp.min(cm_bhw, axis=1, keepdims=True)                      # (B, 1)
    mx = jnp.max(cm_bhw, axis=1, keepdims=True)                      # (B, 1)
    inv = 1.0 / (mx - mn + 1e-12)
    cormap_rows = ((cm_bhw - mn) * inv).reshape(N, 1)
    # proto1 = mean over all N rows of y * cormap, reconstructed from S0/S1.
    proto = jnp.sum((s1 - mn * s0) * inv, axis=0, keepdims=True) * (1.0 / N)  # (1, C)

    # ---- Kernel E: out3 = y * proto + y * cormap ----
    out3_nc = pl.pallas_call(
        apply_kernel,
        out_shape=jax.ShapeDtypeStruct((N, C), jnp.float32),
        grid_spec=pltpu.PrefetchScalarGridSpec(
            num_scalar_prefetch=0,
            grid=(N // TM,),
            in_specs=[pl.BlockSpec((TM, C), row1),
                      pl.BlockSpec((TM, 1), row1),
                      pl.BlockSpec((1, C), const1)],
            out_specs=pl.BlockSpec((TM, C), row1)),
        compiler_params=pltpu.CompilerParams(
            dimension_semantics=("parallel",),
            vmem_limit_bytes=VMEM_LIMIT),
    )(y_nc, cormap_rows, proto)

    x5_out = y_nc.reshape(B, H, W, C).transpose(0, 3, 1, 2)          # (B, C, H, W)
    out3 = out3_nc.reshape(B, H, W, C).transpose(0, 3, 1, 2)         # (B, C, H, W)
    proto1 = proto.reshape(1, C, 1, 1)
    mask_out = mask_bhw.reshape(B, 1, H, W)
    return x5_out, proto1, out3, mask_out


if __name__ == "__main__":
    key = jax.random.PRNGKey(0)
    kx, kp = jax.random.split(key)
    B, C, H, W = 2, 128, 16, 16        # N = 512 -> 2 q-row tiles, 2 kv steps
    x = jax.random.normal(kx, (B, C, H, W), jnp.float32)
    params = init_params(kp, C)

    outs = att_layer_forward(x, params, training=True)
    jax.block_until_ready(outs)

    x5_o, proto1_o, out3_o, mask_o = outs
    assert x5_o.shape == (B, C, H, W)
    assert proto1_o.shape == (1, C, 1, 1)
    assert out3_o.shape == (B, C, H, W)
    assert mask_o.shape == (B, 1, H, W)
    print("KERNEL_OK")
</pallas_src>

<mosaic_0001>
module attributes {stable_mosaic.version = 11 : i64} {
  func.func @conv_qk_kernel(%arg0: i32, %arg1: memref<256x128xf32, #tpu.memory_space<vmem>>, %arg2: memref<128x128xbf16, #tpu.memory_space<vmem>>, %arg3: memref<1x128xf32, #tpu.memory_space<vmem>>, %arg4: memref<128x128xbf16, #tpu.memory_space<vmem>>, %arg5: memref<1x128xf32, #tpu.memory_space<vmem>>, %arg6: memref<128x128xbf16, #tpu.memory_space<vmem>>, %arg7: memref<1x128xf32, #tpu.memory_space<vmem>>, %arg8: memref<256x128xf32, #tpu.memory_space<vmem>>, %arg9: memref<256x128xbf16, #tpu.memory_space<vmem>>, %arg10: memref<256x128xbf16, #tpu.memory_space<vmem>>) attributes {dimension_semantics = [#tpu.dimension_semantics<parallel>], iteration_bounds = array<i64: 2>, scalar_prefetch = 0 : i64, scratch_operands = 0 : i64, tpu.core_type = #tpu.core_type<tc>, window_params = [{transform_indices = @transform_0, window_bounds = array<i64: 256, 128>}, {pipeline_mode = #tpu.pipeline_mode<synchronous>, transform_indices = @transform_1, window_bounds = array<i64: 128, 128>}, {pipeline_mode = #tpu.pipeline_mode<synchronous>, transform_indices = @transform_2, window_bounds = array<i64: 1, 128>}, {pipeline_mode = #tpu.pipeline_mode<synchronous>, transform_indices = @transform_3, window_bounds = array<i64: 128, 128>}, {pipeline_mode = #tpu.pipeline_mode<synchronous>, transform_indices = @transform_4, window_bounds = array<i64: 1, 128>}, {pipeline_mode = #tpu.pipeline_mode<synchronous>, transform_indices = @transform_5, window_bounds = array<i64: 128, 128>}, {pipeline_mode = #tpu.pipeline_mode<synchronous>, transform_indices = @transform_6, window_bounds = array<i64: 1, 128>}, {transform_indices = @transform_7, window_bounds = array<i64: 256, 128>}, {transform_indices = @transform_8, window_bounds = array<i64: 256, 128>}, {transform_indices = @transform_9, window_bounds = array<i64: 256, 128>}]} {
    %c0 = arith.constant 0 : index
    %c0_0 = arith.constant 0 : index
    %0 = vector.load %arg1[%c0, %c0_0] : memref<256x128xf32, #tpu.memory_space<vmem>>, vector<256x128xf32>
    %1 = arith.truncf %0 : vector<256x128xf32> to vector<256x128xbf16>
    %c0_1 = arith.constant 0 : index
    %c0_2 = arith.constant 0 : index
    %2 = vector.load %arg2[%c0_1, %c0_2] : memref<128x128xbf16, #tpu.memory_space<vmem>>, vector<128x128xbf16>
    %cst = arith.constant dense<0.000000e+00> : vector<256x128xf32>
    %3 = tpu.matmul %1, %2, %cst {dimension_numbers = #tpu.dot_dimension_numbers<[1], [0], [0], [1], [0, 0, 1, 1], [], []>} : vector<256x128xbf16>, vector<128x128xbf16>, vector<256x128xf32> -> vector<256x128xf32>
    %c0_3 = arith.constant 0 : index
    %c0_4 = arith.constant 0 : index
    %4 = vector.load %arg3[%c0_3, %c0_4] : memref<1x128xf32, #tpu.memory_space<vmem>>, vector<1x128xf32>
    %5 = vector.broadcast %4 : vector<1x128xf32> to vector<256x128xf32>
    %6 = arith.addf %3, %5 : vector<256x128xf32>
    %7 = arith.addf %6, %0 : vector<256x128xf32>
    %c0_5 = arith.constant 0 : index
    %c0_6 = arith.constant 0 : index
    %8 = vector.load %arg8[%c0_5, %c0_6] : memref<256x128xf32, #tpu.memory_space<vmem>>, vector<256x128xf32>
    tpu.vector_store %arg8[%c0_5, %c0_6], %7 {strides = array<i32>} : memref<256x128xf32, #tpu.memory_space<vmem>>, vector<256x128xf32>,
    %9 = arith.truncf %7 : vector<256x128xf32> to vector<256x128xbf16>
    %c0_7 = arith.constant 0 : index
    %c0_8 = arith.constant 0 : index
    %10 = vector.load %arg4[%c0_7, %c0_8] : memref<128x128xbf16, #tpu.memory_space<vmem>>, vector<128x128xbf16>
    %cst_9 = arith.constant dense<0.000000e+00> : vector<256x128xf32>
    %11 = tpu.matmul %9, %10, %cst_9 {dimension_numbers = #tpu.dot_dimension_numbers<[1], [0], [0], [1], [0, 0, 1, 1], [], []>} : vector<256x128xbf16>, vector<128x128xbf16>, vector<256x128xf32> -> vector<256x128xf32>
    %c0_10 = arith.constant 0 : index
    %c0_11 = arith.constant 0 : index
    %12 = vector.load %arg5[%c0_10, %c0_11] : memref<1x128xf32, #tpu.memory_space<vmem>>, vector<1x128xf32>
    %13 = vector.broadcast %12 : vector<1x128xf32> to vector<256x128xf32>
    %14 = arith.addf %11, %13 : vector<256x128xf32>
    %15 = arith.truncf %14 : vector<256x128xf32> to vector<256x128xbf16>
    %c0_12 = arith.constant 0 : index
    %c0_13 = arith.constant 0 : index
    %16 = vector.load %arg9[%c0_12, %c0_13] : memref<256x128xbf16, #tpu.memory_space<vmem>>, vector<256x128xbf16>
    tpu.vector_store %arg9[%c0_12, %c0_13], %15 {strides = array<i32>} : memref<256x128xbf16, #tpu.memory_space<vmem>>, vector<256x128xbf16>,
    %c0_14 = arith.constant 0 : index
    %c0_15 = arith.constant 0 : index
    %17 = vector.load %arg6[%c0_14, %c0_15] : memref<128x128xbf16, #tpu.memory_space<vmem>>, vector<128x128xbf16>
    %cst_16 = arith.constant dense<0.000000e+00> : vector<256x128xf32>
    %18 = tpu.matmul %9, %17, %cst_16 {dimension_numbers = #tpu.dot_dimension_numbers<[1], [0], [0], [1], [0, 0, 1, 1], [], []>} : vector<256x128xbf16>, vector<128x128xbf16>, vector<256x128xf32> -> vector<256x128xf32>
    %c0_17 = arith.constant 0 : index
    %c0_18 = arith.constant 0 : index
    %19 = vector.load %arg7[%c0_17, %c0_18] : memref<1x128xf32, #tpu.memory_space<vmem>>, vector<1x128xf32>
    %20 = vector.broadcast %19 : vector<1x128xf32> to vector<256x128xf32>
    %21 = arith.addf %18, %20 : vector<256x128xf32>
    %22 = arith.truncf %21 : vector<256x128xf32> to vector<256x128xbf16>
    %c0_19 = arith.constant 0 : index
    %c0_20 = arith.constant 0 : index
    %23 = vector.load %arg10[%c0_19, %c0_20] : memref<256x128xbf16, #tpu.memory_space<vmem>>, vector<256x128xbf16>
    tpu.vector_store %arg10[%c0_19, %c0_20], %22 {strides = array<i32>} : memref<256x128xbf16, #tpu.memory_space<vmem>>, vector<256x128xbf16>,
    return
  }
  func.func @transform_0(%arg0: i32) -> (i32, i32) {
    %c0_i32 = arith.constant 0 : i32
    %c0_i32_0 = arith.constant 0 : i32
    return %arg0, %c0_i32 : i32, i32
  }
  func.func @transform_1(%arg0: i32) -> (i32, i32) {
    %c0_i32 = arith.constant 0 : i32
    %c0_i32_0 = arith.constant 0 : i32
    %c0_i32_1 = arith.constant 0 : i32
    return %c0_i32, %c0_i32_0 : i32, i32
  }
  func.func @transform_2(%arg0: i32) -> (i32, i32) {
    %c0_i32 = arith.constant 0 : i32
    %c0_i32_0 = arith.constant 0 : i32
    %c0_i32_1 = arith.constant 0 : i32
    return %c0_i32, %c0_i32_0 : i32, i32
  }
  func.func @transform_3(%arg0: i32) -> (i32, i32) {
    %c0_i32 = arith.constant 0 : i32
    %c0_i32_0 = arith.constant 0 : i32
    %c0_i32_1 = arith.constant 0 : i32
    return %c0_i32, %c0_i32_0 : i32, i32
  }
  func.func @transform_4(%arg0: i32) -> (i32, i32) {
    %c0_i32 = arith.constant 0 : i32
    %c0_i32_0 = arith.constant 0 : i32
    %c0_i32_1 = arith.constant 0 : i32
    return %c0_i32, %c0_i32_0 : i32, i32
  }
  func.func @transform_5(%arg0: i32) -> (i32, i32) {
    %c0_i32 = arith.constant 0 : i32
    %c0_i32_0 = arith.constant 0 : i32
    %c0_i32_1 = arith.constant 0 : i32
    return %c0_i32, %c0_i32_0 : i32, i32
  }
  func.func @transform_6(%arg0: i32) -> (i32, i32) {
    %c0_i32 = arith.constant 0 : i32
    %c0_i32_0 = arith.constant 0 : i32
    %c0_i32_1 = arith.constant 0 : i32
    return %c0_i32, %c0_i32_0 : i32, i32
  }
  func.func @transform_7(%arg0: i32) -> (i32, i32) {
    %c0_i32 = arith.constant 0 : i32
    %c0_i32_0 = arith.constant 0 : i32
    return %arg0, %c0_i32 : i32, i32
  }
  func.func @transform_8(%arg0: i32) -> (i32, i32) {
    %c0_i32 = arith.constant 0 : i32
    %c0_i32_0 = arith.constant 0 : i32
    return %arg0, %c0_i32 : i32, i32
  }
  func.func @transform_9(%arg0: i32) -> (i32, i32) {
    %c0_i32 = arith.constant 0 : i32
    %c0_i32_0 = arith.constant 0 : i32
    return %arg0, %c0_i32 : i32, i32
  }
}

module attributes {stable_mosaic.version = 11 : i64} {
  func.func @attn_logits_kernel(%arg0: i32, %arg1: i32, %arg2: memref<256x128xbf16, #tpu.memory_space<vmem>>, %arg3: memref<256x128xbf16, #tpu.memory_space<vmem>>, %arg4: memref<1x256xf32, #tpu.memory_space<vmem>>, %arg5: memref<1x256xf32, #tpu.memory_space<vmem>>) attributes {dimension_semantics = [#tpu.dimension_semantics<parallel>, #tpu.dimension_semantics<arbitrary>], iteration_bounds = array<i64: 2, 2>, scalar_prefetch = 0 : i64, scratch_operands = 1 : i64, tpu.core_type = #tpu.core_type<tc>, window_params = [{transform_indices = @transform_0, window_bounds = array<i64: 256, 128>}, {transform_indices = @transform_1, window_bounds = array<i64: 256, 128>}, {transform_indices = @transform_2, window_bounds = array<i64: 1, 256>}]} {
    %c0_i32 = arith.constant 0 : i32
    %0 = arith.cmpi eq, %arg1, %c0_i32 : i32
    %1 = arith.extui %0 : i1 to i32
    %c0_i32_0 = arith.constant 0 : i32
    %2 = arith.cmpi ne, %1, %c0_i32_0 : i32
    scf.if %2 {
      %cst_11 = arith.constant 0.000000e+00 : f32
      %16 = vector.broadcast %cst_11 : f32 to vector<1x256xf32>
      %c0_12 = arith.constant 0 : index
      %c0_13 = arith.constant 0 : index
      %17 = vector.load %arg5[%c0_12, %c0_13] : memref<1x256xf32, #tpu.memory_space<vmem>>, vector<1x256xf32>
      tpu.vector_store %arg5[%c0_12, %c0_13], %16 {strides = array<i32>} : memref<1x256xf32, #tpu.memory_space<vmem>>, vector<1x256xf32>,
    } else {
    }
    %c0 = arith.constant 0 : index
    %c0_1 = arith.constant 0 : index
    %3 = vector.load %arg3[%c0, %c0_1] : memref<256x128xbf16, #tpu.memory_space<vmem>>, vector<256x128xbf16>
    %c0_2 = arith.constant 0 : index
    %c0_3 = arith.constant 0 : index
    %4 = vector.load %arg2[%c0_2, %c0_3] : memref<256x128xbf16, #tpu.memory_space<vmem>>, vector<256x128xbf16>
    %cst = arith.constant dense<0.000000e+00> : vector<256x256xf32>
    %5 = tpu.matmul %3, %4, %cst {dimension_numbers = #tpu.dot_dimension_numbers<[1], [1], [0], [0], [0, 0, 1, 0], [], []>} : vector<256x128xbf16>, vector<256x128xbf16>, vector<256x256xf32> -> vector<256x256xf32>
    %cst_4 = arith.constant 0.0883883461 : f32
    %6 = vector.broadcast %cst_4 : f32 to vector<256x256xf32>
    %7 = arith.mulf %5, %6 : vector<256x256xf32>
    %c0_5 = arith.constant 0 : index
    %c0_6 = arith.constant 0 : index
    %8 = vector.load %arg5[%c0_5, %c0_6] : memref<1x256xf32, #tpu.memory_space<vmem>>, vector<1x256xf32>
    %cst_7 = arith.constant dense<0xFF800000> : vector<256xf32>
    %9 = vector.multi_reduction <maximumf>, %7, %cst_7 [0] : vector<256x256xf32> to vector<256xf32>
    %10 = vector.shape_cast %9 : vector<256xf32> to vector<1x256xf32>
    %11 = arith.addf %8, %10 : vector<1x256xf32>
    %c0_8 = arith.constant 0 : index
    %c0_9 = arith.constant 0 : index
    %12 = vector.load %arg5[%c0_8, %c0_9] : memref<1x256xf32, #tpu.memory_space<vmem>>, vector<1x256xf32>
    tpu.vector_store %arg5[%c0_8, %c0_9], %11 {strides = array<i32>} : memref<1x256xf32, #tpu.memory_space<vmem>>, vector<1x256xf32>,
    %c1_i32 = arith.constant 1 : i32
    %13 = arith.cmpi eq, %arg1, %c1_i32 : i32
    %14 = arith.extui %13 : i1 to i32
    %c0_i32_10 = arith.constant 0 : i32
    %15 = arith.cmpi ne, %14, %c0_i32_10 : i32
    scf.if %15 {
      %c0_11 = arith.constant 0 : index
      %c0_12 = arith.constant 0 : index
      %16 = vector.load %arg5[%c0_11, %c0_12] : memref<1x256xf32, #tpu.memory_space<vmem>>, vector<1x256xf32>
      %cst_13 = arith.constant 5.000000e-01 : f32
      %17 = vector.broadcast %cst_13 : f32 to vector<1x256xf32>
      %18 = arith.mulf %16, %17 : vector<1x256xf32>
      %c0_14 = arith.constant 0 : index
      %c0_15 = arith.constant 0 : index
      %19 = vector.load %arg4[%c0_14, %c0_15] : memref<1x256xf32, #tpu.memory_space<vmem>>, vector<1x256xf32>
      tpu.vector_store %arg4[%c0_14, %c0_15], %18 {strides = array<i32>} : memref<1x256xf32, #tpu.memory_space<vmem>>, vector<1x256xf32>,
    } else {
    }
    return
  }
  func.func @transform_0(%arg0: i32, %arg1: i32) -> (i32, i32) {
    %c0_i32 = arith.constant 0 : i32
    %c0_i32_0 = arith.constant 0 : i32
    return %arg0, %c0_i32 : i32, i32
  }
  func.func @transform_1(%arg0: i32, %arg1: i32) -> (i32, i32) {
    %c0_i32 = arith.constant 0 : i32
    %c0_i32_0 = arith.constant 0 : i32
    return %arg1, %c0_i32 : i32, i32
  }
  func.func @transform_2(%arg0: i32, %arg1: i32) -> (i32, i32) {
    %c0_i32 = arith.constant 0 : i32
    %c0_i32_0 = arith.constant 0 : i32
    return %c0_i32, %arg0 : i32, i32
  }
}

module attributes {stable_mosaic.version = 11 : i64} {
  func.func @seeds_kernel(%arg0: i32, %arg1: memref<256x128xf32, #tpu.memory_space<vmem>>, %arg2: memref<2x256xf32, #tpu.memory_space<vmem>>, %arg3: memref<2x128xf32, #tpu.memory_space<vmem>>) attributes {dimension_semantics = [#tpu.dimension_semantics<arbitrary>], iteration_bounds = array<i64: 2>, scalar_prefetch = 0 : i64, scratch_operands = 0 : i64, tpu.core_type = #tpu.core_type<tc>, window_params = [{transform_indices = @transform_0, window_bounds = array<i64: 256, 128>}, {transform_indices = @transform_1, window_bounds = array<i64: 2, 256>}, {pipeline_mode = #tpu.pipeline_mode<synchronous>, transform_indices = @transform_2, window_bounds = array<i64: 2, 128>}]} {
    %c0_i32 = arith.constant 0 : i32
    %0 = arith.cmpi eq, %arg0, %c0_i32 : i32
    %1 = arith.extui %0 : i1 to i32
    %c0_i32_0 = arith.constant 0 : i32
    %2 = arith.cmpi ne, %1, %c0_i32_0 : i32
    scf.if %2 {
      %cst_10 = arith.constant 0.000000e+00 : f32
      %17 = vector.broadcast %cst_10 : f32 to vector<2x128xf32>
      %c0_11 = arith.constant 0 : index
      %c0_12 = arith.constant 0 : index
      %18 = vector.load %arg3[%c0_11, %c0_12] : memref<2x128xf32, #tpu.memory_space<vmem>>, vector<2x128xf32>
      tpu.vector_store %arg3[%c0_11, %c0_12], %17 {strides = array<i32>} : memref<2x128xf32, #tpu.memory_space<vmem>>, vector<2x128xf32>,
    } else {
    }
    %c0 = arith.constant 0 : index
    %c0_1 = arith.constant 0 : index
    %3 = vector.load %arg1[%c0, %c0_1] : memref<256x128xf32, #tpu.memory_space<vmem>>, vector<256x128xf32>
    %4 = arith.mulf %3, %3 : vector<256x128xf32>
    %cst = arith.constant dense<0.000000e+00> : vector<256xf32>
    %5 = vector.multi_reduction <add>, %4, %cst [1] : vector<256x128xf32> to vector<256xf32>
    %6 = vector.shape_cast %5 : vector<256xf32> to vector<256x1xf32>
    %cst_2 = arith.constant 1.000000e-24 : f32
    %7 = vector.broadcast %cst_2 : f32 to vector<256x1xf32>
    %8 = arith.maximumf %6, %7 : vector<256x1xf32>
    %9 = math.rsqrt %8 : vector<256x1xf32>
    %10 = vector.broadcast %9 : vector<256x1xf32> to vector<256x128xf32>
    %11 = arith.mulf %3, %10 : vector<256x128xf32>
    %c0_3 = arith.constant 0 : index
    %c0_4 = arith.constant 0 : index
    %12 = vector.load %arg3[%c0_3, %c0_4] : memref<2x128xf32, #tpu.memory_space<vmem>>, vector<2x128xf32>
    %c0_5 = arith.constant 0 : index
    %c0_6 = arith.constant 0 : index
    %13 = vector.load %arg2[%c0_5, %c0_6] : memref<2x256xf32, #tpu.memory_space<vmem>>, vector<2x256xf32>
    %cst_7 = arith.constant dense<0.000000e+00> : vector<2x128xf32>
    %14 = tpu.matmul %13, %11, %cst_7 {dimension_numbers = #tpu.dot_dimension_numbers<[1], [0], [0], [1], [0, 0, 1, 1], [], []>} : vector<2x256xf32>, vector<256x128xf32>, vector<2x128xf32> -> vector<2x128xf32>
    %15 = arith.addf %12, %14 : vector<2x128xf32>
    %c0_8 = arith.constant 0 : index
    %c0_9 = arith.constant 0 : index
    %16 = vector.load %arg3[%c0_8, %c0_9] : memref<2x128xf32, #tpu.memory_space<vmem>>, vector<2x128xf32>
    tpu.vector_store %arg3[%c0_8, %c0_9], %15 {strides = array<i32>} : memref<2x128xf32, #tpu.memory_space<vmem>>, vector<2x128xf32>,
    return
  }
  func.func @transform_0(%arg0: i32) -> (i32, i32) {
    %c0_i32 = arith.constant 0 : i32
    %c0_i32_0 = arith.constant 0 : i32
    return %arg0, %c0_i32 : i32, i32
  }
  func.func @transform_1(%arg0: i32) -> (i32, i32) {
    %c0_i32 = arith.constant 0 : i32
    %c0_i32_0 = arith.constant 0 : i32
    return %c0_i32, %arg0 : i32, i32
  }
  func.func @transform_2(%arg0: i32) -> (i32, i32) {
    %c0_i32 = arith.constant 0 : i32
    %c0_i32_0 = arith.constant 0 : i32
    %c0_i32_1 = arith.constant 0 : i32
    return %c0_i32, %c0_i32_0 : i32, i32
  }
}

module attributes {stable_mosaic.version = 11 : i64} {
  func.func @cormap_stats_kernel(%arg0: i32, %arg1: memref<256x128xf32, #tpu.memory_space<vmem>>, %arg2: memref<256x2xf32, #tpu.memory_space<vmem>>, %arg3: memref<2x128xf32, #tpu.memory_space<vmem>>, %arg4: memref<256x1xf32, #tpu.memory_space<vmem>>, %arg5: memref<2x128xf32, #tpu.memory_space<vmem>>, %arg6: memref<2x128xf32, #tpu.memory_space<vmem>>) attributes {dimension_semantics = [#tpu.dimension_semantics<arbitrary>], iteration_bounds = array<i64: 2>, scalar_prefetch = 0 : i64, scratch_operands = 0 : i64, tpu.core_type = #tpu.core_type<tc>, window_params = [{transform_indices = @transform_0, window_bounds = array<i64: 256, 128>}, {transform_indices = @transform_1, window_bounds = array<i64: 256, 2>}, {pipeline_mode = #tpu.pipeline_mode<synchronous>, transform_indices = @transform_2, window_bounds = array<i64: 2, 128>}, {transform_indices = @transform_3, window_bounds = array<i64: 256, 1>}, {pipeline_mode = #tpu.pipeline_mode<synchronous>, transform_indices = @transform_4, window_bounds = array<i64: 2, 128>}, {pipeline_mode = #tpu.pipeline_mode<synchronous>, transform_indices = @transform_5, window_bounds = array<i64: 2, 128>}]} {
    %c0_i32 = arith.constant 0 : i32
    %0 = arith.cmpi eq, %arg0, %c0_i32 : i32
    %1 = arith.extui %0 : i1 to i32
    %c0_i32_0 = arith.constant 0 : i32
    %2 = arith.cmpi ne, %1, %c0_i32_0 : i32
    scf.if %2 {
      %cst_22 = arith.constant 0.000000e+00 : f32
      %30 = vector.broadcast %cst_22 : f32 to vector<2x128xf32>
      %c0_23 = arith.constant 0 : index
      %c0_24 = arith.constant 0 : index
      %31 = vector.load %arg5[%c0_23, %c0_24] : memref<2x128xf32, #tpu.memory_space<vmem>>, vector<2x128xf32>
      tpu.vector_store %arg5[%c0_23, %c0_24], %30 {strides = array<i32>} : memref<2x128xf32, #tpu.memory_space<vmem>>, vector<2x128xf32>,
      %cst_25 = arith.constant 0.000000e+00 : f32
      %32 = vector.broadcast %cst_25 : f32 to vector<2x128xf32>
      %c0_26 = arith.constant 0 : index
      %c0_27 = arith.constant 0 : index
      %33 = vector.load %arg6[%c0_26, %c0_27] : memref<2x128xf32, #tpu.memory_space<vmem>>, vector<2x128xf32>
      tpu.vector_store %arg6[%c0_26, %c0_27], %32 {strides = array<i32>} : memref<2x128xf32, #tpu.memory_space<vmem>>, vector<2x128xf32>,
    } else {
    }
    %c0 = arith.constant 0 : index
    %c0_1 = arith.constant 0 : index
    %3 = vector.load %arg1[%c0, %c0_1] : memref<256x128xf32, #tpu.memory_space<vmem>>, vector<256x128xf32>
    %4 = arith.mulf %3, %3 : vector<256x128xf32>
    %cst = arith.constant dense<0.000000e+00> : vector<256xf32>
    %5 = vector.multi_reduction <add>, %4, %cst [1] : vector<256x128xf32> to vector<256xf32>
    %6 = vector.shape_cast %5 : vector<256xf32> to vector<256x1xf32>
    %cst_2 = arith.constant 1.000000e-24 : f32
    %7 = vector.broadcast %cst_2 : f32 to vector<256x1xf32>
    %8 = arith.maximumf %6, %7 : vector<256x1xf32>
    %9 = math.rsqrt %8 : vector<256x1xf32>
    %10 = vector.broadcast %9 : vector<256x1xf32> to vector<256x128xf32>
    %11 = arith.mulf %3, %10 : vector<256x128xf32>
    %c0_3 = arith.constant 0 : index
    %c0_4 = arith.constant 0 : index
    %12 = vector.load %arg3[%c0_3, %c0_4] : memref<2x128xf32, #tpu.memory_space<vmem>>, vector<2x128xf32>
    %cst_5 = arith.constant dense<0.000000e+00> : vector<128xf32>
    %13 = vector.multi_reduction <add>, %12, %cst_5 [0] : vector<2x128xf32> to vector<128xf32>
    %14 = vector.shape_cast %13 : vector<128xf32> to vector<1x128xf32>
    %cst_6 = arith.constant 2.000000e+00 : f32
    %15 = vector.broadcast %cst_6 : f32 to vector<1x128xf32>
    %16 = arith.divf %14, %15 : vector<1x128xf32>
    %cst_7 = arith.constant dense<0.000000e+00> : vector<256x1xf32>
    %17 = tpu.matmul %11, %16, %cst_7 {dimension_numbers = #tpu.dot_dimension_numbers<[1], [1], [0], [0], [0, 0, 1, 0], [], []>} : vector<256x128xf32>, vector<1x128xf32>, vector<256x1xf32> -> vector<256x1xf32>
    %c0_8 = arith.constant 0 : index
    %c0_9 = arith.constant 0 : index
    %18 = vector.load %arg4[%c0_8, %c0_9] : memref<256x1xf32, #tpu.memory_space<vmem>>, vector<256x1xf32>
    tpu.vector_store %arg4[%c0_8, %c0_9], %17 {strides = array<i32>} : memref<256x1xf32, #tpu.memory_space<vmem>>, vector<256x1xf32>,
    %c0_10 = arith.constant 0 : index
    %c0_11 = arith.constant 0 : index
    %19 = vector.load %arg2[%c0_10, %c0_11] : memref<256x2xf32, #tpu.memory_space<vmem>>, vector<256x2xf32>
    %c0_12 = arith.constant 0 : index
    %c0_13 = arith.constant 0 : index
    %20 = vector.load %arg5[%c0_12, %c0_13] : memref<2x128xf32, #tpu.memory_space<vmem>>, vector<2x128xf32>
    %cst_14 = arith.constant dense<0.000000e+00> : vector<2x128xf32>
    %21 = tpu.matmul %19, %3, %cst_14 {dimension_numbers = #tpu.dot_dimension_numbers<[0], [0], [1], [1], [0, 1, 1, 1], [], []>} : vector<256x2xf32>, vector<256x128xf32>, vector<2x128xf32> -> vector<2x128xf32>
    %22 = arith.addf %20, %21 : vector<2x128xf32>
    %c0_15 = arith.constant 0 : index
    %c0_16 = arith.constant 0 : index
    %23 = vector.load %arg5[%c0_15, %c0_16] : memref<2x128xf32, #tpu.memory_space<vmem>>, vector<2x128xf32>
    tpu.vector_store %arg5[%c0_15, %c0_16], %22 {strides = array<i32>} : memref<2x128xf32, #tpu.memory_space<vmem>>, vector<2x128xf32>,
    %c0_17 = arith.constant 0 : index
    %c0_18 = arith.constant 0 : index
    %24 = vector.load %arg6[%c0_17, %c0_18] : memref<2x128xf32, #tpu.memory_space<vmem>>, vector<2x128xf32>
    %25 = vector.broadcast %17 : vector<256x1xf32> to vector<256x2xf32>
    %26 = arith.mulf %19, %25 : vector<256x2xf32>
    %cst_19 = arith.constant dense<0.000000e+00> : vector<2x128xf32>
    %27 = tpu.matmul %26, %3, %cst_19 {dimension_numbers = #tpu.dot_dimension_numbers<[0], [0], [1], [1], [0, 1, 1, 1], [], []>} : vector<256x2xf32>, vector<256x128xf32>, vector<2x128xf32> -> vector<2x128xf32>
    %28 = arith.addf %24, %27 : vector<2x128xf32>
    %c0_20 = arith.constant 0 : index
    %c0_21 = arith.constant 0 : index
    %29 = vector.load %arg6[%c0_20, %c0_21] : memref<2x128xf32, #tpu.memory_space<vmem>>, vector<2x128xf32>
    tpu.vector_store %arg6[%c0_20, %c0_21], %28 {strides = array<i32>} : memref<2x128xf32, #tpu.memory_space<vmem>>, vector<2x128xf32>,
    return
  }
  func.func @transform_0(%arg0: i32) -> (i32, i32) {
    %c0_i32 = arith.constant 0 : i32
    %c0_i32_0 = arith.constant 0 : i32
    return %arg0, %c0_i32 : i32, i32
  }
  func.func @transform_1(%arg0: i32) -> (i32, i32) {
    %c0_i32 = arith.constant 0 : i32
    %c0_i32_0 = arith.constant 0 : i32
    return %arg0, %c0_i32 : i32, i32
  }
  func.func @transform_2(%arg0: i32) -> (i32, i32) {
    %c0_i32 = arith.constant 0 : i32
    %c0_i32_0 = arith.constant 0 : i32
    %c0_i32_1 = arith.constant 0 : i32
    return %c0_i32, %c0_i32_0 : i32, i32
  }
  func.func @transform_3(%arg0: i32) -> (i32, i32) {
    %c0_i32 = arith.constant 0 : i32
    %c0_i32_0 = arith.constant 0 : i32
    return %arg0, %c0_i32 : i32, i32
  }
  func.func @transform_4(%arg0: i32) -> (i32, i32) {
    %c0_i32 = arith.constant 0 : i32
    %c0_i32_0 = arith.constant 0 : i32
    %c0_i32_1 = arith.constant 0 : i32
    return %c0_i32, %c0_i32_0 : i32, i32
  }
  func.func @transform_5(%arg0: i32) -> (i32, i32) {
    %c0_i32 = arith.constant 0 : i32
    %c0_i32_0 = arith.constant 0 : i32
    %c0_i32_1 = arith.constant 0 : i32
    return %c0_i32, %c0_i32_0 : i32, i32
  }
}

module attributes {stable_mosaic.version = 11 : i64} {
  func.func @apply_kernel(%arg0: i32, %arg1: memref<256x128xf32, #tpu.memory_space<vmem>>, %arg2: memref<256x1xf32, #tpu.memory_space<vmem>>, %arg3: memref<1x128xf32, #tpu.memory_space<vmem>>, %arg4: memref<256x128xf32, #tpu.memory_space<vmem>>) attributes {dimension_semantics = [#tpu.dimension_semantics<parallel>], iteration_bounds = array<i64: 2>, scalar_prefetch = 0 : i64, scratch_operands = 0 : i64, tpu.core_type = #tpu.core_type<tc>, window_params = [{transform_indices = @transform_0, window_bounds = array<i64: 256, 128>}, {transform_indices = @transform_1, window_bounds = array<i64: 256, 1>}, {pipeline_mode = #tpu.pipeline_mode<synchronous>, transform_indices = @transform_2, window_bounds = array<i64: 1, 128>}, {transform_indices = @transform_3, window_bounds = array<i64: 256, 128>}]} {
    %c0 = arith.constant 0 : index
    %c0_0 = arith.constant 0 : index
    %0 = vector.load %arg1[%c0, %c0_0] : memref<256x128xf32, #tpu.memory_space<vmem>>, vector<256x128xf32>
    %c0_1 = arith.constant 0 : index
    %c0_2 = arith.constant 0 : index
    %1 = vector.load %arg3[%c0_1, %c0_2] : memref<1x128xf32, #tpu.memory_space<vmem>>, vector<1x128xf32>
    %2 = vector.broadcast %1 : vector<1x128xf32> to vector<256x128xf32>
    %3 = arith.mulf %0, %2 : vector<256x128xf32>
    %c0_3 = arith.constant 0 : index
    %c0_4 = arith.constant 0 : index
    %4 = vector.load %arg2[%c0_3, %c0_4] : memref<256x1xf32, #tpu.memory_space<vmem>>, vector<256x1xf32>
    %5 = vector.broadcast %4 : vector<256x1xf32> to vector<256x128xf32>
    %6 = arith.mulf %0, %5 : vector<256x128xf32>
    %7 = arith.addf %3, %6 : vector<256x128xf32>
    %c0_5 = arith.constant 0 : index
    %c0_6 = arith.constant 0 : index
    %8 = vector.load %arg4[%c0_5, %c0_6] : memref<256x128xf32, #tpu.memory_space<vmem>>, vector<256x128xf32>
    tpu.vector_store %arg4[%c0_5, %c0_6], %7 {strides = array<i32>} : memref<256x128xf32, #tpu.memory_space<vmem>>, vector<256x128xf32>,
    return
  }
  func.func @transform_0(%arg0: i32) -> (i32, i32) {
    %c0_i32 = arith.constant 0 : i32
    %c0_i32_0 = arith.constant 0 : i32
    return %arg0, %c0_i32 : i32, i32
  }
  func.func @transform_1(%arg0: i32) -> (i32, i32) {
    %c0_i32 = arith.constant 0 : i32
    %c0_i32_0 = arith.constant 0 : i32
    return %arg0, %c0_i32 : i32, i32
  }
  func.func @transform_2(%arg0: i32) -> (i32, i32) {
    %c0_i32 = arith.constant 0 : i32
    %c0_i32_0 = arith.constant 0 : i32
    %c0_i32_1 = arith.constant 0 : i32
    return %c0_i32, %c0_i32_0 : i32, i32
  }
  func.func @transform_3(%arg0: i32) -> (i32, i32) {
    %c0_i32 = arith.constant 0 : i32
    %c0_i32_0 = arith.constant 0 : i32
    return %arg0, %c0_i32 : i32, i32
  }
}

</mosaic_0001>

<bundles_post_ra>
// kernel: att_layer_forward.7
= control target key start
LH: loop header
LB: loop body
LE: loop exit
PB: predicated region body
PF: predicated region fallthrough
CT: control target
= control target key end

     0   :  { %s683_s9 = smov 0   ;;  %s911_s0 = inlined_call_operand.vmem [shape: f32[512,128], index: 0, kind: input, shape index: {}]   ;;  %s912_s1 = inlined_call_operand.vmem [shape: f32[2,512], index: 1, kind: input, shape index: {}]   ;;  %s913_s2 = inlined_call_operand.vmem [shape: f32[2,128], index: 2, kind: output, shape index: {}]  }
   0x1 LB: > { %s507_s10 = sadd.s32 4294967295, %s665_s9   ;;  %p510_p0 = scmp.ge.s32.totalorder %s665_s9, 1  ;;  %s665_s9 = sphi %s683_s9, %s12_s9  }
   0x2   : > { %p119_p1 = scmp.lt.s32.totalorder %s665_s9, 3 }
   0x4   : > { %p120_p2 = pnand %p510_p0, %p119_p1 }
   0x5   : > { %s511_s11 = sshll.u32 (!%p120_p2), %s507_s10, 5  ;;  %s513_s12 = sshll.u32 (!%p120_p2), %s507_s10, 1 }
   0x6   : > { %123 = sbr.rel (%p120_p2) target bundleno = 467 (0x1d3), region = 28  ;;  %p142_p3 = scmp.lt.s32.totalorder (!%p120_p2), %s511_s11, 63 }
   0x7   : > { %p148_p4 = scmp.lt.s32.totalorder (!%p120_p2), %s513_s12, 3  ;;  %p515_p5 = scmp.ne.s32.totalorder (!%p120_p2), %s507_s10, 0 }
   0xd   : > { %s915_s11 = smov (!%p142_p3, %s511_s11), 63  ;;  %s917_s12 = smov (!%p148_p4, %s513_s12), 3 }
   0xe   : > { %s512_s13 = sshll.u32 %s915_s11, 3  ;;  %s514_s17 = sshll.u32 %s917_s12, 1  ;;  %v667_v0 = vmov (!%p515_p5), 0.0  }
   0xf   : > { %s694_s16 = scalar_lea.vmem %s911_s0, %s512_s13  ;;  %s699_s20 = scalar_lea.vmem %s912_s1, %s514_s17  ;;  %157 = vst [vmem:[%s913_s2] sm:$0x3] (!%p515_p5), %v667_v0 }
  0x10   : > { %156 = sbr.rel (%p515_p5) target bundleno = 23 (0x17), region = 32 }
  0x17 PF: > { %v705_v1 = vld [vmem:[%s694_s16 + $0x80] sm:$0xff]  ;;  %v711_v3 = vld [vmem:[%s694_s16 + $0x88] sm:$0xff]  ;;  %v725_v9 = vld [vmem:[%s694_s16 + $0x90] sm:$0xff] }
  0x18   : > { %v708_v2 = vld [vmem:[%s694_s16] sm:$0xff]  ;;  %v206_v4 = vmul.f32 %v705_v1, %v705_v1  ;;  %v718_v6 = vld [vmem:[%s694_s16 + $0x8] sm:$0xff]  ;;  %v207_v7 = vmul.f32 %v711_v3, %v711_v3  ;;  %v728_v10 = vld [vmem:[%s694_s16 + $0x98] sm:$0xff]  ;;  %v208_v11 = vmul.f32 %v725_v9, %v725_v9 }
  0x19   : > { %v190_v5 = vmul.f32 %v708_v2, %v708_v2  ;;  %v191_v8 = vmul.f32 %v718_v6, %v718_v6  ;;  %v209_v12 = vmul.f32 %v728_v10, %v728_v10  ;;  %v735_v13 = vld [vmem:[%s694_s16 + $0x10] sm:$0xff]  ;;  %v738_v14 = vld [vmem:[%s694_s16 + $0x18] sm:$0xff]  ;;  %v745_v17 = vld [vmem:[%s694_s16 + $0xa0] sm:$0xff] }
  0x1a   : > { %254 = vadd.xlane.f32.xlu0 %v206_v4  ;;  %v192_v15 = vmul.f32 %v735_v13, %v735_v13  ;;  %v193_v16 = vmul.f32 %v738_v14, %v738_v14  ;;  %v748_v18 = vld [vmem:[%s694_s16 + $0xa8] sm:$0xff]  ;;  %v210_v19 = vmul.f32 %v745_v17, %v745_v17  ;;  %v755_v21 = vld [vmem:[%s694_s16 + $0x20] sm:$0xff]  ;;  %v765_v25 = vld [vmem:[%s694_s16 + $0xb0] sm:$0xff] }
  0x1b   : > { %222 = vadd.xlane.f32.xlu1 %v190_v5  ;;  %v211_v20 = vmul.f32 %v748_v18, %v748_v18  ;;  %v758_v22 = vld [vmem:[%s694_s16 + $0x28] sm:$0xff]  ;;  %v194_v23 = vmul.f32 %v755_v21, %v755_v21  ;;  %v768_v26 = vld [vmem:[%s694_s16 + $0xb8] sm:$0xff]  ;;  %v212_v27 = vmul.f32 %v765_v25, %v765_v25  ;;  %v775_v29 = vld [vmem:[%s694_s16 + $0x30] sm:$0xff] }
  0x1c   : > { %v195_v24 = vmul.f32 %v758_v22, %v758_v22  ;;  %v213_v28 = vmul.f32 %v768_v26, %v768_v26  ;;  %v778_v30 = vld [vmem:[%s694_s16 + $0x38] sm:$0xff]  ;;  %v196_v31 = vmul.f32 %v775_v29, %v775_v29  ;;  %v785_v33 = vld [vmem:[%s694_s16 + $0xc0] sm:$0xff]  ;;  %v788_v34 = vld [vmem:[%s694_s16 + $0xc8] sm:$0xff] }
  0x1d   : > { %v197_v32 = vmul.f32 %v778_v30, %v778_v30  ;;  %v214_v35 = vmul.f32 %v785_v33, %v785_v33  ;;  %v215_v36 = vmul.f32 %v788_v34, %v788_v34  ;;  %v795_v37 = vld [vmem:[%s694_s16 + $0x40] sm:$0xff]  ;;  %v798_v38 = vld [vmem:[%s694_s16 + $0x48] sm:$0xff]  ;;  %v805_v41 = vld [vmem:[%s694_s16 + $0xd0] sm:$0xff] }
  0x1e   : > { %256 = vadd.xlane.f32.xlu0 %v207_v7  ;;  %v198_v39 = vmul.f32 %v795_v37, %v795_v37  ;;  %v199_v40 = vmul.f32 %v798_v38, %v798_v38  ;;  %v808_v42 = vld [vmem:[%s694_s16 + $0xd8] sm:$0xff]  ;;  %v216_v43 = vmul.f32 %v805_v41, %v805_v41  ;;  %v815_v45 = vld [vmem:[%s694_s16 + $0x50] sm:$0xff]  ;;  %v825_v49 = vld [vmem:[%s694_s16 + $0xe0] sm:$0xff] }
  0x1f   : > { %224 = vadd.xlane.f32.xlu1 %v191_v8  ;;  %v217_v44 = vmul.f32 %v808_v42, %v808_v42  ;;  %v818_v46 = vld [vmem:[%s694_s16 + $0x58] sm:$0xff]  ;;  %v200_v47 = vmul.f32 %v815_v45, %v815_v45  ;;  %v828_v50 = vld [vmem:[%s694_s16 + $0xe8] sm:$0xff]  ;;  %v218_v51 = vmul.f32 %v825_v49, %v825_v49  ;;  %v835_v53 = vld [vmem:[%s694_s16 + $0x60] sm:$0xff] }
  0x20   : > { %v201_v48 = vmul.f32 %v818_v46, %v818_v46  ;;  %v219_v52 = vmul.f32 %v828_v50, %v828_v50  ;;  %v838_v54 = vld [vmem:[%s694_s16 + $0x68] sm:$0xff]  ;;  %v202_v55 = vmul.f32 %v835_v53, %v835_v53  ;;  %v845_v57 = vld [vmem:[%s694_s16 + $0xf0] sm:$0xff]  ;;  %v848_v58 = vld [vmem:[%s694_s16 + $0xf8] sm:$0xff] }
  0x21   : > { %v203_v56 = vmul.f32 %v838_v54, %v838_v54  ;;  %v220_v59 = vmul.f32 %v845_v57, %v845_v57  ;;  %v221_v60 = vmul.f32 %v848_v58, %v848_v58  ;;  %v855_v61 = vld [vmem:[%s694_s16 + $0x70] sm:$0xff]  ;;  %v858_v62 = vld [vmem:[%s694_s16 + $0x78] sm:$0xff]  ;;  %v865_v4 = vld.sshfl [vmem:[%s699_s20] sm:$0x33 pattern:$0x76325410] }
  0x22   : > { %258 = vadd.xlane.f32.xlu0 %v208_v11  ;;  %v204_v63 = vmul.f32 %v855_v61, %v855_v61  ;;  %v205_v0 = vmul.f32 %v858_v62, %v858_v62  ;;  %v392_v5 = vcombine.high %v865_v4, %v865_v4 }
  0x23   : > { %260 = vadd.xlane.f32.xlu1 %v209_v12 }
  0x24   : > { %459 = vmatprep.mubr.f32.mxu0 %v392_v5 }
  0x26   : > { %226 = vadd.xlane.f32.xlu0 %v192_v15 }
  0x27   : > { %228 = vadd.xlane.f32.xlu1 %v193_v16 }
  0x2a   : > { %262 = vadd.xlane.f32.xlu0 %v210_v19 }
  0x2b   : > { %264 = vadd.xlane.f32.xlu1 %v211_v20 }
  0x2e   : > { %230 = vadd.xlane.f32.xlu0 %v194_v23 }
  0x2f   : > { %232 = vadd.xlane.f32.xlu1 %v195_v24 }
  0x32   : > { %266 = vadd.xlane.f32.xlu0 %v212_v27 }
  0x33   : > { %268 = vadd.xlane.f32.xlu1 %v213_v28 }
  0x36   : > { %234 = vadd.xlane.f32.xlu0 %v196_v31 }
  0x37   : > { %236 = vadd.xlane.f32.xlu1 %v197_v32 }
  0x3a   : > { %270 = vadd.xlane.f32.xlu0 %v214_v35 }
  0x3b   : > { %272 = vadd.xlane.f32.xlu1 %v215_v36 }
  0x3e   : > { %238 = vadd.xlane.f32.xlu0 %v198_v39 }
  0x3f   : > { %240 = vadd.xlane.f32.xlu1 %v199_v40 }
  0x42   : > { %274 = vadd.xlane.f32.xlu0 %v216_v43 }
  0x43   : > { %276 = vadd.xlane.f32.xlu1 %v217_v44 }
  0x46   : > { %242 = vadd.xlane.f32.xlu0 %v200_v47 }
  0x47   : > { %244 = vadd.xlane.f32.xlu1 %v201_v48 }
  0x4a   : > { %278 = vadd.xlane.f32.xlu0 %v218_v51 }
  0x4b   : > { %280 = vadd.xlane.f32.xlu1 %v219_v52 }
  0x4e   : > { %246 = vadd.xlane.f32.xlu0 %v202_v55 }
  0x4f   : > { %248 = vadd.xlane.f32.xlu1 %v203_v56 }
  0x52   : > { %282 = vadd.xlane.f32.xlu0 %v220_v59 }
  0x53   : > { %284 = vadd.xlane.f32.xlu1 %v221_v60 }
  0x56   : > { %250 = vadd.xlane.f32.xlu0 %v204_v63 }
  0x57   : > { %252 = vadd.xlane.f32.xlu1 %v205_v0 }
  0xa7   : > { %v255_v7 = vpop.xlane.xlu0 %254 }
  0xa8   : > { %v223_v8 = vpop.xlane.xlu1 %222  ;;  %v302_v11 = vmax.f32 %v255_v7, 1e-24 }
  0xa9   : > { %v286_v12 = vmax.f32 %v223_v8, 1e-24 }
  0xaa   : > { %595 = vrsqrt.f32 %v302_v11 }
  0xab   : > { %v257_v15 = vpop.xlane.xlu0 %256  ;;  %597 = vrsqrt.f32 %v286_v12 }
  0xac   : > { %v225_v16 = vpop.xlane.xlu1 %224  ;;  %v303_v19 = vmax.f32 %v257_v15, 1e-24 }
  0xad   : > { %v287_v20 = vmax.f32 %v225_v16, 1e-24 }
  0xae   : > { %599 = vrsqrt.f32 %v303_v19 }
  0xaf   : > { %601 = vrsqrt.f32 %v287_v20  ;;  %v259_v23 = vpop.xlane.xlu0 %258 }
  0xb0   : > { %v261_v24 = vpop.xlane.xlu1 %260  ;;  %v304_v27 = vmax.f32 %v259_v23, 1e-24 }
  0xb1   : > { %v305_v28 = vmax.f32 %v261_v24, 1e-24 }
  0xb2   : > { %603 = vrsqrt.f32 %v304_v27 }
  0xb3   : > { %605 = vrsqrt.f32 %v305_v28  ;;  %v227_v31 = vpop.xlane.xlu0 %226 }
  0xb4   : > { %v229_v32 = vpop.xlane.xlu1 %228  ;;  %v288_v35 = vmax.f32 %v227_v31, 1e-24  ;;  %v596_v39 = vpop.eup %595 }
  0xb5   : > { %v289_v36 = vmax.f32 %v229_v32, 1e-24  ;;  %v598_v40 = vpop.eup %597  ;;  %v366_v55 = vmul.f32 %v596_v39, %v705_v1 }
  0xb6   : > { %607 = vrsqrt.f32 %v288_v35  ;;  %v350_v59 = vmul.f32 %v598_v40, %v708_v2 }
  0xb7   : > { %609 = vrsqrt.f32 %v289_v36  ;;  %v263_v43 = vpop.xlane.xlu0 %262 }
  0xb8   : > { %v265_v44 = vpop.xlane.xlu1 %264  ;;  %v600_v47 = vpop.eup %599  ;;  %v306_v48 = vmax.f32 %v263_v43, 1e-24 }
  0xb9   : > { %v307_v51 = vmax.f32 %v265_v44, 1e-24  ;;  %v602_v52 = vpop.eup %601  ;;  %v367_v56 = vmul.f32 %v600_v47, %v711_v3 }
  0xba   : > { %611 = vrsqrt.f32 %v306_v48  ;;  %v351_v60 = vmul.f32 %v602_v52, %v718_v6 }
  0xbb   : > { %613 = vrsqrt.f32 %v307_v51  ;;  %v231_v63 = vpop.xlane.xlu0 %230  ;;  %v554_v5 = vpack.c.bf16 %v367_v56, %v366_v55 }
  0xbc   : > { %v233_v0 = vpop.xlane.xlu1 %232  ;;  %v604_v7 = vpop.eup %603  ;;  %v290_v8 = vmax.f32 %v231_v63, 1e-24  ;;  %v556_v12 = vpack.c.bf16 %v351_v60, %v350_v59 }
  0xbd   : > { %v291_v11 = vmax.f32 %v233_v0, 1e-24  ;;  %v606_v15 = vpop.eup %605  ;;  %555 = vmatprep.subr.bf16.mxu0 %v554_v5  ;;  %v368_v16 = vmul.f32 %v604_v7, %v725_v9 }
  0xbe   : > { %615 = vrsqrt.f32 %v290_v8  ;;  %557 = vmatpush3.bf16.msra.mxu0 %v556_v12  ;;  %v369_v1 = vmul.f32 %v606_v15, %v728_v10 }
  0xbf   : > { %617 = vrsqrt.f32 %v291_v11  ;;  %v267_v2 = vpop.xlane.xlu0 %266 }
  0xc0   : > { %v269_v3 = vpop.xlane.xlu1 %268  ;;  %v608_v6 = vpop.eup %607  ;;  %v308_v19 = vmax.f32 %v267_v2, 1e-24  ;;  %v558_v23 = vpack.c.bf16 %v369_v1, %v368_v16 }
  0xc1   : > { %v309_v20 = vmax.f32 %v269_v3, 1e-24  ;;  %v610_v24 = vpop.eup %609  ;;  %v352_v27 = vmul.f32 %v608_v6, %v735_v13 }
  0xc2   : > { %619 = vrsqrt.f32 %v308_v19  ;;  %559 = vmatprep.subr.bf16.mxu0 %v558_v23  ;;  %v353_v28 = vmul.f32 %v610_v24, %v738_v14 }
  0xc3   : > { %621 = vrsqrt.f32 %v309_v20  ;;  %v235_v9 = vpop.xlane.xlu0 %234 }
  0xc4   : > { %v237_v31 = vpop.xlane.xlu1 %236  ;;  %v612_v32 = vpop.eup %611  ;;  %v292_v35 = vmax.f32 %v235_v9, 1e-24  ;;  %v560_v36 = vpack.c.bf16 %v353_v28, %v352_v27 }
  0xc5   : > { %v293_v10 = vmax.f32 %v237_v31, 1e-24  ;;  %v614_v39 = vpop.eup %613  ;;  %v370_v40 = vmul.f32 %v612_v32, %v745_v17 }
  0xc6   : > { %623 = vrsqrt.f32 %v292_v35  ;;  %561 = vmatpush3.bf16.msra.mxu0 %v560_v36  ;;  %v371_v43 = vmul.f32 %v614_v39, %v748_v18 }
  0xc7   : > { %625 = vrsqrt.f32 %v293_v10  ;;  %v271_v13 = vpop.xlane.xlu0 %270 }
  0xc8   : > { %v273_v44 = vpop.xlane.xlu1 %272  ;;  %v616_v47 = vpop.eup %615  ;;  %v310_v48 = vmax.f32 %v271_v13, 1e-24  ;;  %v562_v51 = vpack.c.bf16 %v371_v43, %v370_v40 }
  0xc9   : > { %v311_v14 = vmax.f32 %v273_v44, 1e-24  ;;  %v618_v52 = vpop.eup %617  ;;  %v354_v55 = vmul.f32 %v616_v47, %v755_v21 }
  0xca   : > { %627 = vrsqrt.f32 %v310_v48  ;;  %563 = vmatprep.subr.bf16.mxu0 %v562_v51  ;;  %v355_v56 = vmul.f32 %v618_v52, %v758_v22 }
  0xcb   : > { %629 = vrsqrt.f32 %v311_v14  ;;  %v239_v17 = vpop.xlane.xlu0 %238 }
  0xcc   : > { %v241_v59 = vpop.xlane.xlu1 %240  ;;  %v620_v60 = vpop.eup %619  ;;  %v294_v63 = vmax.f32 %v239_v17, 1e-24  ;;  %v564_v0 = vpack.c.bf16 %v355_v56, %v354_v55 }
  0xcd   : > { %v295_v18 = vmax.f32 %v241_v59, 1e-24  ;;  %v622_v5 = vpop.eup %621  ;;  %v372_v7 = vmul.f32 %v620_v60, %v765_v25 }
  0xce   : > { %631 = vrsqrt.f32 %v294_v63  ;;  %565 = vmatpush3.bf16.msra.mxu0 %v564_v0  ;;  %v373_v8 = vmul.f32 %v622_v5, %v768_v26 }
  0xcf   : > { %633 = vrsqrt.f32 %v295_v18  ;;  %v275_v21 = vpop.xlane.xlu0 %274 }
  0xd0   : > { %v277_v11 = vpop.xlane.xlu1 %276  ;;  %v624_v12 = vpop.eup %623  ;;  %v312_v15 = vmax.f32 %v275_v21, 1e-24  ;;  %v566_v16 = vpack.c.bf16 %v373_v8, %v372_v7 }
  0xd1   : > { %v313_v22 = vmax.f32 %v277_v11, 1e-24  ;;  %v626_v1 = vpop.eup %625  ;;  %v356_v2 = vmul.f32 %v624_v12, %v775_v29 }
  0xd2   : > { %635 = vrsqrt.f32 %v312_v15  ;;  %567 = vmatprep.subr.bf16.mxu0 %v566_v16  ;;  %v357_v3 = vmul.f32 %v626_v1, %v778_v30 }
  0xd3   : > { %637 = vrsqrt.f32 %v313_v22  ;;  %v243_v25 = vpop.xlane.xlu0 %242 }
  0xd4   : > { %v245_v6 = vpop.xlane.xlu1 %244  ;;  %v628_v19 = vpop.eup %627  ;;  %v296_v20 = vmax.f32 %v243_v25, 1e-24  ;;  %v568_v23 = vpack.c.bf16 %v357_v3, %v356_v2 }
  0xd5   : > { %v297_v26 = vmax.f32 %v245_v6, 1e-24  ;;  %v630_v24 = vpop.eup %629  ;;  %v374_v27 = vmul.f32 %v628_v19, %v785_v33 }
  0xd6   : > { %639 = vrsqrt.f32 %v296_v20  ;;  %569 = vmatpush3.bf16.msra.mxu0 %v568_v23  ;;  %v375_v28 = vmul.f32 %v630_v24, %v788_v34 }
  0xd7   : > { %641 = vrsqrt.f32 %v297_v26  ;;  %v279_v29 = vpop.xlane.xlu0 %278 }
  0xd8   : > { %v281_v9 = vpop.xlane.xlu1 %280  ;;  %v632_v31 = vpop.eup %631  ;;  %v314_v32 = vmax.f32 %v279_v29, 1e-24  ;;  %v570_v35 = vpack.c.bf16 %v375_v28, %v374_v27 }
  0xd9   : > { %v315_v30 = vmax.f32 %v281_v9, 1e-24  ;;  %v634_v10 = vpop.eup %633  ;;  %v358_v36 = vmul.f32 %v632_v31, %v795_v37 }
  0xda   : > { %643 = vrsqrt.f32 %v314_v32  ;;  %571 = vmatprep.subr.bf16.mxu0 %v570_v35  ;;  %v359_v39 = vmul.f32 %v634_v10, %v798_v38 }
  0xdb   : > { %645 = vrsqrt.f32 %v315_v30  ;;  %v247_v33 = vpop.xlane.xlu0 %246 }
  0xdc   : > { %v249_v40 = vpop.xlane.xlu1 %248  ;;  %v636_v43 = vpop.eup %635  ;;  %v298_v13 = vmax.f32 %v247_v33, 1e-24  ;;  %v572_v44 = vpack.c.bf16 %v359_v39, %v358_v36 }
  0xdd   : > { %v299_v34 = vmax.f32 %v249_v40, 1e-24  ;;  %v638_v47 = vpop.eup %637  ;;  %v376_v48 = vmul.f32 %v636_v43, %v805_v41 }
  0xde   : > { %647 = vrsqrt.f32 %v298_v13  ;;  %573 = vmatpush3.bf16.msra.mxu0 %v572_v44  ;;  %v377_v14 = vmul.f32 %v638_v47, %v808_v42 }
  0xdf   : > { %649 = vrsqrt.f32 %v299_v34  ;;  %v283_v37 = vpop.xlane.xlu0 %282 }
  0xe0   : > { %v285_v51 = vpop.xlane.xlu1 %284  ;;  %v640_v52 = vpop.eup %639  ;;  %v316_v55 = vmax.f32 %v283_v37, 1e-24  ;;  %v574_v56 = vpack.c.bf16 %v377_v14, %v376_v48 }
  0xe1   : > { %v317_v38 = vmax.f32 %v285_v51, 1e-24  ;;  %v642_v17 = vpop.eup %641  ;;  %v360_v59 = vmul.f32 %v640_v52, %v815_v45 }
  0xe2   : > { %651 = vrsqrt.f32 %v316_v55  ;;  %575 = vmatprep.subr.bf16.mxu0 %v574_v56  ;;  %v361_v60 = vmul.f32 %v642_v17, %v818_v46 }
  0xe3   : > { %653 = vrsqrt.f32 %v317_v38  ;;  %v251_v41 = vpop.xlane.xlu0 %250 }
  0xe4   : > { %v253_v63 = vpop.xlane.xlu1 %252  ;;  %v644_v18 = vpop.eup %643  ;;  %v300_v0 = vmax.f32 %v251_v41, 1e-24  ;;  %v576_v5 = vpack.c.bf16 %v361_v60, %v360_v59 }
  0xe5   : > { %v301_v42 = vmax.f32 %v253_v63, 1e-24  ;;  %v646_v7 = vpop.eup %645  ;;  %v378_v8 = vmul.f32 %v644_v18, %v825_v49 }
  0xe6   : > { %655 = vrsqrt.f32 %v300_v0  ;;  %577 = vmatpush3.bf16.msra.mxu0 %v576_v5  ;;  %v379_v21 = vmul.f32 %v646_v7, %v828_v50 }
  0xe7   : > { %657 = vrsqrt.f32 %v301_v42 }
  0xe8   : > { %v648_v45 = vpop.eup %647  ;;  %v578_v11 = vpack.c.bf16 %v379_v21, %v378_v8 }
  0xe9   : > { %v650_v12 = vpop.eup %649  ;;  %v362_v46 = vmul.f32 %v648_v45, %v835_v53 }
  0xea   : > { %579 = vmatprep.subr.bf16.mxu0 %v578_v11  ;;  %v363_v15 = vmul.f32 %v650_v12, %v838_v54 }
  0xec   : > { %v652_v22 = vpop.eup %651  ;;  %v580_v16 = vpack.c.bf16 %v363_v15, %v362_v46 }
  0xed   : > { %v654_v1 = vpop.eup %653  ;;  %v380_v2 = vmul.f32 %v652_v22, %v845_v57  ;;  %v382_v57 = vld [vmem:[%s913_s2] sm:$0x3] }
  0xee   : > { %581 = vmatpush3.bf16.msra.mxu0 %v580_v16  ;;  %v381_v49 = vmul.f32 %v654_v1, %v848_v58 }
  0xf0   : > { %v656_v3 = vpop.eup %655  ;;  %v582_v25 = vpack.c.bf16 %v381_v49, %v380_v2 }
  0xf1   : > { %v658_v50 = vpop.eup %657  ;;  %v364_v6 = vmul.f32 %v656_v3, %v855_v61 }
  0xf2   : > { %583 = vmatprep.subr.bf16.mxu0 %v582_v25  ;;  %v365_v19 = vmul.f32 %v658_v50, %v858_v62 }
  0xf4   : > { %v584_v53 = vpack.c.bf16 %v365_v19, %v364_v6 }
  0xf6   : > { %585 = vmatpush3.bf16.msra.mxu0 %v584_v53 }
  0xf9   : > { %460 = vmatmul.mubr.f32.vlgmr.msra.gmra.mrb[0].mxu0 %v865_v4 }
 0x1cc   : > { %v551_v54 = vpop.f32.mrb[0].mxu0 }
 0x1cd   : > { %v552_v20 = vpop.f32.mrb[1].mxu0 }
 0x1ce   : > { %v553_v26 = vadd.f32 %v552_v20, %v551_v54 }
 0x1d0   : > { %v465_v58 = vadd.f32 %v553_v26, %v382_v57 }
 0x1d2   : > { %466 = vst [vmem:[%s913_s2] sm:$0x3] %v465_v58 }
 0x1d3 PF: > { %s12_s9 = sadd.s32 1, %s665_s9  }
 0x1d4   : > { %p9_p6 = scmp.ge.s32.totalorder %s12_s9, 4  }
 0x1d6   :  { %11 = sbr.rel (!%p9_p6) target bundleno = 1 (0x1), region = 61 }

// kernel: att_layer_forward.6
= control target key start
LH: loop header
LB: loop body
LE: loop exit
PB: predicated region body
PF: predicated region fallthrough
CT: control target
= control target key end

     0   :  { %s1123_s9 = smov 0   ;;  %s1125_s10 = smov 0   ;;  %s1316_s0 = inlined_call_operand.vmem [shape: bf16[512,128], index: 0, kind: input, shape index: {}]   ;;  %s1317_s1 = inlined_call_operand.vmem [shape: bf16[512,128], index: 1, kind: input, shape index: {}]   ;;  %s1318_s2 = inlined_call_operand.vmem [shape: f32[1,512], index: 2, kind: output, shape index: {}]  }
   0x1   :  { %s1127_s11 = smov 0   ;;  %s1129_s12 = smov 0  }
   0x2   :  { %s1131_s13 = smov 0  }
   0x3 LB: > { %s21_s14 = sadd.s32 1, %s1096_s11  ;;  %s24_s15 = sadd.s32 1, %s1100_s12  ;;  %s1104_s13 = sphi %s1131_s13, %s12_s13   ;;  %s1100_s12 = sphi %s1129_s12, %s1322_s12   ;;  %s1096_s11 = sphi %s1127_s11, %s1321_s11   ;;  %s1092_s10 = sphi %s1125_s10, %s1320_s10   ;;  %s1088_s9 = sphi %s1123_s9, %s1319_s9  }
   0x4   : > { %p22_p0 = scmp.ge.s32.totalorder %s21_s14, 2  ;;  %p886_p1 = scmp.ge.s32.totalorder %s1104_s13, 1 }
   0x5   : > { %p136_p2 = scmp.lt.s32.totalorder %s1104_s13, 5 }
   0x6   : > { %s1324_s14 = smov (%p22_p0, %s21_s14), 0  ;;  %s1326_s15 = smov (!%p22_p0, %s24_s15), %s1100_s12 }
   0x7   : > { %p137_p3 = pnand %p886_p1, %p136_p2  ;;  %p26_p4 = scmp.ge.s32.totalorder %s1326_s15, 2 }
   0x8   : > { %s887_s16 = sshll.u32 (!%p137_p3), %s1092_s10, 5  ;;  %s889_s17 = sshll.u32 (!%p137_p3), %s1088_s9, 5 }
   0x9   : > { %s1328_s15 = smov (%p26_p4, %s1326_s15), 0  ;;  %140 = sbr.rel (%p137_p3) target bundleno = 415 (0x19f), region = 28 }
   0xa   : > { %p163_p5 = scmp.lt.s32.totalorder (!%p137_p3), %s887_s16, 63  ;;  %p169_p6 = scmp.lt.s32.totalorder (!%p137_p3), %s889_s17, 63 }
   0xb   : > { %s891_s18 = sshll.u32 (!%p137_p3), %s1092_s10, 1  ;;  %p892_p8 = scmp.ne.s32.totalorder (!%p137_p3), %s1088_s9, 0 }
   0xc   : > { %p175_p7 = scmp.lt.s32.totalorder (!%p137_p3), %s891_s18, 3 }
  0x10   : > { %s1330_s16 = smov (!%p163_p5, %s887_s16), 63  ;;  %s1332_s17 = smov (!%p169_p6, %s889_s17), 63 }
  0x11   : > { %s888_s19 = sshll.u32 %s1330_s16, 2  ;;  %s890_s23 = sshll.u32 %s1332_s17, 2  ;;  %v184_v0 = vlaneseq (!%p892_p8)  ;;  %v1106_v1 = vmov (!%p892_p8), 0.0  }
  0x12   : > { %s1159_s22 = scalar_lea.vmem %s1316_s0, %s888_s19  ;;  %s1164_s26 = scalar_lea.vmem %s1317_s1, %s890_s23 }
  0x13   : > { %s1334_s18 = smov (!%p175_p7, %s891_s18), 3  ;;  %183 = sbr.rel (%p892_p8) target bundleno = 26 (0x1a), region = 32 }
  0x14   : > { %s177_s29 = scalar_lea.vmem %s1318_s2, %s1334_s18  ;;  %vm186_vm0 = vcmp.lt.s32.totalorder (!%p892_p8), %v184_v0, 256 }
  0x15   : > { %188 = vst.msk [vmem:[#allocation2] sm:$0x3] (!%p892_p8), %vm186_vm0, %v1106_v1 }
  0x1a PF: > { %v1034_v2 = vld [vmem:[%s1159_s22 + $0x40] sm:$0xff]   ;;  %v1036_v4 = vld [vmem:[%s1159_s22 + $0x48] sm:$0xff]   ;;  %v1038_v6 = vld [vmem:[%s1159_s22 + $0x50] sm:$0xff]   ;;  %p925_p9 = scmp.ne.s32.totalorder %s1088_s9, 1 }
  0x1b   : > { %v1035_v3 = vld [vmem:[%s1159_s22] sm:$0xff]   ;;  %928 = vmatprep.subr.bf16.mxu0 %v1034_v2  ;;  %976 = vmatprep.subr.bf16.mxu1 %v1034_v2  ;;  %v1037_v5 = vld [vmem:[%s1159_s22 + $0x8] sm:$0xff]   ;;  %v1039_v7 = vld [vmem:[%s1159_s22 + $0x10] sm:$0xff]  }
  0x1c   : > { %929 = vmatpush3.bf16.xpose.msra.mxu0 %v1035_v3  ;;  %984 = vmatpush3.bf16.xpose.msra.mxu1 %v1035_v3  ;;  %v1040_v8 = vld [vmem:[%s1159_s22 + $0x58] sm:$0xff]   ;;  %v1050_v9 = vld [vmem:[%s1164_s26] sm:$0xff]   ;;  %v1044_v14 = vld [vmem:[%s1159_s22 + $0x68] sm:$0xff]  }
  0x1d   : > { %930 = vmatprep.subr.bf16.mxu0 %v1036_v4  ;;  %977 = vmatprep.subr.bf16.mxu1 %v1036_v4  ;;  %v1052_v10 = vld [vmem:[%s1164_s26 + $0x40] sm:$0xff]   ;;  %v1041_v11 = vld [vmem:[%s1159_s22 + $0x18] sm:$0xff]   ;;  %v1045_v15 = vld [vmem:[%s1159_s22 + $0x28] sm:$0xff]  }
  0x1e   : > { %944 = vmatprep.mubr.bf16.mxu0 %v1050_v9  ;;  %960 = vmatprep.mubr.bf16.mxu1 %v1052_v10  ;;  %v1042_v12 = vld [vmem:[%s1159_s22 + $0x60] sm:$0xff]   ;;  %v1046_v16 = vld [vmem:[%s1159_s22 + $0x70] sm:$0xff]   ;;  %v1048_v18 = vld [vmem:[%s1159_s22 + $0x78] sm:$0xff]  }
  0x1f   : > { %v1043_v13 = vld [vmem:[%s1159_s22 + $0x20] sm:$0xff]   ;;  %v1047_v17 = vld [vmem:[%s1159_s22 + $0x30] sm:$0xff]   ;;  %v1049_v19 = vld [vmem:[%s1159_s22 + $0x38] sm:$0xff]  }
  0x20   : > { %v1051_v20 = vld [vmem:[%s1164_s26 + $0x8] sm:$0xff]   ;;  %v1053_v22 = vld [vmem:[%s1164_s26 + $0x10] sm:$0xff]   ;;  %v1055_v24 = vld [vmem:[%s1164_s26 + $0x18] sm:$0xff]  }
  0x21   : > { %v1054_v21 = vld [vmem:[%s1164_s26 + $0x48] sm:$0xff]   ;;  %v1056_v23 = vld [vmem:[%s1164_s26 + $0x50] sm:$0xff]   ;;  %v1058_v25 = vld [vmem:[%s1164_s26 + $0x58] sm:$0xff]  }
  0x22   : > { %v1057_v26 = vld [vmem:[%s1164_s26 + $0x20] sm:$0xff]   ;;  %v1059_v28 = vld [vmem:[%s1164_s26 + $0x28] sm:$0xff]   ;;  %v1061_v30 = vld [vmem:[%s1164_s26 + $0x30] sm:$0xff]  }
  0x23   : > { %v1060_v27 = vld [vmem:[%s1164_s26 + $0x60] sm:$0xff]   ;;  %v1062_v29 = vld [vmem:[%s1164_s26 + $0x68] sm:$0xff]   ;;  %v1064_v31 = vld [vmem:[%s1164_s26 + $0x70] sm:$0xff]  }
  0x24   : > { %931 = vmatpush3.bf16.xpose.msra.mxu0 %v1037_v5  ;;  %985 = vmatpush3.bf16.xpose.msra.mxu1 %v1037_v5  ;;  %v1063_v32 = vld [vmem:[%s1164_s26 + $0x38] sm:$0xff]  }
  0x25   : > { %932 = vmatprep.subr.bf16.mxu0 %v1038_v6  ;;  %978 = vmatprep.subr.bf16.mxu1 %v1038_v6  ;;  %v1065_v33 = vld [vmem:[%s1164_s26 + $0x78] sm:$0xff]  }
  0x2c   : > { %933 = vmatpush3.bf16.xpose.msra.mxu0 %v1039_v7  ;;  %986 = vmatpush3.bf16.xpose.msra.mxu1 %v1039_v7 }
  0x2d   : > { %934 = vmatprep.subr.bf16.mxu0 %v1040_v8  ;;  %979 = vmatprep.subr.bf16.mxu1 %v1040_v8 }
  0x34   : > { %935 = vmatpush3.bf16.xpose.msra.mxu0 %v1041_v11  ;;  %987 = vmatpush3.bf16.xpose.msra.mxu1 %v1041_v11 }
  0x35   : > { %936 = vmatprep.subr.bf16.mxu0 %v1042_v12  ;;  %980 = vmatprep.subr.bf16.mxu1 %v1042_v12 }
  0x3c   : > { %937 = vmatpush3.bf16.xpose.msra.mxu0 %v1043_v13  ;;  %988 = vmatpush3.bf16.xpose.msra.mxu1 %v1043_v13 }
  0x3d   : > { %938 = vmatprep.subr.bf16.mxu0 %v1044_v14  ;;  %981 = vmatprep.subr.bf16.mxu1 %v1044_v14 }
  0x44   : > { %939 = vmatpush3.bf16.xpose.msra.mxu0 %v1045_v15  ;;  %989 = vmatpush3.bf16.xpose.msra.mxu1 %v1045_v15 }
  0x45   : > { %940 = vmatprep.subr.bf16.mxu0 %v1046_v16  ;;  %982 = vmatprep.subr.bf16.mxu1 %v1046_v16 }
  0x4c   : > { %941 = vmatpush3.bf16.xpose.msra.mxu0 %v1047_v17  ;;  %990 = vmatpush3.bf16.xpose.msra.mxu1 %v1047_v17 }
  0x4d   : > { %942 = vmatprep.subr.bf16.mxu0 %v1048_v18  ;;  %983 = vmatprep.subr.bf16.mxu1 %v1048_v18 }
  0x54   : > { %943 = vmatpush3.bf16.xpose.msra.mxu0 %v1049_v19  ;;  %991 = vmatpush3.bf16.xpose.msra.mxu1 %v1049_v19 }
  0x5b   : > { %945 = vmatmul.mubr.bf16.vlgmr.msra.gmra.mrb[0].mxu0 %v1050_v9  ;;  %961 = vmatmul.mubr.bf16.vlgmr.msra.gmra.mrb[0].mxu1 %v1052_v10 }
  0x5c   : > { %946 = vmatprep.mubr.bf16.mxu0 %v1051_v20  ;;  %962 = vmatprep.mubr.bf16.mxu1 %v1054_v21 }
  0x63   : > { %947 = vmatmul.mubr.bf16.gmra.mrb[4].mxu0 %v1051_v20  ;;  %963 = vmatmul.mubr.bf16.gmra.mrb[4].mxu1 %v1054_v21 }
  0x64   : > { %948 = vmatprep.mubr.bf16.mxu0 %v1053_v22  ;;  %964 = vmatprep.mubr.bf16.mxu1 %v1056_v23 }
  0x6b   : > { %949 = vmatmul.mubr.bf16.gmra.mrb[8].mxu0 %v1053_v22  ;;  %965 = vmatmul.mubr.bf16.gmra.mrb[8].mxu1 %v1056_v23 }
  0x6c   : > { %950 = vmatprep.mubr.bf16.mxu0 %v1055_v24  ;;  %966 = vmatprep.mubr.bf16.mxu1 %v1058_v25 }
  0x73   : > { %951 = vmatmul.mubr.bf16.gmra.mrb[12].mxu0 %v1055_v24  ;;  %967 = vmatmul.mubr.bf16.gmra.mrb[12].mxu1 %v1058_v25 }
  0x74   : > { %952 = vmatprep.mubr.bf16.mxu0 %v1057_v26  ;;  %968 = vmatprep.mubr.bf16.mxu1 %v1060_v27 }
  0x7b   : > { %953 = vmatmul.mubr.bf16.gmra.mrb[16].mxu0 %v1057_v26  ;;  %969 = vmatmul.mubr.bf16.gmra.mrb[16].mxu1 %v1060_v27 }
  0x7c   : > { %954 = vmatprep.mubr.bf16.mxu0 %v1059_v28  ;;  %970 = vmatprep.mubr.bf16.mxu1 %v1062_v29 }
  0x83   : > { %955 = vmatmul.mubr.bf16.gmra.mrb[20].mxu0 %v1059_v28  ;;  %971 = vmatmul.mubr.bf16.gmra.mrb[20].mxu1 %v1062_v29 }
  0x84   : > { %956 = vmatprep.mubr.bf16.mxu0 %v1061_v30  ;;  %972 = vmatprep.mubr.bf16.mxu1 %v1064_v31 }
  0x8b   : > { %957 = vmatmul.mubr.bf16.gmra.mrb[24].mxu0 %v1061_v30  ;;  %973 = vmatmul.mubr.bf16.gmra.mrb[24].mxu1 %v1064_v31 }
  0x8c   : > { %958 = vmatprep.mubr.bf16.mxu0 %v1063_v32  ;;  %974 = vmatprep.mubr.bf16.mxu1 %v1065_v33 }
  0x93   : > { %959 = vmatmul.mubr.bf16.gmra.mrb[28].mxu0 %v1063_v32  ;;  %975 = vmatmul.mubr.bf16.gmra.mrb[28].mxu1 %v1065_v33 }
 0x12e   : > { %v479_v34 = vpop.f32.mrb[0].mxu0  ;;  %v1205_v35 = vpop.f32.mrb[0].mxu1 }
 0x12f   : > { %v481_v36 = vpop.f32.mrb[1].mxu0  ;;  %v1207_v37 = vpop.f32.mrb[1].mxu1  ;;  %v638_v44 = vmul.f32 0.088388346, %v479_v34 }
 0x130   : > { %v483_v38 = vpop.f32.mrb[2].mxu0  ;;  %v1209_v39 = vpop.f32.mrb[2].mxu1  ;;  %v639_v48 = vmul.f32 0.088388346, %v481_v36 }
 0x131   : > { %v485_v40 = vpop.f32.mrb[3].mxu0  ;;  %v1211_v41 = vpop.f32.mrb[3].mxu1  ;;  %v640_v52 = vmul.f32 0.088388346, %v483_v38 }
 0x132   : > { %v641_v57 = vmul.f32 0.088388346, %v485_v40 }
 0x136   : > { %v489_v42 = vpop.f32.mrb[4].mxu0  ;;  %v1213_v43 = vpop.f32.mrb[4].mxu1 }
 0x137   : > { %v642_v45 = vmul.f32 0.088388346, %v489_v42  ;;  %v491_v46 = vpop.f32.mrb[5].mxu0  ;;  %v1215_v47 = vpop.f32.mrb[5].mxu1 }
 0x138   : > { %v643_v49 = vmul.f32 0.088388346, %v491_v46  ;;  %v493_v50 = vpop.f32.mrb[6].mxu0  ;;  %v1217_v51 = vpop.f32.mrb[6].mxu1 }
 0x139   : > { %v703_v53 = vmax.f32 %v638_v44, %v642_v45  ;;  %v644_v54 = vmul.f32 0.088388346, %v493_v50  ;;  %v495_v55 = vpop.f32.mrb[7].mxu0  ;;  %v1219_v56 = vpop.f32.mrb[7].mxu1 }
 0x13a   : > { %v740_v58 = vmax.f32 %v639_v48, %v643_v49  ;;  %v645_v59 = vmul.f32 0.088388346, %v495_v55 }
 0x13b   : > { %v704_v60 = vmax.f32 %v640_v52, %v644_v54 }
 0x13c   : > { %v741_v61 = vmax.f32 %v641_v57, %v645_v59 }
 0x13e   : > { %v499_v62 = vpop.f32.mrb[8].mxu0  ;;  %v1221_v63 = vpop.f32.mrb[8].mxu1 }
 0x13f   : > { %v646_v0 = vmul.f32 0.088388346, %v499_v62  ;;  %v501_v1 = vpop.f32.mrb[9].mxu0  ;;  %v1223_v2 = vpop.f32.mrb[9].mxu1 }
 0x140   : > { %v647_v3 = vmul.f32 0.088388346, %v501_v1  ;;  %v503_v4 = vpop.f32.mrb[10].mxu0  ;;  %v1225_v5 = vpop.f32.mrb[10].mxu1 }
 0x141   : > { %v705_v6 = vmax.f32 %v703_v53, %v646_v0  ;;  %v648_v7 = vmul.f32 0.088388346, %v503_v4  ;;  %v505_v8 = vpop.f32.mrb[11].mxu0  ;;  %v1227_v9 = vpop.f32.mrb[11].mxu1 }
 0x142   : > { %v742_v10 = vmax.f32 %v740_v58, %v647_v3  ;;  %v649_v11 = vmul.f32 0.088388346, %v505_v8 }
 0x143   : > { %v706_v12 = vmax.f32 %v704_v60, %v648_v7 }
 0x144   : > { %v743_v13 = vmax.f32 %v741_v61, %v649_v11 }
 0x146   : > { %v509_v14 = vpop.f32.mrb[12].mxu0  ;;  %v1229_v15 = vpop.f32.mrb[12].mxu1 }
 0x147   : > { %v650_v16 = vmul.f32 0.088388346, %v509_v14  ;;  %v511_v17 = vpop.f32.mrb[13].mxu0  ;;  %v1231_v18 = vpop.f32.mrb[13].mxu1 }
 0x148   : > { %v651_v19 = vmul.f32 0.088388346, %v511_v17  ;;  %v513_v20 = vpop.f32.mrb[14].mxu0  ;;  %v1233_v21 = vpop.f32.mrb[14].mxu1 }
 0x149   : > { %v707_v22 = vmax.f32 %v705_v6, %v650_v16  ;;  %v652_v23 = vmul.f32 0.088388346, %v513_v20  ;;  %v515_v24 = vpop.f32.mrb[15].mxu0  ;;  %v1235_v25 = vpop.f32.mrb[15].mxu1 }
 0x14a   : > { %v744_v26 = vmax.f32 %v742_v10, %v651_v19  ;;  %v653_v27 = vmul.f32 0.088388346, %v515_v24 }
 0x14b   : > { %v708_v28 = vmax.f32 %v706_v12, %v652_v23 }
 0x14c   : > { %v745_v29 = vmax.f32 %v743_v13, %v653_v27 }
 0x14e   : > { %v519_v30 = vpop.f32.mrb[16].mxu0  ;;  %v1237_v31 = vpop.f32.mrb[16].mxu1 }
 0x14f   : > { %v654_v32 = vmul.f32 0.088388346, %v519_v30  ;;  %v521_v33 = vpop.f32.mrb[17].mxu0  ;;  %v1239_v34 = vpop.f32.mrb[17].mxu1 }
 0x150   : > { %v655_v36 = vmul.f32 0.088388346, %v521_v33  ;;  %v523_v38 = vpop.f32.mrb[18].mxu0  ;;  %v1241_v40 = vpop.f32.mrb[18].mxu1 }
 0x151   : > { %v709_v42 = vmax.f32 %v707_v22, %v654_v32  ;;  %v656_v44 = vmul.f32 0.088388346, %v523_v38  ;;  %v525_v45 = vpop.f32.mrb[19].mxu0  ;;  %v1243_v46 = vpop.f32.mrb[19].mxu1 }
 0x152   : > { %v746_v48 = vmax.f32 %v744_v26, %v655_v36  ;;  %v657_v49 = vmul.f32 0.088388346, %v525_v45 }
 0x153   : > { %v710_v50 = vmax.f32 %v708_v28, %v656_v44 }
 0x154   : > { %v747_v52 = vmax.f32 %v745_v29, %v657_v49  ;;  %v671_v49 = vmul.f32 0.088388346, %v1207_v37  ;;  %v677_v37 = vmul.f32 0.088388346, %v1219_v56 }
 0x156   : > { %v529_v53 = vpop.f32.mrb[20].mxu0  ;;  %v1245_v54 = vpop.f32.mrb[20].mxu1 }
 0x157   : > { %v658_v55 = vmul.f32 0.088388346, %v529_v53  ;;  %v531_v57 = vpop.f32.mrb[21].mxu0  ;;  %v1247_v58 = vpop.f32.mrb[21].mxu1 }
 0x158   : > { %v659_v59 = vmul.f32 0.088388346, %v531_v57  ;;  %v533_v60 = vpop.f32.mrb[22].mxu0  ;;  %v1249_v61 = vpop.f32.mrb[22].mxu1  ;;  %v672_v57 = vmul.f32 0.088388346, %v1209_v39 }
 0x159   : > { %v711_v62 = vmax.f32 %v709_v42, %v658_v55  ;;  %v660_v0 = vmul.f32 0.088388346, %v533_v60  ;;  %v535_v1 = vpop.f32.mrb[23].mxu0  ;;  %v1251_v3 = vpop.f32.mrb[23].mxu1  ;;  %v670_v42 = vmul.f32 0.088388346, %v1205_v35 }
 0x15a   : > { %v748_v4 = vmax.f32 %v746_v48, %v659_v59  ;;  %v661_v6 = vmul.f32 0.088388346, %v535_v1  ;;  %v673_v59 = vmul.f32 0.088388346, %v1211_v41  ;;  %v675_v35 = vmul.f32 0.088388346, %v1215_v47 }
 0x15b   : > { %v712_v7 = vmax.f32 %v710_v50, %v660_v0  ;;  %v674_v0 = vmul.f32 0.088388346, %v1213_v43  ;;  %v679_v39 = vmul.f32 0.088388346, %v1223_v2  ;;  %v681_v43 = vmul.f32 0.088388346, %v1227_v9 }
 0x15c   : > { %v749_v8 = vmax.f32 %v747_v52, %v661_v6  ;;  %v676_v6 = vmul.f32 0.088388346, %v1217_v51  ;;  %v683_v51 = vmul.f32 0.088388346, %v1231_v18 }
 0x15e   : > { %v539_v10 = vpop.f32.mrb[24].mxu0  ;;  %v1253_v11 = vpop.f32.mrb[24].mxu1 }
 0x15f   : > { %v662_v12 = vmul.f32 0.088388346, %v539_v10  ;;  %v541_v13 = vpop.f32.mrb[25].mxu0  ;;  %v1255_v14 = vpop.f32.mrb[25].mxu1  ;;  %v678_v10 = vmul.f32 0.088388346, %v1221_v63 }
 0x160   : > { %v663_v16 = vmul.f32 0.088388346, %v541_v13  ;;  %v543_v17 = vpop.f32.mrb[26].mxu0  ;;  %v1257_v19 = vpop.f32.mrb[26].mxu1  ;;  %v680_v13 = vmul.f32 0.088388346, %v1225_v5 }
 0x161   : > { %v713_v20 = vmax.f32 %v711_v62, %v662_v12  ;;  %v664_v22 = vmul.f32 0.088388346, %v543_v17  ;;  %v545_v23 = vpop.f32.mrb[27].mxu0  ;;  %v1259_v24 = vpop.f32.mrb[27].mxu1  ;;  %v682_v17 = vmul.f32 0.088388346, %v1229_v15 }
 0x162   : > { %v750_v26 = vmax.f32 %v748_v4, %v663_v16  ;;  %v665_v27 = vmul.f32 0.088388346, %v545_v23  ;;  %v685_v63 = vmul.f32 0.088388346, %v1235_v25  ;;  %v687_v5 = vmul.f32 0.088388346, %v1239_v34 }
 0x163   : > { %v714_v28 = vmax.f32 %v712_v7, %v664_v22  ;;  %v684_v22 = vmul.f32 0.088388346, %v1233_v21  ;;  %v689_v15 = vmul.f32 0.088388346, %v1243_v46  ;;  %v691_v21 = vmul.f32 0.088388346, %v1247_v58 }
 0x164   : > { %v751_v29 = vmax.f32 %v749_v8, %v665_v27  ;;  %v695_v46 = vmul.f32 0.088388346, %v1255_v14  ;;  %v696_v58 = vmul.f32 0.088388346, %v1257_v19 }
 0x166   : > { %v549_v30 = vpop.f32.mrb[28].mxu0  ;;  %v629_v32 = vpop.f32.mrb[28].mxu1 }
 0x167   : > { %v666_v33 = vmul.f32 0.088388346, %v549_v30  ;;  %v551_v36 = vpop.f32.mrb[29].mxu0  ;;  %v631_v38 = vpop.f32.mrb[29].mxu1  ;;  %v690_v30 = vmul.f32 0.088388346, %v1245_v54 }
 0x168   : > { %v667_v44 = vmul.f32 0.088388346, %v551_v36  ;;  %v553_v45 = vpop.f32.mrb[30].mxu0  ;;  %v1262_v48 = vpop.f32.mrb[30].mxu1  ;;  %v692_v36 = vmul.f32 0.088388346, %v1249_v61 }
 0x169   : > { %v715_v50 = vmax.f32 %v713_v20, %v666_v33  ;;  %v668_v52 = vmul.f32 0.088388346, %v553_v45  ;;  %v555_v53 = vpop.f32.mrb[31].mxu0  ;;  %v1265_v55 = vpop.f32.mrb[31].mxu1  ;;  %v699_v54 = vmul.f32 0.088388346, %v631_v38 }
 0x16a   : > { %v752_v60 = vmax.f32 %v750_v26, %v667_v44  ;;  %v669_v62 = vmul.f32 0.088388346, %v555_v53  ;;  %v686_v26 = vmul.f32 0.088388346, %v1237_v31  ;;  %v693_v31 = vmul.f32 0.088388346, %v1251_v3 }
 0x16b   : > { %v717_v1 = vmax.f32 %v715_v50, %v670_v42  ;;  %v716_v4 = vmax.f32 %v714_v28, %v668_v52  ;;  %v688_v28 = vmul.f32 0.088388346, %v1241_v40  ;;  %v694_v44 = vmul.f32 0.088388346, %v1253_v11 }
 0x16c   : > { %v754_v7 = vmax.f32 %v752_v60, %v671_v49  ;;  %v753_v8 = vmax.f32 %v751_v29, %v669_v62  ;;  %v698_v49 = vmul.f32 0.088388346, %v629_v32  ;;  %v697_v61 = vmul.f32 0.088388346, %v1259_v24 }
 0x16d   : > { %v719_v12 = vmax.f32 %v717_v1, %v674_v0  ;;  %v718_v41 = vmax.f32 %v716_v4, %v672_v57  ;;  %v700_v11 = vmul.f32 0.088388346, %v1262_v48  ;;  %v701_v32 = vmul.f32 0.088388346, %v1265_v55 }
 0x16e   : > { %v756_v16 = vmax.f32 %v754_v7, %v675_v35  ;;  %v755_v47 = vmax.f32 %v753_v8, %v673_v59  ;;  %v1107_v8 = vmov 1966171168   ;;  %v783_v24 = vlaneseq }
 0x16f   : > { %v721_v20 = vmax.f32 %v719_v12, %v678_v10  ;;  %v720_v56 = vmax.f32 %v718_v41, %v676_v6  ;;  %v781_v10 = vunpack.c.l.s4 %v1107_v8 }
 0x170   : > { %v758_v23 = vmax.f32 %v756_v16, %v679_v39  ;;  %v757_v2 = vmax.f32 %v755_v47, %v677_v37  ;;  %vm798_vm1 = vcmp.lt.s32.totalorder %v783_v24, 256 }
 0x171   : > { %v722_v27 = vmax.f32 %v720_v56, %v680_v13  ;;  %v723_v9 = vmax.f32 %v721_v20, %v682_v17  ;;  %v782_v48 = vunpack.c.0.s8 %v781_v10 }
 0x172   : > { %v759_v29 = vmax.f32 %v757_v2, %v681_v43  ;;  %v760_v18 = vmax.f32 %v758_v23, %v683_v51  ;;  %v784_v43 = vshrl.u32 %v783_v24, 7 }
 0x173   : > { %v725_v33 = vmax.f32 %v723_v9, %v686_v26  ;;  %v724_v25 = vmax.f32 %v722_v27, %v684_v22  ;;  %v702_v22 = vld [vmem:[#allocation2] sm:$0x3] }
 0x174   : > { %v762_v42 = vmax.f32 %v760_v18, %v687_v5  ;;  %v761_v34 = vmax.f32 %v759_v29, %v685_v63  ;;  %v785_v51 = vsub.s32 %v782_v48, %v784_v43 }
 0x175   : > { %v727_v45 = vmax.f32 %v725_v33, %v690_v30  ;;  %v726_v40 = vmax.f32 %v724_v25, %v688_v28 }
 0x176   : > { %v764_v50 = vmax.f32 %v762_v42, %v691_v21  ;;  %v763_v52 = vmax.f32 %v761_v34, %v689_v15 }
 0x177   : > { %v729_v53 = vmax.f32 %v727_v45, %v694_v44  ;;  %v728_v57 = vmax.f32 %v726_v40, %v692_v36 }
 0x178   : > { %v766_v59 = vmax.f32 %v764_v50, %v695_v46  ;;  %v765_v3 = vmax.f32 %v763_v52, %v693_v31 }
 0x179   : > { %v730_v60 = vmax.f32 %v728_v57, %v696_v58  ;;  %v731_v62 = vmax.f32 %v729_v53, %v698_v49 }
 0x17a   : > { %v767_v0 = vmax.f32 %v765_v3, %v697_v61  ;;  %v768_v35 = vmax.f32 %v766_v59, %v699_v54 }
 0x17b   : > { %v732_v14 = vmax.f32 %v730_v60, %v700_v11 }
 0x17c   : > { %v769_v1 = vmax.f32 %v767_v0, %v701_v32 }
 0x17d   : > { %v733_v4 = vmax.f32 %v731_v62, %v732_v14 }
 0x17e   : > { %v770_v38 = vmax.f32 %v768_v35, %v769_v1 }
 0x17f   : > { %v734_v6 = vrot.slane %v733_v4, 4 }
 0x180   : > { %v771_v37 = vrot.slane %v770_v38, 4 }
 0x181   : > { %v735_v19 = vmax.f32 %v733_v4, %v734_v6 }
 0x182   : > { %v772_v7 = vmax.f32 %v770_v38, %v771_v37 }
 0x183   : > { %v736_v39 = vrot.slane %v735_v19, 2 }
 0x184   : > { %v773_v12 = vrot.slane %v772_v7, 2 }
 0x185   : > { %v737_v41 = vmax.f32 %v735_v19, %v736_v39 }
 0x186   : > { %v774_v13 = vmax.f32 %v772_v7, %v773_v12 }
 0x187   : > { %v738_v16 = vrot.slane %v737_v41, 1 }
 0x188   : > { %v775_v47 = vrot.slane %v774_v13, 1 }
 0x189   : > { %v739_v55 = vmax.f32 %v737_v41, %v738_v16 }
 0x18a   : > { %v776_v17 = vmax.f32 %v774_v13, %v775_v47 }
 0x18c   : > { %v779_v20 = vcombine.low %v739_v55, %v776_v17 }
 0x18e   : > { %v786_v56 = vrot.slane %v779_v20, %v785_v51  ;;  %804 = sbr.rel (%p925_p9) target bundleno = 415 (0x19f), region = 36 }
 0x190   : > { %v793_v63 = vrot.slane %v786_v56, %v785_v51 }
 0x192   : > { %v795_v23 = vadd.f32 %v793_v63, %v702_v22 }
 0x194   : > { %800 = vst.msk [vmem:[#allocation2] sm:$0x3] %vm798_vm1, %v795_v23 }
 0x19b   : > { %v805_v2 = vld [vmem:[#allocation2] sm:$0x3] }
 0x19c   : > { %v806_v26 = vmul.f32 0.5, %v805_v2 }
 0x19e   : > { %807 = vst.msk [vmem:[%s177_s29] sm:$0x3] %vm798_vm1, %v806_v26 }
 0x19f PF: > { %s12_s13 = sadd.s32 1, %s1104_s13   ;;  %s1319_s9 = smov %s1096_s11 }
 0x1a0   : > { %p9_p10 = scmp.ge.s32.totalorder %s12_s13, 6   ;;  %s1320_s10 = smov %s1100_s12 }
 0x1a1   : > { %s1321_s11 = smov %s1324_s14  ;;  %s1322_s12 = smov %s1328_s15 }
 0x1a2   :  { %11 = sbr.rel (!%p9_p10) target bundleno = 3 (0x3), region = 69 }

// kernel: att_layer_forward.5
= control target key start
LH: loop header
LB: loop body
LE: loop exit
PB: predicated region body
PF: predicated region fallthrough
CT: control target
= control target key end

     0   :  { %s2314_s30 = smov 0   ;;  %s2776_s0 = inlined_call_operand.vmem [shape: f32[512,128], index: 0, kind: input, shape index: {}]   ;;  %s2777_s1 = inlined_call_operand.vmem [shape: bf16[128,128], index: 1, kind: input, shape index: {}]   ;;  %s2778_s2 = inlined_call_operand.vmem [shape: f32[1,128], index: 2, kind: input, shape index: {}]   ;;  %s2779_s3 = inlined_call_operand.vmem [shape: bf16[128,128], index: 3, kind: input, shape index: {}]   ;;  %s2780_s4 = inlined_call_operand.vmem [shape: f32[1,128], index: 4, kind: input, shape index: {}]   ;;  %s2781_s5 = inlined_call_operand.vmem [shape: bf16[128,128], index: 5, kind: input, shape index: {}]   ;;  %s2782_s6 = inlined_call_operand.vmem [shape: f32[1,128], index: 6, kind: input, shape index: {}]   ;;  %s2783_s7 = inlined_call_operand.vmem [shape: f32[512,128], index: 7, kind: output, shape index: {0}]   ;;  %s2784_s8 = inlined_call_operand.vmem [shape: bf16[512,128], index: 8, kind: output, shape index: {1}]   ;;  %s2785_s9 = inlined_call_operand.vmem [shape: bf16[512,128], index: 9, kind: output, shape index: {2}]  }
   0x1 LB: > { %s1632_s10 = sadd.s32 4294967295, %s2262_s30   ;;  %p1636_p0 = scmp.ge.s32.totalorder %s2262_s30, 1  ;;  %s2262_s30 = sphi %s2314_s30, %s20_s30  }
   0x2   : > { %p293_p1 = scmp.lt.s32.totalorder %s2262_s30, 3 }
   0x4   : > { %p294_p2 = pnand %p1636_p0, %p293_p1 }
   0x5   : > { %v2232_v0 = vld [vmem:[%s2777_s1] sm:$0xff] (!%p294_p2)   ;;  %s1637_s13 = sshll.u32 (!%p294_p2), %s1632_s10, 5  ;;  %v2233_v1 = vld [vmem:[%s2777_s1 + $0x8] sm:$0xff] (!%p294_p2)   ;;  %v2234_v2 = vld [vmem:[%s2777_s1 + $0x10] sm:$0xff] (!%p294_p2)  }
   0x6   : > { %297 = sbr.rel (%p294_p2) target bundleno = 536 (0x218), region = 48  ;;  %p340_p3 = scmp.lt.s32.totalorder (!%p294_p2), %s1637_s13, 63  ;;  %2064 = vmatprep.subr.bf16.mxu0 (!%p294_p2), %v2232_v0  ;;  %2208 = vmatprep.subr.bf16.mxu1 (!%p294_p2), %v2232_v0  ;;  %v2235_v3 = vld [vmem:[%s2777_s1 + $0x18] sm:$0xff] (!%p294_p2)   ;;  %v2236_v7 = vld [vmem:[%s2777_s1 + $0x20] sm:$0xff] (!%p294_p2)   ;;  %v2237_v11 = vld [vmem:[%s2777_s1 + $0x28] sm:$0xff] (!%p294_p2)  }
   0x7   : > { %2065 = vmatpush3.bf16.msra.mxu0 (!%p294_p2), %v2232_v0  ;;  %2216 = vmatpush3.bf16.msra.mxu1 (!%p294_p2), %v2232_v0  ;;  %v2238_v12 = vld [vmem:[%s2777_s1 + $0x30] sm:$0xff] (!%p294_p2)   ;;  %v2239_v13 = vld [vmem:[%s2777_s1 + $0x38] sm:$0xff] (!%p294_p2)   ;;  %v2241_v22 = vld [vmem:[%s2781_s5] sm:$0xff] (!%p294_p2)  }
   0x8   : > { %2066 = vmatprep.subr.bf16.mxu0 (!%p294_p2), %v2233_v1  ;;  %2209 = vmatprep.subr.bf16.mxu1 (!%p294_p2), %v2233_v1  ;;  %v2240_v23 = vld [vmem:[%s2779_s3] sm:$0xff] (!%p294_p2)   ;;  %v2242_v28 = vld [vmem:[%s2779_s3 + $0x8] sm:$0xff] (!%p294_p2)   ;;  %v2244_v38 = vld [vmem:[%s2779_s3 + $0x10] sm:$0xff] (!%p294_p2)  }
   0x9   : > { %v2243_v29 = vld [vmem:[%s2781_s5 + $0x8] sm:$0xff] (!%p294_p2)   ;;  %v2245_v40 = vld [vmem:[%s2781_s5 + $0x10] sm:$0xff] (!%p294_p2)   ;;  %v2246_v44 = vld [vmem:[%s2779_s3 + $0x18] sm:$0xff] (!%p294_p2)  }
   0xa   : > { %v2247_v45 = vld [vmem:[%s2781_s5 + $0x18] sm:$0xff] (!%p294_p2)   ;;  %v2248_v54 = vld [vmem:[%s2779_s3 + $0x20] sm:$0xff] (!%p294_p2)   ;;  %v2250_v60 = vld [vmem:[%s2779_s3 + $0x28] sm:$0xff] (!%p294_p2)  }
   0xb   : > { %2067 = vmatpush3.bf16.msra.mxu0 (!%p294_p2), %v2233_v1  ;;  %2217 = vmatpush3.bf16.msra.mxu1 (!%p294_p2), %v2233_v1  ;;  %v2249_v56 = vld [vmem:[%s2781_s5 + $0x20] sm:$0xff] (!%p294_p2)   ;;  %v2251_v61 = vld [vmem:[%s2781_s5 + $0x28] sm:$0xff] (!%p294_p2)  }
   0xc   : > { %2068 = vmatprep.subr.bf16.mxu0 (!%p294_p2), %v2234_v2  ;;  %2210 = vmatprep.subr.bf16.mxu1 (!%p294_p2), %v2234_v2 }
   0xd   : > { %s2787_s13 = smov (!%p340_p3, %s1637_s13), 63 }
   0xe   : > { %s1638_s18 = sshll.u32 %s2787_s13, 3  ;;  %s1642_s19 = sshll.u32 %s2787_s13, 2 }
   0xf   : > { %s2339_s21 = scalar_lea.vmem %s2776_s0, %s1638_s18  ;;  %2069 = vmatpush3.bf16.msra.mxu0 %v2234_v2  ;;  %2218 = vmatpush3.bf16.msra.mxu1 %v2234_v2  ;;  %s2543_s14 = scalar_lea.vmem %s2783_s7, %s1638_s18 }
  0x10   : > { %v2345_v4 = vld [vmem:[%s2339_s21] sm:$0xff]  ;;  %v2348_v5 = vld [vmem:[%s2339_s21 + $0x8] sm:$0xff]  ;;  %2070 = vmatprep.subr.bf16.mxu0 %v2235_v3  ;;  %2211 = vmatprep.subr.bf16.mxu1 %v2235_v3  ;;  %v2373_v14 = vld [vmem:[%s2339_s21 + $0x10] sm:$0xff]  ;;  %s2676_s13 = scalar_lea.vmem %s2784_s8, %s1642_s19  ;;  %s2681_s24 = scalar_lea.vmem %s2785_s9, %s1642_s19 }
  0x11   : > { %v396_v6 = vpack.c.bf16 %v2348_v5, %v2345_v4  ;;  %v2356_v8 = vld [vmem:[%s2339_s21 + $0x80] sm:$0xff]  ;;  %v2359_v9 = vld [vmem:[%s2339_s21 + $0x88] sm:$0xff]  ;;  %v2376_v15 = vld [vmem:[%s2339_s21 + $0x18] sm:$0xff] }
  0x12   : > { %v404_v10 = vpack.c.bf16 %v2359_v9, %v2356_v8  ;;  %v2379_v16 = vld [vmem:[%s2339_s21 + $0x20] sm:$0xff]  ;;  %v2382_v17 = vld [vmem:[%s2339_s21 + $0x28] sm:$0xff]  ;;  %v2385_v18 = vld [vmem:[%s2339_s21 + $0x90] sm:$0xff]  ;;  %v397_v24 = vpack.c.bf16 %v2376_v15, %v2373_v14 }
  0x13   : > { %2080 = vmatprep.mubr.bf16.mxu0 %v396_v6  ;;  %2071 = vmatpush3.bf16.msra.mxu0 %v2235_v3  ;;  %v2388_v19 = vld [vmem:[%s2339_s21 + $0x98] sm:$0xff]  ;;  %v2391_v20 = vld [vmem:[%s2339_s21 + $0xa0] sm:$0xff]  ;;  %v2394_v21 = vld [vmem:[%s2339_s21 + $0xa8] sm:$0xff]  ;;  %v398_v25 = vpack.c.bf16 %v2382_v17, %v2379_v16 }
  0x14   : > { %2072 = vmatprep.subr.bf16.mxu0 %v2236_v7  ;;  %2219 = vmatpush3.bf16.msra.mxu1 %v2235_v3  ;;  %v405_v26 = vpack.c.bf16 %v2388_v19, %v2385_v18  ;;  %v406_v27 = vpack.c.bf16 %v2394_v21, %v2391_v20  ;;  %v2417_v30 = vld [vmem:[%s2339_s21 + $0x30] sm:$0xff]  ;;  %v2420_v31 = vld [vmem:[%s2339_s21 + $0x38] sm:$0xff]  ;;  %v2423_v32 = vld [vmem:[%s2339_s21 + $0x40] sm:$0xff] }
  0x15   : > { %2212 = vmatprep.subr.bf16.mxu1 %v2236_v7  ;;  %2096 = vmatprep.mubr.bf16.mxu1 %v404_v10  ;;  %v2426_v33 = vld [vmem:[%s2339_s21 + $0x48] sm:$0xff]  ;;  %v2429_v34 = vld [vmem:[%s2339_s21 + $0xb0] sm:$0xff]  ;;  %v2432_v35 = vld [vmem:[%s2339_s21 + $0xb8] sm:$0xff]  ;;  %v399_v39 = vpack.c.bf16 %v2420_v31, %v2417_v30 }
  0x16   : > { %v2435_v36 = vld [vmem:[%s2339_s21 + $0xc0] sm:$0xff]  ;;  %v2438_v37 = vld [vmem:[%s2339_s21 + $0xc8] sm:$0xff]  ;;  %v400_v41 = vpack.c.bf16 %v2426_v33, %v2423_v32  ;;  %v407_v42 = vpack.c.bf16 %v2432_v35, %v2429_v34  ;;  %v2461_v46 = vld [vmem:[%s2339_s21 + $0x50] sm:$0xff] }
  0x17   : > { %2073 = vmatpush3.bf16.msra.mxu0 %v2236_v7  ;;  %v408_v43 = vpack.c.bf16 %v2438_v37, %v2435_v36  ;;  %v2464_v47 = vld [vmem:[%s2339_s21 + $0x58] sm:$0xff]  ;;  %v2467_v48 = vld [vmem:[%s2339_s21 + $0x60] sm:$0xff]  ;;  %v2470_v49 = vld [vmem:[%s2339_s21 + $0x68] sm:$0xff] }
  0x18   : > { %2074 = vmatprep.subr.bf16.mxu0 %v2237_v11  ;;  %2220 = vmatpush3.bf16.msra.mxu1 %v2236_v7  ;;  %v2473_v50 = vld [vmem:[%s2339_s21 + $0xd0] sm:$0xff]  ;;  %v2476_v51 = vld [vmem:[%s2339_s21 + $0xd8] sm:$0xff]  ;;  %v2479_v52 = vld [vmem:[%s2339_s21 + $0xe0] sm:$0xff]  ;;  %v401_v55 = vpack.c.bf16 %v2464_v47, %v2461_v46  ;;  %v402_v57 = vpack.c.bf16 %v2470_v49, %v2467_v48 }
  0x19   : > { %2213 = vmatprep.subr.bf16.mxu1 %v2237_v11  ;;  %v2482_v53 = vld [vmem:[%s2339_s21 + $0xe8] sm:$0xff]  ;;  %v409_v58 = vpack.c.bf16 %v2476_v51, %v2473_v50  ;;  %v2505_v62 = vld [vmem:[%s2339_s21 + $0x70] sm:$0xff]  ;;  %v2508_v63 = vld [vmem:[%s2339_s21 + $0x78] sm:$0xff] }
  0x1a   : > { %v410_v59 = vpack.c.bf16 %v2482_v53, %v2479_v52  ;;  %v2511_v0 = vld [vmem:[%s2339_s21 + $0xf0] sm:$0xff]  ;;  %v2514_v1 = vld [vmem:[%s2339_s21 + $0xf8] sm:$0xff]  ;;  %v403_v2 = vpack.c.bf16 %v2508_v63, %v2505_v62 }
  0x1b   : > { %2075 = vmatpush3.bf16.msra.mxu0 %v2237_v11  ;;  %v411_v3 = vpack.c.bf16 %v2514_v1, %v2511_v0  ;;  %v2252_v6 = vld [vmem:[%s2779_s3 + $0x30] sm:$0xff]   ;;  %v2254_v10 = vld [vmem:[%s2779_s3 + $0x38] sm:$0xff]  }
  0x1c   : > { %2076 = vmatprep.subr.bf16.mxu0 %v2238_v12  ;;  %2221 = vmatpush3.bf16.msra.mxu1 %v2237_v11  ;;  %v2253_v7 = vld [vmem:[%s2781_s5 + $0x30] sm:$0xff]   ;;  %v2255_v11 = vld [vmem:[%s2781_s5 + $0x38] sm:$0xff]  }
  0x1d   : > { %2214 = vmatprep.subr.bf16.mxu1 %v2238_v12 }
  0x1f   : > { %2077 = vmatpush3.bf16.msra.mxu0 %v2238_v12 }
  0x20   : > { %2078 = vmatprep.subr.bf16.mxu0 %v2239_v13  ;;  %2222 = vmatpush3.bf16.msra.mxu1 %v2238_v12  ;;  %v2535_v12 = vld [vmem:[%s2778_s2] ss:$0 sm:$0xff] }
  0x21   : > { %2215 = vmatprep.subr.bf16.mxu1 %v2239_v13 }
  0x23   : > { %2079 = vmatpush3.bf16.msra.mxu0 %v2239_v13 }
  0x24   : > { %2223 = vmatpush3.bf16.msra.mxu1 %v2239_v13  ;;  %2160 = vmatprep.subr.bf16.mxu0 %v2241_v22 }
  0x25   : > { %2112 = vmatprep.subr.bf16.mxu1 %v2240_v23 }
  0x26   : > { %2081 = vmatmul.mubr.bf16.vlgmr.msra.gmra.mrb[0].mxu0 %v397_v24 }
  0x27   : > { %2084 = vmatprep.mubr.bf16.mxu0 %v398_v25  ;;  %2097 = vmatmul.mubr.bf16.vlgmr.msra.gmra.mrb[0].mxu1 %v405_v26 }
  0x28   : > { %2100 = vmatprep.mubr.bf16.mxu1 %v406_v27  ;;  %2113 = vmatpush3.bf16.msra.mxu1 %v2240_v23 }
  0x29   : > { %2161 = vmatpush3.bf16.msra.mxu0 %v2241_v22  ;;  %2114 = vmatprep.subr.bf16.mxu1 %v2242_v28 }
  0x2a   : > { %2162 = vmatprep.subr.bf16.mxu0 %v2243_v29 }
  0x2c   : > { %2115 = vmatpush3.bf16.msra.mxu1 %v2242_v28 }
  0x2d   : > { %2163 = vmatpush3.bf16.msra.mxu0 %v2243_v29  ;;  %2116 = vmatprep.subr.bf16.mxu1 %v2244_v38 }
  0x2e   : > { %2085 = vmatmul.mubr.bf16.gmra.mrb[4].mxu0 %v399_v39  ;;  %2164 = vmatprep.subr.bf16.mxu0 %v2245_v40 }
  0x2f   : > { %2088 = vmatprep.mubr.bf16.mxu0 %v400_v41  ;;  %2101 = vmatmul.mubr.bf16.gmra.mrb[4].mxu1 %v407_v42 }
  0x30   : > { %2104 = vmatprep.mubr.bf16.mxu1 %v408_v43  ;;  %2117 = vmatpush3.bf16.msra.mxu1 %v2244_v38 }
  0x31   : > { %2165 = vmatpush3.bf16.msra.mxu0 %v2245_v40  ;;  %2118 = vmatprep.subr.bf16.mxu1 %v2246_v44 }
  0x32   : > { %2166 = vmatprep.subr.bf16.mxu0 %v2247_v45 }
  0x34   : > { %2119 = vmatpush3.bf16.msra.mxu1 %v2246_v44 }
  0x35   : > { %2167 = vmatpush3.bf16.msra.mxu0 %v2247_v45  ;;  %2120 = vmatprep.subr.bf16.mxu1 %v2248_v54 }
  0x36   : > { %2089 = vmatmul.mubr.bf16.gmra.mrb[8].mxu0 %v401_v55  ;;  %2168 = vmatprep.subr.bf16.mxu0 %v2249_v56 }
  0x37   : > { %2092 = vmatprep.mubr.bf16.mxu0 %v402_v57  ;;  %2105 = vmatmul.mubr.bf16.gmra.mrb[8].mxu1 %v409_v58 }
  0x38   : > { %2108 = vmatprep.mubr.bf16.mxu1 %v410_v59  ;;  %2121 = vmatpush3.bf16.msra.mxu1 %v2248_v54 }
  0x39   : > { %2169 = vmatpush3.bf16.msra.mxu0 %v2249_v56  ;;  %2122 = vmatprep.subr.bf16.mxu1 %v2250_v60 }
  0x3a   : > { %2170 = vmatprep.subr.bf16.mxu0 %v2251_v61 }
  0x3c   : > { %2123 = vmatpush3.bf16.msra.mxu1 %v2250_v60 }
  0x3d   : > { %2171 = vmatpush3.bf16.msra.mxu0 %v2251_v61  ;;  %2124 = vmatprep.subr.bf16.mxu1 %v2252_v6 }
  0x3e   : > { %2093 = vmatmul.mubr.bf16.gmra.mrb[12].mxu0 %v403_v2  ;;  %2172 = vmatprep.subr.bf16.mxu0 %v2253_v7 }
  0x3f   : > { %2109 = vmatmul.mubr.bf16.gmra.mrb[12].mxu1 %v411_v3 }
  0x40   : > { %2125 = vmatpush3.bf16.msra.mxu1 %v2252_v6 }
  0x41   : > { %2173 = vmatpush3.bf16.msra.mxu0 %v2253_v7  ;;  %2126 = vmatprep.subr.bf16.mxu1 %v2254_v10 }
  0x42   : > { %2174 = vmatprep.subr.bf16.mxu0 %v2255_v11 }
  0x44   : > { %2127 = vmatpush3.bf16.msra.mxu1 %v2254_v10 }
  0x45   : > { %2175 = vmatpush3.bf16.msra.mxu0 %v2255_v11 }
  0xf9   : > { %v2082_v13 = vpop.f32.mrb[0].mxu0 }
  0xfa   : > { %v526_v22 = vadd.f32 %v2082_v13, %v2535_v12  ;;  %v517_v23 = vpop.f32.mrb[1].mxu0  ;;  %v2098_v24 = vpop.f32.mrb[0].mxu1 }
  0xfb   : > { %v518_v25 = vadd.f32 %v2535_v12, %v517_v23  ;;  %v2083_v26 = vpop.f32.mrb[2].mxu0  ;;  %v590_v27 = vadd.f32 %v2098_v24, %v2535_v12  ;;  %v581_v28 = vpop.f32.mrb[1].mxu1 }
  0xfc   : > { %v646_v29 = vadd.f32 %v526_v22, %v2373_v14  ;;  %v529_v38 = vadd.f32 %v2083_v26, %v2535_v12  ;;  %v520_v39 = vpop.f32.mrb[3].mxu0  ;;  %v582_v40 = vadd.f32 %v2535_v12, %v581_v28  ;;  %v2099_v41 = vpop.f32.mrb[2].mxu1 }
  0xfd   : > { %v644_v42 = vadd.f32 %v518_v25, %v2345_v4  ;;  %v521_v43 = vadd.f32 %v2535_v12, %v520_v39  ;;  %v662_v44 = vadd.f32 %v590_v27, %v2385_v18  ;;  %v593_v45 = vadd.f32 %v2099_v41, %v2535_v12  ;;  %v584_v54 = vpop.f32.mrb[3].mxu1 }
  0xfe   : > { %678 = vst [vmem:[%s2543_s14 + $0x10] sm:$0xff] %v646_v29  ;;  %v647_v14 = vadd.f32 %v529_v38, %v2376_v15  ;;  %v660_v55 = vadd.f32 %v582_v40, %v2356_v8  ;;  %v585_v56 = vadd.f32 %v2535_v12, %v584_v54 }
  0xff   : > { %676 = vst [vmem:[%s2543_s14] sm:$0xff] %v644_v42  ;;  %v645_v4 = vadd.f32 %v521_v43, %v2348_v5  ;;  %694 = vst [vmem:[%s2543_s14 + $0x90] sm:$0xff] %v662_v44  ;;  %v663_v57 = vadd.f32 %v593_v45, %v2388_v19 }
 0x100   : > { %679 = vst [vmem:[%s2543_s14 + $0x18] sm:$0xff] %v647_v14  ;;  %v709_v18 = vpack.c.bf16 %v647_v14, %v646_v29  ;;  %692 = vst [vmem:[%s2543_s14 + $0x80] sm:$0xff] %v660_v55  ;;  %v661_v58 = vadd.f32 %v585_v56, %v2359_v9 }
 0x101   : > { %677 = vst [vmem:[%s2543_s14 + $0x8] sm:$0xff] %v645_v4  ;;  %v2086_v59 = vpop.f32.mrb[4].mxu0  ;;  %v708_v60 = vpack.c.bf16 %v645_v4, %v644_v42  ;;  %695 = vst [vmem:[%s2543_s14 + $0x98] sm:$0xff] %v663_v57  ;;  %v2567_v15 = vpack.c.bf16 %v663_v57, %v662_v44 }
 0x102   : > { %v542_v8 = vadd.f32 %v2086_v59, %v2535_v12  ;;  %v533_v61 = vpop.f32.mrb[5].mxu0  ;;  %693 = vst [vmem:[%s2543_s14 + $0x88] sm:$0xff] %v661_v58  ;;  %v2102_v2 = vpop.f32.mrb[4].mxu1  ;;  %v2571_v5 = vpack.c.bf16 %v661_v58, %v660_v55 }
 0x103   : > { %v534_v19 = vadd.f32 %v2535_v12, %v533_v61  ;;  %v2087_v3 = vpop.f32.mrb[6].mxu0  ;;  %2128 = vmatprep.mubr.bf16.mxu1 %v708_v60  ;;  %2176 = vmatprep.mubr.bf16.mxu0 %v708_v60  ;;  %v606_v9 = vadd.f32 %v2102_v2, %v2535_v12  ;;  %v597_v6 = vpop.f32.mrb[5].mxu1 }
 0x104   : > { %v650_v7 = vadd.f32 %v542_v8, %v2417_v30  ;;  %v545_v10 = vadd.f32 %v2087_v3, %v2535_v12  ;;  %v536_v11 = vpop.f32.mrb[7].mxu0  ;;  %2129 = vmatmul.mubr.bf16.vlgmr.msra.gmra.mrb[16].mxu1 %v709_v18  ;;  %2177 = vmatmul.mubr.bf16.vlgmr.msra.gmra.mrb[16].mxu0 %v709_v18  ;;  %v598_v13 = vadd.f32 %v2535_v12, %v597_v6  ;;  %v2103_v22 = vpop.f32.mrb[6].mxu1 }
 0x105   : > { %v648_v23 = vadd.f32 %v534_v19, %v2379_v16  ;;  %v537_v24 = vadd.f32 %v2535_v12, %v536_v11  ;;  %v666_v25 = vadd.f32 %v606_v9, %v2429_v34  ;;  %v609_v30 = vadd.f32 %v2103_v22, %v2535_v12  ;;  %v600_v26 = vpop.f32.mrb[7].mxu1 }
 0x106   : > { %682 = vst [vmem:[%s2543_s14 + $0x30] sm:$0xff] %v650_v7  ;;  %v651_v27 = vadd.f32 %v545_v10, %v2420_v31  ;;  %v664_v28 = vadd.f32 %v598_v13, %v2391_v20  ;;  %v601_v29 = vadd.f32 %v2535_v12, %v600_v26 }
 0x107   : > { %680 = vst [vmem:[%s2543_s14 + $0x20] sm:$0xff] %v648_v23  ;;  %v649_v16 = vadd.f32 %v537_v24, %v2382_v17  ;;  %698 = vst [vmem:[%s2543_s14 + $0xb0] sm:$0xff] %v666_v25  ;;  %v667_v38 = vadd.f32 %v609_v30, %v2432_v35 }
 0x108   : > { %683 = vst [vmem:[%s2543_s14 + $0x38] sm:$0xff] %v651_v27  ;;  %v711_v34 = vpack.c.bf16 %v651_v27, %v650_v7  ;;  %696 = vst [vmem:[%s2543_s14 + $0xa0] sm:$0xff] %v664_v28  ;;  %v665_v39 = vadd.f32 %v601_v29, %v2394_v21 }
 0x109   : > { %681 = vst [vmem:[%s2543_s14 + $0x28] sm:$0xff] %v649_v16  ;;  %v2090_v40 = vpop.f32.mrb[8].mxu0  ;;  %v710_v41 = vpack.c.bf16 %v649_v16, %v648_v23  ;;  %699 = vst [vmem:[%s2543_s14 + $0xb8] sm:$0xff] %v667_v38  ;;  %v2595_v31 = vpack.c.bf16 %v667_v38, %v666_v25 }
 0x10a   : > { %v558_v20 = vadd.f32 %v2090_v40, %v2535_v12  ;;  %v549_v42 = vpop.f32.mrb[9].mxu0  ;;  %697 = vst [vmem:[%s2543_s14 + $0xa8] sm:$0xff] %v665_v39  ;;  %v2106_v43 = vpop.f32.mrb[8].mxu1  ;;  %v2599_v17 = vpack.c.bf16 %v665_v39, %v664_v28 }
 0x10b   : > { %v550_v35 = vadd.f32 %v2535_v12, %v549_v42  ;;  %v2091_v44 = vpop.f32.mrb[10].mxu0  ;;  %2132 = vmatprep.mubr.bf16.mxu1 %v710_v41  ;;  %2180 = vmatprep.mubr.bf16.mxu0 %v710_v41  ;;  %v622_v21 = vadd.f32 %v2106_v43, %v2535_v12  ;;  %v613_v45 = vpop.f32.mrb[9].mxu1 }
 0x10c   : > { %v654_v54 = vadd.f32 %v558_v20, %v2461_v46  ;;  %v561_v14 = vadd.f32 %v2091_v44, %v2535_v12  ;;  %v552_v55 = vpop.f32.mrb[11].mxu0  ;;  %2133 = vmatmul.mubr.bf16.gmra.mrb[20].mxu1 %v711_v34  ;;  %2181 = vmatmul.mubr.bf16.gmra.mrb[20].mxu0 %v711_v34  ;;  %v614_v56 = vadd.f32 %v2535_v12, %v613_v45  ;;  %v2107_v4 = vpop.f32.mrb[10].mxu1 }
 0x10d   : > { %v652_v57 = vadd.f32 %v550_v35, %v2423_v32  ;;  %v553_v18 = vadd.f32 %v2535_v12, %v552_v55  ;;  %v670_v58 = vadd.f32 %v622_v21, %v2473_v50  ;;  %v625_v46 = vadd.f32 %v2107_v4, %v2535_v12  ;;  %v616_v59 = vpop.f32.mrb[11].mxu1 }
 0x10e   : > { %686 = vst [vmem:[%s2543_s14 + $0x50] sm:$0xff] %v654_v54  ;;  %v655_v60 = vadd.f32 %v561_v14, %v2464_v47  ;;  %v668_v8 = vadd.f32 %v614_v56, %v2435_v36  ;;  %v617_v61 = vadd.f32 %v2535_v12, %v616_v59 }
 0x10f   : > { %684 = vst [vmem:[%s2543_s14 + $0x40] sm:$0xff] %v652_v57  ;;  %v653_v32 = vadd.f32 %v553_v18, %v2426_v33  ;;  %702 = vst [vmem:[%s2543_s14 + $0xd0] sm:$0xff] %v670_v58  ;;  %v671_v2 = vadd.f32 %v625_v46, %v2476_v51 }
 0x110   : > { %687 = vst [vmem:[%s2543_s14 + $0x58] sm:$0xff] %v655_v60  ;;  %v713_v50 = vpack.c.bf16 %v655_v60, %v654_v54  ;;  %700 = vst [vmem:[%s2543_s14 + $0xc0] sm:$0xff] %v668_v8  ;;  %v669_v19 = vadd.f32 %v617_v61, %v2438_v37 }
 0x111   : > { %685 = vst [vmem:[%s2543_s14 + $0x48] sm:$0xff] %v653_v32  ;;  %v2094_v3 = vpop.f32.mrb[12].mxu0  ;;  %v712_v9 = vpack.c.bf16 %v653_v32, %v652_v57  ;;  %703 = vst [vmem:[%s2543_s14 + $0xd8] sm:$0xff] %v671_v2  ;;  %v721_v47 = vpack.c.bf16 %v671_v2, %v670_v58 }
 0x112   : > { %v574_v36 = vadd.f32 %v2094_v3, %v2535_v12  ;;  %v565_v6 = vpop.f32.mrb[13].mxu0  ;;  %701 = vst [vmem:[%s2543_s14 + $0xc8] sm:$0xff] %v669_v19  ;;  %v2110_v7 = vpop.f32.mrb[12].mxu1  ;;  %v720_v10 = vpack.c.bf16 %v669_v19, %v668_v8 }
 0x113   : > { %v566_v33 = vadd.f32 %v2535_v12, %v565_v6  ;;  %v2095_v11 = vpop.f32.mrb[14].mxu0  ;;  %2136 = vmatprep.mubr.bf16.mxu1 %v712_v9  ;;  %2184 = vmatprep.mubr.bf16.mxu0 %v712_v9  ;;  %v638_v51 = vadd.f32 %v2110_v7, %v2535_v12  ;;  %v629_v37 = vpop.f32.mrb[13].mxu1 }
 0x114   : > { %v658_v13 = vadd.f32 %v574_v36, %v2505_v62  ;;  %v577_v22 = vadd.f32 %v2095_v11, %v2535_v12  ;;  %v568_v23 = vpop.f32.mrb[15].mxu0  ;;  %2137 = vmatmul.mubr.bf16.gmra.mrb[24].mxu1 %v713_v50  ;;  %2185 = vmatmul.mubr.bf16.gmra.mrb[24].mxu0 %v713_v50  ;;  %v630_v24 = vadd.f32 %v2535_v12, %v629_v37  ;;  %v2111_v25 = vpop.f32.mrb[14].mxu1 }
 0x115   : > { %v656_v30 = vadd.f32 %v566_v33, %v2467_v48  ;;  %v569_v26 = vadd.f32 %v2535_v12, %v568_v23  ;;  %v674_v27 = vadd.f32 %v638_v51, %v2511_v0  ;;  %v641_v62 = vadd.f32 %v2111_v25, %v2535_v12  ;;  %v632_v28 = vpop.f32.mrb[15].mxu1 }
 0x116   : > { %690 = vst [vmem:[%s2543_s14 + $0x70] sm:$0xff] %v658_v13  ;;  %v659_v29 = vadd.f32 %v577_v22, %v2508_v63  ;;  %v672_v16 = vadd.f32 %v630_v24, %v2479_v52  ;;  %v633_v38 = vadd.f32 %v2535_v12, %v632_v28  ;;  %v2659_v52 = vld [vmem:[%s2780_s4] ss:$0 sm:$0xff] }
 0x117   : > { %688 = vst [vmem:[%s2543_s14 + $0x60] sm:$0xff] %v656_v30  ;;  %v657_v48 = vadd.f32 %v569_v26, %v2470_v49  ;;  %706 = vst [vmem:[%s2543_s14 + $0xf0] sm:$0xff] %v674_v27  ;;  %v675_v34 = vadd.f32 %v641_v62, %v2514_v1  ;;  %v2664_v1 = vld [vmem:[%s2782_s6] ss:$0 sm:$0xff] }
 0x118   : > { %691 = vst [vmem:[%s2543_s14 + $0x78] sm:$0xff] %v659_v29  ;;  %v715_v0 = vpack.c.bf16 %v659_v29, %v658_v13  ;;  %704 = vst [vmem:[%s2543_s14 + $0xe0] sm:$0xff] %v672_v16  ;;  %v673_v39 = vadd.f32 %v633_v38, %v2482_v53 }
 0x119   : > { %689 = vst [vmem:[%s2543_s14 + $0x68] sm:$0xff] %v657_v48  ;;  %v714_v40 = vpack.c.bf16 %v657_v48, %v656_v30  ;;  %707 = vst [vmem:[%s2543_s14 + $0xf8] sm:$0xff] %v675_v34  ;;  %v723_v41 = vpack.c.bf16 %v675_v34, %v674_v27 }
 0x11a   : > { %705 = vst [vmem:[%s2543_s14 + $0xe8] sm:$0xff] %v673_v39  ;;  %v722_v63 = vpack.c.bf16 %v673_v39, %v672_v16 }
 0x11b   : > { %2140 = vmatprep.mubr.bf16.mxu1 %v714_v40  ;;  %2188 = vmatprep.mubr.bf16.mxu0 %v714_v40 }
 0x11c   : > { %2141 = vmatmul.mubr.bf16.gmra.mrb[28].mxu1 %v715_v0  ;;  %2189 = vmatmul.mubr.bf16.gmra.mrb[28].mxu0 %v715_v0 }
 0x11d   : > { %2144 = vmatprep.mubr.bf16.mxu1 %v2571_v5  ;;  %2192 = vmatprep.mubr.bf16.mxu0 %v2571_v5 }
 0x124   : > { %2145 = vmatmul.mubr.bf16.gmra.mrb[32].mxu1 %v2567_v15  ;;  %2193 = vmatmul.mubr.bf16.gmra.mrb[32].mxu0 %v2567_v15 }
 0x125   : > { %2148 = vmatprep.mubr.bf16.mxu1 %v2599_v17  ;;  %2196 = vmatprep.mubr.bf16.mxu0 %v2599_v17 }
 0x12c   : > { %2149 = vmatmul.mubr.bf16.gmra.mrb[36].mxu1 %v2595_v31  ;;  %2197 = vmatmul.mubr.bf16.gmra.mrb[36].mxu0 %v2595_v31 }
 0x12d   : > { %2152 = vmatprep.mubr.bf16.mxu1 %v720_v10  ;;  %2200 = vmatprep.mubr.bf16.mxu0 %v720_v10 }
 0x134   : > { %2153 = vmatmul.mubr.bf16.gmra.mrb[40].mxu1 %v721_v47  ;;  %2201 = vmatmul.mubr.bf16.gmra.mrb[40].mxu0 %v721_v47 }
 0x135   : > { %2156 = vmatprep.mubr.bf16.mxu1 %v722_v63  ;;  %2204 = vmatprep.mubr.bf16.mxu0 %v722_v63 }
 0x13c   : > { %2157 = vmatmul.mubr.bf16.gmra.mrb[44].mxu1 %v723_v41  ;;  %2205 = vmatmul.mubr.bf16.gmra.mrb[44].mxu0 %v723_v41 }
 0x1d7   : > { %v2130_v49 = vpop.f32.mrb[16].mxu1  ;;  %v2178_v53 = vpop.f32.mrb[16].mxu0 }
 0x1d8   : > { %v829_v12 = vpop.f32.mrb[17].mxu1  ;;  %v1221_v15 = vpop.f32.mrb[17].mxu0  ;;  %v838_v20 = vadd.f32 %v2130_v49, %v2659_v52  ;;  %v1230_v42 = vadd.f32 %v2178_v53, %v2664_v1 }
 0x1d9   : > { %v2131_v5 = vpop.f32.mrb[18].mxu1  ;;  %v2179_v31 = vpop.f32.mrb[18].mxu0  ;;  %v830_v21 = vadd.f32 %v2659_v52, %v829_v12  ;;  %v1222_v45 = vadd.f32 %v2664_v1, %v1221_v15 }
 0x1da   : > { %v841_v43 = vadd.f32 %v2131_v5, %v2659_v52  ;;  %v1233_v17 = vadd.f32 %v2179_v31, %v2664_v1  ;;  %v832_v35 = vpop.f32.mrb[19].mxu1  ;;  %v1224_v44 = vpop.f32.mrb[19].mxu0 }
 0x1db   : > { %v833_v54 = vadd.f32 %v2659_v52, %v832_v35  ;;  %v1225_v14 = vadd.f32 %v2664_v1, %v1224_v44 }
 0x1dc   : > { %v1810_v55 = vpack.c.bf16 %v841_v43, %v838_v20  ;;  %v1890_v56 = vpack.c.bf16 %v1233_v17, %v1230_v42 }
 0x1dd   : > { %v1805_v4 = vpack.c.bf16 %v833_v54, %v830_v21  ;;  %v1885_v57 = vpack.c.bf16 %v1225_v14, %v1222_v45 }
 0x1de   : > { %1962 = vst [vmem:[%s2676_s13 + $0x8] sm:$0xff] %v1810_v55   ;;  %1977 = vst [vmem:[%s2681_s24 + $0x8] sm:$0xff] %v1890_v56  }
 0x1df   : > { %1806 = vst [vmem:[%s2676_s13] sm:$0xff] %v1805_v4   ;;  %1886 = vst [vmem:[%s2681_s24] sm:$0xff] %v1885_v57   ;;  %v2134_v18 = vpop.f32.mrb[20].mxu1  ;;  %v2182_v58 = vpop.f32.mrb[20].mxu0 }
 0x1e0   : > { %v845_v46 = vpop.f32.mrb[21].mxu1  ;;  %v1237_v59 = vpop.f32.mrb[21].mxu0  ;;  %v854_v61 = vadd.f32 %v2134_v18, %v2659_v52  ;;  %v1246_v32 = vadd.f32 %v2182_v58, %v2664_v1 }
 0x1e1   : > { %v2135_v60 = vpop.f32.mrb[22].mxu1  ;;  %v2183_v8 = vpop.f32.mrb[22].mxu0  ;;  %v846_v9 = vadd.f32 %v2659_v52, %v845_v46  ;;  %v1238_v47 = vadd.f32 %v2664_v1, %v1237_v59 }
 0x1e2   : > { %v857_v2 = vadd.f32 %v2135_v60, %v2659_v52  ;;  %v1249_v50 = vadd.f32 %v2183_v8, %v2664_v1  ;;  %v848_v19 = vpop.f32.mrb[23].mxu1  ;;  %v1240_v3 = vpop.f32.mrb[23].mxu0 }
 0x1e3   : > { %v849_v36 = vadd.f32 %v2659_v52, %v848_v19  ;;  %v1241_v6 = vadd.f32 %v2664_v1, %v1240_v3 }
 0x1e4   : > { %v1820_v7 = vpack.c.bf16 %v857_v2, %v854_v61  ;;  %v1900_v10 = vpack.c.bf16 %v1249_v50, %v1246_v32 }
 0x1e5   : > { %v1815_v33 = vpack.c.bf16 %v849_v36, %v846_v9  ;;  %v1895_v11 = vpack.c.bf16 %v1241_v6, %v1238_v47 }
 0x1e6   : > { %1964 = vst [vmem:[%s2676_s13 + $0x18] sm:$0xff] %v1820_v7   ;;  %1979 = vst [vmem:[%s2681_s24 + $0x18] sm:$0xff] %v1900_v10  }
 0x1e7   : > { %1963 = vst [vmem:[%s2676_s13 + $0x10] sm:$0xff] %v1815_v33   ;;  %1978 = vst [vmem:[%s2681_s24 + $0x10] sm:$0xff] %v1895_v11   ;;  %v2138_v51 = vpop.f32.mrb[24].mxu1  ;;  %v2186_v37 = vpop.f32.mrb[24].mxu0 }
 0x1e8   : > { %v861_v13 = vpop.f32.mrb[25].mxu1  ;;  %v1253_v22 = vpop.f32.mrb[25].mxu0  ;;  %v870_v25 = vadd.f32 %v2138_v51, %v2659_v52  ;;  %v1262_v30 = vadd.f32 %v2186_v37, %v2664_v1 }
 0x1e9   : > { %v2139_v23 = vpop.f32.mrb[26].mxu1  ;;  %v2187_v24 = vpop.f32.mrb[26].mxu0  ;;  %v862_v29 = vadd.f32 %v2659_v52, %v861_v13  ;;  %v1254_v16 = vadd.f32 %v2664_v1, %v1253_v22 }
 0x1ea   : > { %v873_v26 = vadd.f32 %v2139_v23, %v2659_v52  ;;  %v1265_v27 = vadd.f32 %v2187_v24, %v2664_v1  ;;  %v864_v62 = vpop.f32.mrb[27].mxu1  ;;  %v1256_v28 = vpop.f32.mrb[27].mxu0 }
 0x1eb   : > { %v865_v38 = vadd.f32 %v2659_v52, %v864_v62  ;;  %v1257_v48 = vadd.f32 %v2664_v1, %v1256_v28 }
 0x1ec   : > { %v1830_v34 = vpack.c.bf16 %v873_v26, %v870_v25  ;;  %v1910_v0 = vpack.c.bf16 %v1265_v27, %v1262_v30 }
 0x1ed   : > { %v1825_v39 = vpack.c.bf16 %v865_v38, %v862_v29  ;;  %v1905_v40 = vpack.c.bf16 %v1257_v48, %v1254_v16 }
 0x1ee   : > { %1966 = vst [vmem:[%s2676_s13 + $0x28] sm:$0xff] %v1830_v34   ;;  %1981 = vst [vmem:[%s2681_s24 + $0x28] sm:$0xff] %v1910_v0  }
 0x1ef   : > { %1965 = vst [vmem:[%s2676_s13 + $0x20] sm:$0xff] %v1825_v39   ;;  %1980 = vst [vmem:[%s2681_s24 + $0x20] sm:$0xff] %v1905_v40   ;;  %v2142_v41 = vpop.f32.mrb[28].mxu1  ;;  %v2190_v63 = vpop.f32.mrb[28].mxu0 }
 0x1f0   : > { %v877_v49 = vpop.f32.mrb[29].mxu1  ;;  %v1269_v53 = vpop.f32.mrb[29].mxu0  ;;  %v886_v5 = vadd.f32 %v2142_v41, %v2659_v52  ;;  %v1278_v31 = vadd.f32 %v2190_v63, %v2664_v1 }
 0x1f1   : > { %v2143_v12 = vpop.f32.mrb[30].mxu1  ;;  %v2191_v15 = vpop.f32.mrb[30].mxu0  ;;  %v878_v35 = vadd.f32 %v2659_v52, %v877_v49  ;;  %v1270_v44 = vadd.f32 %v2664_v1, %v1269_v53 }
 0x1f2   : > { %v889_v20 = vadd.f32 %v2143_v12, %v2659_v52  ;;  %v1281_v42 = vadd.f32 %v2191_v15, %v2664_v1  ;;  %v880_v43 = vpop.f32.mrb[31].mxu1  ;;  %v1272_v17 = vpop.f32.mrb[31].mxu0 }
 0x1f3   : > { %v881_v21 = vadd.f32 %v2659_v52, %v880_v43  ;;  %v1273_v45 = vadd.f32 %v2664_v1, %v1272_v17 }
 0x1f4   : > { %v1840_v54 = vpack.c.bf16 %v889_v20, %v886_v5  ;;  %v1920_v14 = vpack.c.bf16 %v1281_v42, %v1278_v31 }
 0x1f5   : > { %v1835_v55 = vpack.c.bf16 %v881_v21, %v878_v35  ;;  %v1915_v56 = vpack.c.bf16 %v1273_v45, %v1270_v44 }
 0x1f6   : > { %1968 = vst [vmem:[%s2676_s13 + $0x38] sm:$0xff] %v1840_v54   ;;  %1983 = vst [vmem:[%s2681_s24 + $0x38] sm:$0xff] %v1920_v14  }
 0x1f7   : > { %1967 = vst [vmem:[%s2676_s13 + $0x30] sm:$0xff] %v1835_v55   ;;  %1982 = vst [vmem:[%s2681_s24 + $0x30] sm:$0xff] %v1915_v56   ;;  %v2146_v4 = vpop.f32.mrb[32].mxu1  ;;  %v2194_v57 = vpop.f32.mrb[32].mxu0 }
 0x1f8   : > { %v893_v18 = vpop.f32.mrb[33].mxu1  ;;  %v1285_v58 = vpop.f32.mrb[33].mxu0  ;;  %v902_v60 = vadd.f32 %v2146_v4, %v2659_v52  ;;  %v1294_v8 = vadd.f32 %v2194_v57, %v2664_v1 }
 0x1f9   : > { %v2147_v46 = vpop.f32.mrb[34].mxu1  ;;  %v2195_v59 = vpop.f32.mrb[34].mxu0  ;;  %v894_v19 = vadd.f32 %v2659_v52, %v893_v18  ;;  %v1286_v3 = vadd.f32 %v2664_v1, %v1285_v58 }
 0x1fa   : > { %v905_v61 = vadd.f32 %v2147_v46, %v2659_v52  ;;  %v1297_v32 = vadd.f32 %v2195_v59, %v2664_v1  ;;  %v896_v2 = vpop.f32.mrb[35].mxu1  ;;  %v1288_v50 = vpop.f32.mrb[35].mxu0 }
 0x1fb   : > { %v897_v9 = vadd.f32 %v2659_v52, %v896_v2  ;;  %v1289_v47 = vadd.f32 %v2664_v1, %v1288_v50 }
 0x1fc   : > { %v1850_v36 = vpack.c.bf16 %v905_v61, %v902_v60  ;;  %v1930_v6 = vpack.c.bf16 %v1297_v32, %v1294_v8 }
 0x1fd   : > { %v1845_v7 = vpack.c.bf16 %v897_v9, %v894_v19  ;;  %v1925_v10 = vpack.c.bf16 %v1289_v47, %v1286_v3 }
 0x1fe   : > { %1970 = vst [vmem:[%s2676_s13 + $0x48] sm:$0xff] %v1850_v36   ;;  %1985 = vst [vmem:[%s2681_s24 + $0x48] sm:$0xff] %v1930_v6  }
 0x1ff   : > { %1969 = vst [vmem:[%s2676_s13 + $0x40] sm:$0xff] %v1845_v7   ;;  %1984 = vst [vmem:[%s2681_s24 + $0x40] sm:$0xff] %v1925_v10   ;;  %v2150_v33 = vpop.f32.mrb[36].mxu1  ;;  %v2198_v11 = vpop.f32.mrb[36].mxu0 }
 0x200   : > { %v909_v51 = vpop.f32.mrb[37].mxu1  ;;  %v1301_v37 = vpop.f32.mrb[37].mxu0  ;;  %v918_v23 = vadd.f32 %v2150_v33, %v2659_v52  ;;  %v1310_v24 = vadd.f32 %v2198_v11, %v2664_v1 }
 0x201   : > { %v2151_v13 = vpop.f32.mrb[38].mxu1  ;;  %v2199_v22 = vpop.f32.mrb[38].mxu0  ;;  %v910_v62 = vadd.f32 %v2659_v52, %v909_v51  ;;  %v1302_v28 = vadd.f32 %v2664_v1, %v1301_v37 }
 0x202   : > { %v921_v25 = vadd.f32 %v2151_v13, %v2659_v52  ;;  %v1313_v30 = vadd.f32 %v2199_v22, %v2664_v1  ;;  %v912_v26 = vpop.f32.mrb[39].mxu1  ;;  %v1304_v27 = vpop.f32.mrb[39].mxu0 }
 0x203   : > { %v913_v29 = vadd.f32 %v2659_v52, %v912_v26  ;;  %v1305_v16 = vadd.f32 %v2664_v1, %v1304_v27 }
 0x204   : > { %v1860_v38 = vpack.c.bf16 %v921_v25, %v918_v23  ;;  %v1940_v48 = vpack.c.bf16 %v1313_v30, %v1310_v24 }
 0x205   : > { %v1855_v34 = vpack.c.bf16 %v913_v29, %v910_v62  ;;  %v1935_v0 = vpack.c.bf16 %v1305_v16, %v1302_v28 }
 0x206   : > { %1972 = vst [vmem:[%s2676_s13 + $0x58] sm:$0xff] %v1860_v38   ;;  %1987 = vst [vmem:[%s2681_s24 + $0x58] sm:$0xff] %v1940_v48  }
 0x207   : > { %1971 = vst [vmem:[%s2676_s13 + $0x50] sm:$0xff] %v1855_v34   ;;  %1986 = vst [vmem:[%s2681_s24 + $0x50] sm:$0xff] %v1935_v0   ;;  %v2154_v39 = vpop.f32.mrb[40].mxu1  ;;  %v2202_v40 = vpop.f32.mrb[40].mxu0 }
 0x208   : > { %v925_v41 = vpop.f32.mrb[41].mxu1  ;;  %v1317_v63 = vpop.f32.mrb[41].mxu0  ;;  %v934_v12 = vadd.f32 %v2154_v39, %v2659_v52  ;;  %v1326_v15 = vadd.f32 %v2202_v40, %v2664_v1 }
 0x209   : > { %v2155_v49 = vpop.f32.mrb[42].mxu1  ;;  %v2203_v53 = vpop.f32.mrb[42].mxu0  ;;  %v926_v43 = vadd.f32 %v2659_v52, %v925_v41  ;;  %v1318_v17 = vadd.f32 %v2664_v1, %v1317_v63 }
 0x20a   : > { %v937_v5 = vadd.f32 %v2155_v49, %v2659_v52  ;;  %v1329_v31 = vadd.f32 %v2203_v53, %v2664_v1  ;;  %v928_v20 = vpop.f32.mrb[43].mxu1  ;;  %v1320_v42 = vpop.f32.mrb[43].mxu0 }
 0x20b   : > { %v929_v35 = vadd.f32 %v2659_v52, %v928_v20  ;;  %v1321_v44 = vadd.f32 %v2664_v1, %v1320_v42 }
 0x20c   : > { %v1870_v21 = vpack.c.bf16 %v937_v5, %v934_v12  ;;  %v1950_v45 = vpack.c.bf16 %v1329_v31, %v1326_v15 }
 0x20d   : > { %v1865_v54 = vpack.c.bf16 %v929_v35, %v926_v43  ;;  %v1945_v14 = vpack.c.bf16 %v1321_v44, %v1318_v17 }
 0x20e   : > { %1974 = vst [vmem:[%s2676_s13 + $0x68] sm:$0xff] %v1870_v21   ;;  %1989 = vst [vmem:[%s2681_s24 + $0x68] sm:$0xff] %v1950_v45  }
 0x20f   : > { %1973 = vst [vmem:[%s2676_s13 + $0x60] sm:$0xff] %v1865_v54   ;;  %1988 = vst [vmem:[%s2681_s24 + $0x60] sm:$0xff] %v1945_v14   ;;  %v2158_v55 = vpop.f32.mrb[44].mxu1  ;;  %v2206_v56 = vpop.f32.mrb[44].mxu0 }
 0x210   : > { %v941_v4 = vpop.f32.mrb[45].mxu1  ;;  %v1333_v57 = vpop.f32.mrb[45].mxu0  ;;  %v950_v46 = vadd.f32 %v2158_v55, %v2659_v52  ;;  %v1342_v59 = vadd.f32 %v2206_v56, %v2664_v1 }
 0x211   : > { %v2159_v18 = vpop.f32.mrb[46].mxu1  ;;  %v2207_v58 = vpop.f32.mrb[46].mxu0  ;;  %v942_v2 = vadd.f32 %v2659_v52, %v941_v4  ;;  %v1334_v50 = vadd.f32 %v2664_v1, %v1333_v57 }
 0x212   : > { %v953_v60 = vadd.f32 %v2159_v18, %v2659_v52  ;;  %v1345_v8 = vadd.f32 %v2207_v58, %v2664_v1  ;;  %v944_v61 = vpop.f32.mrb[47].mxu1  ;;  %v1336_v32 = vpop.f32.mrb[47].mxu0 }
 0x213   : > { %v945_v19 = vadd.f32 %v2659_v52, %v944_v61  ;;  %v1337_v3 = vadd.f32 %v2664_v1, %v1336_v32 }
 0x214   : > { %v1880_v9 = vpack.c.bf16 %v953_v60, %v950_v46  ;;  %v1960_v47 = vpack.c.bf16 %v1345_v8, %v1342_v59 }
 0x215   : > { %v1875_v36 = vpack.c.bf16 %v945_v19, %v942_v2  ;;  %v1955_v6 = vpack.c.bf16 %v1337_v3, %v1334_v50 }
 0x216   : > { %1976 = vst [vmem:[%s2676_s13 + $0x78] sm:$0xff] %v1880_v9   ;;  %1991 = vst [vmem:[%s2681_s24 + $0x78] sm:$0xff] %v1960_v47  }
 0x217   : > { %1975 = vst [vmem:[%s2676_s13 + $0x70] sm:$0xff] %v1875_v36   ;;  %1990 = vst [vmem:[%s2681_s24 + $0x70] sm:$0xff] %v1955_v6  }
 0x218 PF: > { %s20_s30 = sadd.s32 1, %s2262_s30  }
 0x219   : > { %p17_p4 = scmp.ge.s32.totalorder %s20_s30, 4  }
 0x21b   :  { %19 = sbr.rel (!%p17_p4) target bundleno = 1 (0x1), region = 102 }

// kernel: att_layer_forward.8
= control target key start
LH: loop header
LB: loop body
LE: loop exit
PB: predicated region body
PF: predicated region fallthrough
CT: control target
= control target key end

     0   :  { %s1367_s18 = smov 0   ;;  %s1768_s0 = inlined_call_operand.vmem [shape: f32[512,128], index: 0, kind: input, shape index: {}]   ;;  %s1769_s1 = inlined_call_operand.vmem [shape: f32[512,2], index: 1, kind: input, shape index: {}]   ;;  %s1770_s2 = inlined_call_operand.vmem [shape: f32[2,128], index: 2, kind: input, shape index: {}]   ;;  %s1771_s3 = inlined_call_operand.vmem [shape: f32[512,1], index: 3, kind: output, shape index: {0}]   ;;  %s1772_s4 = inlined_call_operand.vmem [shape: f32[2,128], index: 4, kind: output, shape index: {1}]   ;;  %s1773_s5 = inlined_call_operand.vmem [shape: f32[2,128], index: 5, kind: output, shape index: {2}]  }
   0x1 LB: > { %s1033_s19 = sadd.s32 4294967295, %s1334_s18   ;;  %p1037_p0 = scmp.ge.s32.totalorder %s1334_s18, 1  ;;  %s1334_s18 = sphi %s1367_s18, %s16_s18  }
   0x2   : > { %p194_p1 = scmp.lt.s32.totalorder %s1334_s18, 3 }
   0x4   : > { %p195_p2 = pnand %p1037_p0, %p194_p1 }
   0x5   : > { %s1038_s20 = sshll.u32 (!%p195_p2), %s1033_s19, 5  ;;  %p1044_p4 = scmp.ne.s32.totalorder (!%p195_p2), %s1033_s19, 0 }
   0x6   : > { %198 = sbr.rel (%p195_p2) target bundleno = 681 (0x2a9), region = 32  ;;  %p228_p3 = scmp.lt.s32.totalorder (!%p195_p2), %s1038_s20, 63 }
   0xd   : > { %s1775_s20 = smov (!%p228_p3, %s1038_s20), 63  ;;  %248 = sbr.rel (%p1044_p4) target bundleno = 20 (0x14), region = 36 }
   0xe   : > { %s1039_s21 = sshll.u32 %s1775_s20, 3  ;;  %v1336_v0 = vmov (!%p1044_p4), 0.0  }
   0xf   : > { %s1378_s24 = scalar_lea.vmem %s1768_s0, %s1039_s21  ;;  %s1383_s27 = scalar_lea.vmem %s1769_s1, %s1039_s21  ;;  %249 = vst [vmem:[%s1772_s4] sm:$0x3] (!%p1044_p4), %v1336_v0  ;;  %250 = vst [vmem:[%s1773_s5] sm:$0x3] (!%p1044_p4), %v1336_v0 }
  0x10   : > { %s1388_s30 = scalar_lea.vmem %s1771_s3, %s1039_s21 }
  0x14 PF: > { %v1397_v1 = vld [vmem:[%s1378_s24 + $0x80] sm:$0xff]  ;;  %v1400_v2 = vld [vmem:[%s1378_s24 + $0x88] sm:$0xff]  ;;  %v1417_v9 = vld [vmem:[%s1378_s24 + $0x90] sm:$0xff]  ;;  %vm476_vm0 = vcmask 1041408   ;;  %vm582_vm1 = vcmask 7168  }
  0x15   : > { %v1403_v3 = vld [vmem:[%s1378_s24] sm:$0xff]  ;;  %v299_v4 = vmul.f32 %v1397_v1, %v1397_v1  ;;  %v300_v5 = vmul.f32 %v1400_v2, %v1400_v2  ;;  %v1410_v6 = vld [vmem:[%s1378_s24 + $0x8] sm:$0xff]  ;;  %v1420_v10 = vld [vmem:[%s1378_s24 + $0x10] sm:$0xff]  ;;  %v301_v11 = vmul.f32 %v1417_v9, %v1417_v9 }
  0x16   : > { %v283_v7 = vmul.f32 %v1403_v3, %v1403_v3  ;;  %v284_v8 = vmul.f32 %v1410_v6, %v1410_v6  ;;  %v285_v12 = vmul.f32 %v1420_v10, %v1420_v10  ;;  %v1427_v13 = vld [vmem:[%s1378_s24 + $0x98] sm:$0xff]  ;;  %v1437_v17 = vld [vmem:[%s1378_s24 + $0xa0] sm:$0xff]  ;;  %v1447_v21 = vld [vmem:[%s1378_s24 + $0xa8] sm:$0xff] }
  0x17   : > { %347 = vadd.xlane.f32.xlu0 %v299_v4  ;;  %349 = vadd.xlane.f32.xlu1 %v300_v5  ;;  %v1430_v14 = vld [vmem:[%s1378_s24 + $0x18] sm:$0xff]  ;;  %v302_v15 = vmul.f32 %v1427_v13, %v1427_v13  ;;  %v1440_v18 = vld [vmem:[%s1378_s24 + $0x20] sm:$0xff]  ;;  %v303_v19 = vmul.f32 %v1437_v17, %v1437_v17  ;;  %v1450_v22 = vld [vmem:[%s1378_s24 + $0x28] sm:$0xff]  ;;  %v304_v23 = vmul.f32 %v1447_v21, %v1447_v21 }
  0x18   : > { %v286_v16 = vmul.f32 %v1430_v14, %v1430_v14  ;;  %v287_v20 = vmul.f32 %v1440_v18, %v1440_v18  ;;  %v288_v24 = vmul.f32 %v1450_v22, %v1450_v22  ;;  %v1457_v25 = vld [vmem:[%s1378_s24 + $0xb0] sm:$0xff]  ;;  %v1467_v29 = vld [vmem:[%s1378_s24 + $0xb8] sm:$0xff]  ;;  %v1477_v33 = vld [vmem:[%s1378_s24 + $0xc0] sm:$0xff] }
  0x19   : > { %v1460_v26 = vld [vmem:[%s1378_s24 + $0x30] sm:$0xff]  ;;  %v305_v27 = vmul.f32 %v1457_v25, %v1457_v25  ;;  %v1470_v30 = vld [vmem:[%s1378_s24 + $0x38] sm:$0xff]  ;;  %v306_v31 = vmul.f32 %v1467_v29, %v1467_v29  ;;  %v1480_v34 = vld [vmem:[%s1378_s24 + $0x40] sm:$0xff]  ;;  %v307_v35 = vmul.f32 %v1477_v33, %v1477_v33 }
  0x1a   : > { %v289_v28 = vmul.f32 %v1460_v26, %v1460_v26  ;;  %v290_v32 = vmul.f32 %v1470_v30, %v1470_v30  ;;  %v291_v36 = vmul.f32 %v1480_v34, %v1480_v34  ;;  %v1487_v37 = vld [vmem:[%s1378_s24 + $0xc8] sm:$0xff]  ;;  %v1497_v41 = vld [vmem:[%s1378_s24 + $0xd0] sm:$0xff]  ;;  %v1507_v45 = vld [vmem:[%s1378_s24 + $0xd8] sm:$0xff] }
  0x1b   : > { %315 = vadd.xlane.f32.xlu0 %v283_v7  ;;  %317 = vadd.xlane.f32.xlu1 %v284_v8  ;;  %v1490_v38 = vld [vmem:[%s1378_s24 + $0x48] sm:$0xff]  ;;  %v308_v39 = vmul.f32 %v1487_v37, %v1487_v37  ;;  %v1500_v42 = vld [vmem:[%s1378_s24 + $0x50] sm:$0xff]  ;;  %v309_v43 = vmul.f32 %v1497_v41, %v1497_v41  ;;  %v1510_v46 = vld [vmem:[%s1378_s24 + $0x58] sm:$0xff]  ;;  %v310_v47 = vmul.f32 %v1507_v45, %v1507_v45 }
  0x1c   : > { %v292_v40 = vmul.f32 %v1490_v38, %v1490_v38  ;;  %v293_v44 = vmul.f32 %v1500_v42, %v1500_v42  ;;  %v294_v48 = vmul.f32 %v1510_v46, %v1510_v46  ;;  %v1517_v49 = vld [vmem:[%s1378_s24 + $0xe0] sm:$0xff]  ;;  %v1527_v53 = vld [vmem:[%s1378_s24 + $0xe8] sm:$0xff]  ;;  %v1537_v57 = vld [vmem:[%s1378_s24 + $0xf0] sm:$0xff] }
  0x1d   : > { %v1520_v50 = vld [vmem:[%s1378_s24 + $0x60] sm:$0xff]  ;;  %v311_v51 = vmul.f32 %v1517_v49, %v1517_v49  ;;  %v1530_v54 = vld [vmem:[%s1378_s24 + $0x68] sm:$0xff]  ;;  %v312_v55 = vmul.f32 %v1527_v53, %v1527_v53  ;;  %v1540_v58 = vld [vmem:[%s1378_s24 + $0x70] sm:$0xff]  ;;  %v313_v59 = vmul.f32 %v1537_v57, %v1537_v57 }
  0x1e   : > { %v295_v52 = vmul.f32 %v1520_v50, %v1520_v50  ;;  %v296_v56 = vmul.f32 %v1530_v54, %v1530_v54  ;;  %v297_v60 = vmul.f32 %v1540_v58, %v1540_v58  ;;  %v1547_v61 = vld [vmem:[%s1378_s24 + $0xf8] sm:$0xff]  ;;  %v475_v4 = vld [vmem:[%s1770_s2] sm:$0x3] }
  0x1f   : > { %351 = vadd.xlane.f32.xlu0 %v301_v11  ;;  %319 = vadd.xlane.f32.xlu1 %v285_v12  ;;  %v1550_v62 = vld [vmem:[%s1378_s24 + $0x78] sm:$0xff]  ;;  %v314_v63 = vmul.f32 %v1547_v61, %v1547_v61  ;;  %v477_v5 = vsel %vm476_vm0, %v475_v4, 0.0 }
  0x20   : > { %v298_v0 = vmul.f32 %v1550_v62, %v1550_v62  ;;  %v478_v7 = vrot.slane %v477_v5, 4 }
  0x22   : > { %v479_v8 = vadd.f32 %v478_v7, %v477_v5 }
  0x23   : > { %353 = vadd.xlane.f32.xlu0 %v302_v15  ;;  %321 = vadd.xlane.f32.xlu1 %v286_v16 }
  0x24   : > { %v480_v11 = vrot.slane %v479_v8, 2 }
  0x26   : > { %v481_v16 = vadd.f32 %v480_v11, %v479_v8 }
  0x27   : > { %355 = vadd.xlane.f32.xlu0 %v303_v19  ;;  %323 = vadd.xlane.f32.xlu1 %v287_v20 }
  0x2b   : > { %357 = vadd.xlane.f32.xlu0 %v304_v23  ;;  %325 = vadd.xlane.f32.xlu1 %v288_v24 }
  0x2f   : > { %359 = vadd.xlane.f32.xlu0 %v305_v27  ;;  %327 = vadd.xlane.f32.xlu1 %v289_v28  ;;  %v482_v27 = vrot.slane %v481_v16, 1 }
  0x33   : > { %361 = vadd.xlane.f32.xlu0 %v306_v31  ;;  %329 = vadd.xlane.f32.xlu1 %v290_v32 }
  0x37   : > { %363 = vadd.xlane.f32.xlu0 %v307_v35  ;;  %331 = vadd.xlane.f32.xlu1 %v291_v36  ;;  %v483_v36 = vadd.f32 %v482_v27, %v481_v16 }
  0x3b   : > { %365 = vadd.xlane.f32.xlu0 %v308_v39  ;;  %333 = vadd.xlane.f32.xlu1 %v292_v40 }
  0x3f   : > { %367 = vadd.xlane.f32.xlu0 %v309_v43  ;;  %335 = vadd.xlane.f32.xlu1 %v293_v44 }
  0x43   : > { %369 = vadd.xlane.f32.xlu0 %v310_v47  ;;  %337 = vadd.xlane.f32.xlu1 %v294_v48  ;;  %v1559_v47 = vmul.f32 0.5, %v483_v36 }
  0x47   : > { %371 = vadd.xlane.f32.xlu0 %v311_v51  ;;  %339 = vadd.xlane.f32.xlu1 %v295_v52 }
  0x4b   : > { %373 = vadd.xlane.f32.xlu0 %v312_v55  ;;  %341 = vadd.xlane.f32.xlu1 %v296_v56 }
  0x4f   : > { %375 = vadd.xlane.f32.xlu0 %v313_v59  ;;  %343 = vadd.xlane.f32.xlu1 %v297_v60 }
  0x53   : > { %377 = vadd.xlane.f32.xlu0 %v314_v63  ;;  %345 = vadd.xlane.f32.xlu1 %v298_v0 }
  0xa4   : > { %v348_v12 = vpop.xlane.xlu0 %347  ;;  %v350_v15 = vpop.xlane.xlu1 %349 }
  0xa5   : > { %v395_v19 = vmax.f32 %v348_v12, 1e-24  ;;  %v396_v20 = vmax.f32 %v350_v15, 1e-24 }
  0xa7   : > { %1264 = vrsqrt.f32 %v395_v19 }
  0xa8   : > { %1266 = vrsqrt.f32 %v396_v20  ;;  %v316_v23 = vpop.xlane.xlu0 %315  ;;  %v318_v24 = vpop.xlane.xlu1 %317 }
  0xa9   : > { %v379_v28 = vmax.f32 %v316_v23, 1e-24  ;;  %v380_v31 = vmax.f32 %v318_v24, 1e-24 }
  0xab   : > { %1268 = vrsqrt.f32 %v379_v28 }
  0xac   : > { %1270 = vrsqrt.f32 %v380_v31  ;;  %v352_v32 = vpop.xlane.xlu0 %351  ;;  %v320_v35 = vpop.xlane.xlu1 %319 }
  0xad   : > { %v397_v39 = vmax.f32 %v352_v32, 1e-24  ;;  %v381_v40 = vmax.f32 %v320_v35, 1e-24 }
  0xaf   : > { %1272 = vrsqrt.f32 %v397_v39 }
  0xb0   : > { %1274 = vrsqrt.f32 %v381_v40  ;;  %v354_v43 = vpop.xlane.xlu0 %353  ;;  %v322_v44 = vpop.xlane.xlu1 %321 }
  0xb1   : > { %v1265_v48 = vpop.eup %1264  ;;  %v398_v51 = vmax.f32 %v354_v43, 1e-24  ;;  %v382_v52 = vmax.f32 %v322_v44, 1e-24 }
  0xb2   : > { %v1267_v55 = vpop.eup %1266  ;;  %v459_v56 = vmul.f32 %v1265_v48, %v1397_v1 }
  0xb3   : > { %1276 = vrsqrt.f32 %v398_v51  ;;  %v460_v59 = vmul.f32 %v1267_v55, %v1400_v2 }
  0xb4   : > { %1278 = vrsqrt.f32 %v382_v52  ;;  %v502_v60 = vmul.f32 %v1559_v47, %v459_v56  ;;  %v356_v63 = vpop.xlane.xlu0 %355  ;;  %v324_v0 = vpop.xlane.xlu1 %323 }
  0xb5   : > { %v1269_v4 = vpop.eup %1268  ;;  %v399_v5 = vmax.f32 %v356_v63, 1e-24  ;;  %v383_v7 = vmax.f32 %v324_v0, 1e-24  ;;  %v503_v11 = vmul.f32 %v1559_v47, %v460_v59 }
  0xb6   : > { %v1271_v8 = vpop.eup %1270  ;;  %550 = vadd.xlane.f32.xlu0 %v502_v60  ;;  %v443_v12 = vmul.f32 %v1269_v4, %v1403_v3 }
  0xb7   : > { %1280 = vrsqrt.f32 %v399_v5  ;;  %v444_v15 = vmul.f32 %v1271_v8, %v1410_v6 }
  0xb8   : > { %1282 = vrsqrt.f32 %v383_v7  ;;  %v486_v16 = vmul.f32 %v1559_v47, %v443_v12  ;;  %v358_v19 = vpop.xlane.xlu0 %357  ;;  %v326_v20 = vpop.xlane.xlu1 %325 }
  0xb9   : > { %v1273_v23 = vpop.eup %1272  ;;  %v400_v24 = vmax.f32 %v358_v19, 1e-24  ;;  %v384_v27 = vmax.f32 %v326_v20, 1e-24  ;;  %v487_v31 = vmul.f32 %v1559_v47, %v444_v15 }
  0xba   : > { %v1275_v28 = vpop.eup %1274  ;;  %552 = vadd.xlane.f32.xlu0 %v503_v11  ;;  %518 = vadd.xlane.f32.xlu1 %v486_v16  ;;  %v461_v32 = vmul.f32 %v1273_v23, %v1417_v9 }
  0xbb   : > { %1284 = vrsqrt.f32 %v400_v24  ;;  %v445_v35 = vmul.f32 %v1275_v28, %v1420_v10 }
  0xbc   : > { %1286 = vrsqrt.f32 %v384_v27  ;;  %v360_v36 = vpop.xlane.xlu0 %359  ;;  %v328_v39 = vpop.xlane.xlu1 %327  ;;  %v504_v40 = vmul.f32 %v1559_v47, %v461_v32 }
  0xbd   : > { %v1277_v43 = vpop.eup %1276  ;;  %v401_v44 = vmax.f32 %v360_v36, 1e-24  ;;  %v385_v48 = vmax.f32 %v328_v39, 1e-24  ;;  %v488_v52 = vmul.f32 %v1559_v47, %v445_v35 }
  0xbe   : > { %v1279_v51 = vpop.eup %1278  ;;  %520 = vadd.xlane.f32.xlu1 %v487_v31  ;;  %554 = vadd.xlane.f32.xlu0 %v504_v40  ;;  %v462_v55 = vmul.f32 %v1277_v43, %v1427_v13 }
  0xbf   : > { %1288 = vrsqrt.f32 %v401_v44  ;;  %v446_v56 = vmul.f32 %v1279_v51, %v1430_v14 }
  0xc0   : > { %1290 = vrsqrt.f32 %v385_v48  ;;  %v362_v59 = vpop.xlane.xlu0 %361  ;;  %v330_v60 = vpop.xlane.xlu1 %329  ;;  %v505_v63 = vmul.f32 %v1559_v47, %v462_v55 }
  0xc1   : > { %v1281_v0 = vpop.eup %1280  ;;  %v402_v4 = vmax.f32 %v362_v59, 1e-24  ;;  %v386_v5 = vmax.f32 %v330_v60, 1e-24  ;;  %v489_v8 = vmul.f32 %v1559_v47, %v446_v56 }
  0xc2   : > { %v1283_v7 = vpop.eup %1282  ;;  %522 = vadd.xlane.f32.xlu1 %v488_v52  ;;  %556 = vadd.xlane.f32.xlu0 %v505_v63  ;;  %v463_v11 = vmul.f32 %v1281_v0, %v1437_v17 }
  0xc3   : > { %1292 = vrsqrt.f32 %v402_v4  ;;  %v447_v12 = vmul.f32 %v1283_v7, %v1440_v18 }
  0xc4   : > { %1294 = vrsqrt.f32 %v386_v5  ;;  %v364_v15 = vpop.xlane.xlu0 %363  ;;  %v332_v16 = vpop.xlane.xlu1 %331  ;;  %v506_v19 = vmul.f32 %v1559_v47, %v463_v11 }
  0xc5   : > { %v1285_v20 = vpop.eup %1284  ;;  %v403_v23 = vmax.f32 %v364_v15, 1e-24  ;;  %v387_v24 = vmax.f32 %v332_v16, 1e-24  ;;  %v490_v28 = vmul.f32 %v1559_v47, %v447_v12 }
  0xc6   : > { %v1287_v27 = vpop.eup %1286  ;;  %524 = vadd.xlane.f32.xlu1 %v489_v8  ;;  %558 = vadd.xlane.f32.xlu0 %v506_v19  ;;  %v464_v31 = vmul.f32 %v1285_v20, %v1447_v21 }
  0xc7   : > { %1296 = vrsqrt.f32 %v403_v23  ;;  %v448_v32 = vmul.f32 %v1287_v27, %v1450_v22 }
  0xc8   : > { %1298 = vrsqrt.f32 %v387_v24  ;;  %v366_v35 = vpop.xlane.xlu0 %365  ;;  %v334_v36 = vpop.xlane.xlu1 %333  ;;  %v507_v39 = vmul.f32 %v1559_v47, %v464_v31 }
  0xc9   : > { %v1289_v40 = vpop.eup %1288  ;;  %v404_v43 = vmax.f32 %v366_v35, 1e-24  ;;  %v388_v44 = vmax.f32 %v334_v36, 1e-24  ;;  %v491_v51 = vmul.f32 %v1559_v47, %v448_v32 }
  0xca   : > { %v1291_v48 = vpop.eup %1290  ;;  %526 = vadd.xlane.f32.xlu1 %v490_v28  ;;  %560 = vadd.xlane.f32.xlu0 %v507_v39  ;;  %v465_v52 = vmul.f32 %v1289_v40, %v1457_v25 }
  0xcb   : > { %1300 = vrsqrt.f32 %v404_v43  ;;  %v449_v55 = vmul.f32 %v1291_v48, %v1460_v26 }
  0xcc   : > { %1302 = vrsqrt.f32 %v388_v44  ;;  %v368_v56 = vpop.xlane.xlu0 %367  ;;  %v336_v59 = vpop.xlane.xlu1 %335  ;;  %v508_v60 = vmul.f32 %v1559_v47, %v465_v52 }
  0xcd   : > { %v1293_v63 = vpop.eup %1292  ;;  %v405_v0 = vmax.f32 %v368_v56, 1e-24  ;;  %v389_v4 = vmax.f32 %v336_v59, 1e-24  ;;  %v492_v7 = vmul.f32 %v1559_v47, %v449_v55 }
  0xce   : > { %v1295_v5 = vpop.eup %1294  ;;  %528 = vadd.xlane.f32.xlu1 %v491_v51  ;;  %562 = vadd.xlane.f32.xlu0 %v508_v60  ;;  %v466_v8 = vmul.f32 %v1293_v63, %v1467_v29 }
  0xcf   : > { %1304 = vrsqrt.f32 %v405_v0  ;;  %v450_v11 = vmul.f32 %v1295_v5, %v1470_v30 }
  0xd0   : > { %1306 = vrsqrt.f32 %v389_v4  ;;  %v370_v12 = vpop.xlane.xlu0 %369  ;;  %v338_v15 = vpop.xlane.xlu1 %337  ;;  %v509_v16 = vmul.f32 %v1559_v47, %v466_v8 }
  0xd1   : > { %v1297_v19 = vpop.eup %1296  ;;  %v406_v20 = vmax.f32 %v370_v12, 1e-24  ;;  %v390_v23 = vmax.f32 %v338_v15, 1e-24  ;;  %v493_v27 = vmul.f32 %v1559_v47, %v450_v11 }
  0xd2   : > { %v1299_v24 = vpop.eup %1298  ;;  %530 = vadd.xlane.f32.xlu1 %v492_v7  ;;  %564 = vadd.xlane.f32.xlu0 %v509_v16  ;;  %v467_v28 = vmul.f32 %v1297_v19, %v1477_v33 }
  0xd3   : > { %1308 = vrsqrt.f32 %v406_v20  ;;  %v451_v31 = vmul.f32 %v1299_v24, %v1480_v34 }
  0xd4   : > { %1310 = vrsqrt.f32 %v390_v23  ;;  %v372_v32 = vpop.xlane.xlu0 %371  ;;  %v340_v35 = vpop.xlane.xlu1 %339  ;;  %v510_v36 = vmul.f32 %v1559_v47, %v467_v28 }
  0xd5   : > { %v1301_v39 = vpop.eup %1300  ;;  %v407_v40 = vmax.f32 %v372_v32, 1e-24  ;;  %v391_v43 = vmax.f32 %v340_v35, 1e-24  ;;  %v494_v48 = vmul.f32 %v1559_v47, %v451_v31 }
  0xd6   : > { %v1303_v44 = vpop.eup %1302  ;;  %532 = vadd.xlane.f32.xlu1 %v493_v27  ;;  %566 = vadd.xlane.f32.xlu0 %v510_v36  ;;  %v468_v51 = vmul.f32 %v1301_v39, %v1487_v37 }
  0xd7   : > { %1312 = vrsqrt.f32 %v407_v40  ;;  %v452_v52 = vmul.f32 %v1303_v44, %v1490_v38 }
  0xd8   : > { %1314 = vrsqrt.f32 %v391_v43  ;;  %v374_v55 = vpop.xlane.xlu0 %373  ;;  %v342_v56 = vpop.xlane.xlu1 %341  ;;  %v511_v59 = vmul.f32 %v1559_v47, %v468_v51 }
  0xd9   : > { %v1305_v60 = vpop.eup %1304  ;;  %v408_v63 = vmax.f32 %v374_v55, 1e-24  ;;  %v392_v0 = vmax.f32 %v342_v56, 1e-24  ;;  %v495_v5 = vmul.f32 %v1559_v47, %v452_v52 }
  0xda   : > { %v1307_v4 = vpop.eup %1306  ;;  %534 = vadd.xlane.f32.xlu1 %v494_v48  ;;  %568 = vadd.xlane.f32.xlu0 %v511_v59  ;;  %v469_v7 = vmul.f32 %v1305_v60, %v1497_v41 }
  0xdb   : > { %1316 = vrsqrt.f32 %v408_v63  ;;  %v453_v8 = vmul.f32 %v1307_v4, %v1500_v42 }
  0xdc   : > { %1318 = vrsqrt.f32 %v392_v0  ;;  %v376_v11 = vpop.xlane.xlu0 %375  ;;  %v344_v12 = vpop.xlane.xlu1 %343  ;;  %v512_v15 = vmul.f32 %v1559_v47, %v469_v7 }
  0xdd   : > { %v1309_v16 = vpop.eup %1308  ;;  %v409_v19 = vmax.f32 %v376_v11, 1e-24  ;;  %v393_v20 = vmax.f32 %v344_v12, 1e-24  ;;  %v496_v24 = vmul.f32 %v1559_v47, %v453_v8 }
  0xde   : > { %v1311_v23 = vpop.eup %1310  ;;  %536 = vadd.xlane.f32.xlu1 %v495_v5  ;;  %570 = vadd.xlane.f32.xlu0 %v512_v15  ;;  %v470_v27 = vmul.f32 %v1309_v16, %v1507_v45 }
  0xdf   : > { %1320 = vrsqrt.f32 %v409_v19  ;;  %v454_v28 = vmul.f32 %v1311_v23, %v1510_v46 }
  0xe0   : > { %1322 = vrsqrt.f32 %v393_v20  ;;  %v378_v31 = vpop.xlane.xlu0 %377  ;;  %v346_v32 = vpop.xlane.xlu1 %345  ;;  %v513_v35 = vmul.f32 %v1559_v47, %v470_v27 }
  0xe1   : > { %v1313_v36 = vpop.eup %1312  ;;  %v410_v39 = vmax.f32 %v378_v31, 1e-24  ;;  %v394_v40 = vmax.f32 %v346_v32, 1e-24  ;;  %v497_v44 = vmul.f32 %v1559_v47, %v454_v28  ;;  %v1117_v28 = vpack.c.bf16 %v1400_v2, %v1397_v1 }
  0xe2   : > { %v1315_v43 = vpop.eup %1314  ;;  %538 = vadd.xlane.f32.xlu1 %v496_v24  ;;  %572 = vadd.xlane.f32.xlu0 %v513_v35  ;;  %v471_v48 = vmul.f32 %v1313_v36, %v1517_v49  ;;  %v1119_v31 = vpack.c.bf16 %v1410_v6, %v1403_v3  ;;  %v1121_v32 = vpack.c.bf16 %v1427_v13, %v1417_v9 }
  0xe3   : > { %1324 = vrsqrt.f32 %v410_v39  ;;  %v455_v51 = vmul.f32 %v1315_v43, %v1520_v50  ;;  %1118 = vmatprep.subr.bf16.mxu0 %v1117_v28  ;;  %1150 = vmatprep.subr.bf16.mxu1 %v1117_v28  ;;  %v1123_v35 = vpack.c.bf16 %v1430_v14, %v1420_v10  ;;  %v1127_v1 = vpack.c.bf16 %v1450_v22, %v1440_v18 }
  0xe4   : > { %1326 = vrsqrt.f32 %v394_v40  ;;  %v514_v52 = vmul.f32 %v1559_v47, %v471_v48  ;;  %1120 = vmatpush3.bf16.msra.mxu0 %v1119_v31  ;;  %1152 = vmatpush3.bf16.msra.mxu1 %v1119_v31  ;;  %v1129_v2 = vpack.c.bf16 %v1467_v29, %v1457_v25  ;;  %v1131_v3 = vpack.c.bf16 %v1470_v30, %v1460_v26  ;;  %v615_v26 = vld [vmem:[%s1383_s27] sm:$0xff]  ;;  %v632_v29 = vld [vmem:[%s1383_s27 + $0x88] sm:$0xff]  ;;  %v618_v48 = vld [vmem:[%s1383_s27 + $0x18] sm:$0xff] }
  0xe5   : > { %v1317_v55 = vpop.eup %1316  ;;  %v498_v59 = vmul.f32 %v1559_v47, %v455_v51  ;;  %1122 = vmatprep.subr.bf16.mxu0 %v1121_v32  ;;  %1154 = vmatprep.subr.bf16.mxu1 %v1121_v32  ;;  %v1133_v6 = vpack.c.bf16 %v1487_v37, %v1477_v33  ;;  %v1135_v9 = vpack.c.bf16 %v1490_v38, %v1480_v34  ;;  %v635_v51 = vld [vmem:[%s1383_s27 + $0xa0] sm:$0xff]  ;;  %v621_v32 = vld [vmem:[%s1383_s27 + $0x30] sm:$0xff] }
  0xe6   : > { %v1319_v56 = vpop.eup %1318  ;;  %540 = vadd.xlane.f32.xlu1 %v497_v44  ;;  %574 = vadd.xlane.f32.xlu0 %v514_v52  ;;  %v472_v60 = vmul.f32 %v1317_v55, %v1527_v53  ;;  %v1137_v10 = vpack.c.bf16 %v1507_v45, %v1497_v41  ;;  %v1139_v13 = vpack.c.bf16 %v1510_v46, %v1500_v42  ;;  %v616_v41 = vld [vmem:[%s1383_s27 + $0x8] sm:$0xff]  ;;  %v633_v42 = vld [vmem:[%s1383_s27 + $0x90] sm:$0xff] }
  0xe7   : > { %v456_v63 = vmul.f32 %v1319_v56, %v1530_v54  ;;  %v1141_v14 = vpack.c.bf16 %v1527_v53, %v1517_v49  ;;  %v1145_v18 = vpack.c.bf16 %v1547_v61, %v1537_v57  ;;  %v1147_v45 = vpack.c.bf16 %v1550_v62, %v1540_v58 }
  0xe8   : > { %v515_v0 = vmul.f32 %v1559_v47, %v472_v60  ;;  %1124 = vmatpush3.bf16.msra.mxu0 %v1123_v35  ;;  %1156 = vmatpush3.bf16.msra.mxu1 %v1123_v35  ;;  %v638_v35 = vld [vmem:[%s1383_s27 + $0xb8] sm:$0xff] }
  0xe9   : > { %v1321_v4 = vpop.eup %1320  ;;  %v499_v7 = vmul.f32 %v1559_v47, %v456_v63 }
  0xea   : > { %v1323_v5 = vpop.eup %1322  ;;  %542 = vadd.xlane.f32.xlu1 %v498_v59  ;;  %576 = vadd.xlane.f32.xlu0 %v515_v0  ;;  %v473_v8 = vmul.f32 %v1321_v4, %v1537_v57  ;;  %v619_v0 = vld [vmem:[%s1383_s27 + $0x20] sm:$0xff]  ;;  %v636_v4 = vld [vmem:[%s1383_s27 + $0xa8] sm:$0xff] }
  0xeb   : > { %v457_v11 = vmul.f32 %v1323_v5, %v1540_v58  ;;  %v634_v58 = vld [vmem:[%s1383_s27 + $0x98] sm:$0xff] }
  0xec   : > { %v516_v12 = vmul.f32 %v1559_v47, %v473_v8 }
  0xed   : > { %v1325_v15 = vpop.eup %1324  ;;  %v500_v19 = vmul.f32 %v1559_v47, %v457_v11 }
  0xee   : > { %v1327_v16 = vpop.eup %1326  ;;  %544 = vadd.xlane.f32.xlu1 %v499_v7  ;;  %578 = vadd.xlane.f32.xlu0 %v516_v12  ;;  %v474_v20 = vmul.f32 %v1325_v15, %v1547_v61  ;;  %v617_v61 = vld [vmem:[%s1383_s27 + $0x10] sm:$0xff] }
  0xef   : > { %v458_v23 = vmul.f32 %v1327_v16, %v1550_v62  ;;  %v620_v16 = vld [vmem:[%s1383_s27 + $0x28] sm:$0xff] }
  0xf0   : > { %v517_v24 = vmul.f32 %v1559_v47, %v474_v20 }
  0xf1   : > { %v501_v27 = vmul.f32 %v1559_v47, %v458_v23  ;;  %v1125_v47 = vpack.c.bf16 %v1447_v21, %v1437_v17  ;;  %v1143_v17 = vpack.c.bf16 %v1530_v54, %v1520_v50  ;;  %v631_v21 = vld [vmem:[%s1383_s27 + $0x80] sm:$0xff] }
  0xf2   : > { %546 = vadd.xlane.f32.xlu1 %v500_v19  ;;  %580 = vadd.xlane.f32.xlu0 %v517_v24  ;;  %v637_v19 = vld [vmem:[%s1383_s27 + $0xb0] sm:$0xff] }
  0xf3   : > { %1126 = vmatprep.subr.bf16.mxu0 %v1125_v47  ;;  %1158 = vmatprep.subr.bf16.mxu1 %v1125_v47 }
  0xf4   : > { %1128 = vmatpush3.bf16.msra.mxu0 %v1127_v1  ;;  %1160 = vmatpush3.bf16.msra.mxu1 %v1127_v1 }
  0xf5   : > { %1130 = vmatprep.subr.bf16.mxu0 %v1129_v2  ;;  %1162 = vmatprep.subr.bf16.mxu1 %v1129_v2 }
  0xf6   : > { %548 = vadd.xlane.f32.xlu1 %v501_v27 }
  0xf8   : > { %1132 = vmatpush3.bf16.msra.mxu0 %v1131_v3  ;;  %1164 = vmatpush3.bf16.msra.mxu1 %v1131_v3 }
  0xf9   : > { %1134 = vmatprep.subr.bf16.mxu0 %v1133_v6  ;;  %1166 = vmatprep.subr.bf16.mxu1 %v1133_v6 }
  0xfc   : > { %1136 = vmatpush3.bf16.msra.mxu0 %v1135_v9  ;;  %1168 = vmatpush3.bf16.msra.mxu1 %v1135_v9 }
  0xfd   : > { %1138 = vmatprep.subr.bf16.mxu0 %v1137_v10  ;;  %1170 = vmatprep.subr.bf16.mxu1 %v1137_v10  ;;  %v622_v10 = vld [vmem:[%s1383_s27 + $0x38] sm:$0xff] }
 0x100   : > { %1140 = vmatpush3.bf16.msra.mxu0 %v1139_v13  ;;  %1172 = vmatpush3.bf16.msra.mxu1 %v1139_v13  ;;  %v639_v13 = vld [vmem:[%s1383_s27 + $0xc0] sm:$0xff] }
 0x101   : > { %1142 = vmatprep.subr.bf16.mxu0 %v1141_v14  ;;  %1174 = vmatprep.subr.bf16.mxu1 %v1141_v14 }
 0x104   : > { %1144 = vmatpush3.bf16.msra.mxu0 %v1143_v17  ;;  %1176 = vmatpush3.bf16.msra.mxu1 %v1143_v17 }
 0x105   : > { %1146 = vmatprep.subr.bf16.mxu0 %v1145_v18  ;;  %1178 = vmatprep.subr.bf16.mxu1 %v1145_v18 }
 0x108   : > { %1148 = vmatpush3.bf16.msra.mxu0 %v1147_v45  ;;  %1180 = vmatpush3.bf16.msra.mxu1 %v1147_v45  ;;  %v641_v45 = vld [vmem:[%s1383_s27 + $0xd0] sm:$0xff] }
 0x143   : > { %v551_v22 = vpop.xlane.xlu0 %550 }
 0x144   : > { %599 = vst.msk [vmem:[%s1388_s30 + $0x80] sm:$0xff] %vm582_vm1, %v551_v22  ;;  %v801_v25 = vmul.f32 %v631_v21, %v551_v22 }
 0x146   : > { %v1190_v30 = vpack.i.bf16 %v801_v25, %v631_v21 }
 0x147   : > { %v519_v33 = vpop.xlane.xlu1 %518  ;;  %v553_v34 = vpop.xlane.xlu0 %552 }
 0x148   : > { %583 = vst.msk [vmem:[%s1388_s30] sm:$0xff] %vm582_vm1, %v519_v33  ;;  %v785_v37 = vmul.f32 %v615_v26, %v519_v33  ;;  %v802_v38 = vmul.f32 %v632_v29, %v553_v34  ;;  %600 = vst.msk [vmem:[%s1388_s30 + $0x88] sm:$0xff] %vm582_vm1, %v553_v34  ;;  %1191 = vxpose.xlu0.b32.start [1/16] (narrow) %v1190_v30, 8 }
 0x14a   : > { %v1192_v46 = vpack.i.bf16 %v802_v38, %v632_v29  ;;  %v1227_v49 = vpack.i.bf16 %v785_v37, %v615_v26  ;;  %v623_v26 = vld [vmem:[%s1383_s27 + $0x40] sm:$0xff]  ;;  %v640_v29 = vld [vmem:[%s1383_s27 + $0xc8] sm:$0xff] }
 0x14b   : > { %v521_v50 = vpop.xlane.xlu1 %520  ;;  %v555_v53 = vpop.xlane.xlu0 %554 }
 0x14c   : > { %v786_v54 = vmul.f32 %v616_v41, %v521_v50  ;;  %584 = vst.msk [vmem:[%s1388_s30 + $0x8] sm:$0xff] %vm582_vm1, %v521_v50  ;;  %1228 = vxpose.xlu1.b32.start [1/16] (narrow) %v1227_v49, 8  ;;  %1193 = vxpose.xlu0.b32.cont [2/16] (narrow) %v1192_v46, 8  ;;  %v803_v57 = vmul.f32 %v633_v42, %v555_v53  ;;  %601 = vst.msk [vmem:[%s1388_s30 + $0x90] sm:$0xff] %vm582_vm1, %v555_v53 }
 0x14e   : > { %v1229_v62 = vpack.i.bf16 %v786_v54, %v616_v41  ;;  %v1194_v36 = vpack.i.bf16 %v803_v57, %v633_v42  ;;  %v624_v42 = vld [vmem:[%s1383_s27 + $0x48] sm:$0xff] }
 0x14f   : > { %v523_v39 = vpop.xlane.xlu1 %522  ;;  %v557_v40 = vpop.xlane.xlu0 %556 }
 0x150   : > { %v787_v43 = vmul.f32 %v617_v61, %v523_v39  ;;  %585 = vst.msk [vmem:[%s1388_s30 + $0x10] sm:$0xff] %vm582_vm1, %v523_v39  ;;  %1230 = vxpose.xlu1.b32.cont [2/16] (narrow) %v1229_v62, 8  ;;  %v804_v44 = vmul.f32 %v634_v58, %v557_v40  ;;  %602 = vst.msk [vmem:[%s1388_s30 + $0x98] sm:$0xff] %vm582_vm1, %v557_v40  ;;  %1195 = vxpose.xlu0.b32.cont [3/16] (narrow) %v1194_v36, 8 }
 0x152   : > { %v1231_v52 = vpack.i.bf16 %v787_v43, %v617_v61  ;;  %v1196_v55 = vpack.i.bf16 %v804_v44, %v634_v58  ;;  %v625_v61 = vld [vmem:[%s1383_s27 + $0x50] sm:$0xff]  ;;  %v642_v58 = vld [vmem:[%s1383_s27 + $0xd8] sm:$0xff] }
 0x153   : > { %v525_v56 = vpop.xlane.xlu1 %524  ;;  %v559_v59 = vpop.xlane.xlu0 %558 }
 0x154   : > { %v788_v60 = vmul.f32 %v618_v48, %v525_v56  ;;  %586 = vst.msk [vmem:[%s1388_s30 + $0x18] sm:$0xff] %vm582_vm1, %v525_v56  ;;  %1232 = vxpose.xlu1.b32.cont [3/16] (narrow) %v1231_v52, 8  ;;  %v805_v63 = vmul.f32 %v635_v51, %v559_v59  ;;  %603 = vst.msk [vmem:[%s1388_s30 + $0xa0] sm:$0xff] %vm582_vm1, %v559_v59  ;;  %1197 = vxpose.xlu0.b32.cont [4/16] (narrow) %v1196_v55, 8 }
 0x156   : > { %v1233_v5 = vpack.i.bf16 %v788_v60, %v618_v48  ;;  %v1198_v7 = vpack.i.bf16 %v805_v63, %v635_v51  ;;  %v626_v48 = vld [vmem:[%s1383_s27 + $0x58] sm:$0xff]  ;;  %v643_v51 = vld [vmem:[%s1383_s27 + $0xe0] sm:$0xff] }
 0x157   : > { %v527_v8 = vpop.xlane.xlu1 %526  ;;  %v561_v11 = vpop.xlane.xlu0 %560 }
 0x158   : > { %v789_v12 = vmul.f32 %v619_v0, %v527_v8  ;;  %587 = vst.msk [vmem:[%s1388_s30 + $0x20] sm:$0xff] %vm582_vm1, %v527_v8  ;;  %1234 = vxpose.xlu1.b32.cont [4/16] (narrow) %v1233_v5, 8  ;;  %v806_v15 = vmul.f32 %v636_v4, %v561_v11  ;;  %604 = vst.msk [vmem:[%s1388_s30 + $0xa8] sm:$0xff] %vm582_vm1, %v561_v11  ;;  %1199 = vxpose.xlu0.b32.cont [5/16] (narrow) %v1198_v7, 8 }
 0x15a   : > { %v1235_v20 = vpack.i.bf16 %v789_v12, %v619_v0  ;;  %v1200_v23 = vpack.i.bf16 %v806_v15, %v636_v4  ;;  %v627_v0 = vld [vmem:[%s1383_s27 + $0x60] sm:$0xff]  ;;  %v644_v4 = vld [vmem:[%s1383_s27 + $0xe8] sm:$0xff] }
 0x15b   : > { %v529_v24 = vpop.xlane.xlu1 %528  ;;  %v563_v27 = vpop.xlane.xlu0 %562 }
 0x15c   : > { %v790_v28 = vmul.f32 %v620_v16, %v529_v24  ;;  %588 = vst.msk [vmem:[%s1388_s30 + $0x28] sm:$0xff] %vm582_vm1, %v529_v24  ;;  %1236 = vxpose.xlu1.b32.cont [5/16] (narrow) %v1235_v20, 8  ;;  %v807_v31 = vmul.f32 %v637_v19, %v563_v27  ;;  %605 = vst.msk [vmem:[%s1388_s30 + $0xb0] sm:$0xff] %vm582_vm1, %v563_v27  ;;  %1201 = vxpose.xlu0.b32.cont [6/16] (narrow) %v1200_v23, 8 }
 0x15e   : > { %v1237_v47 = vpack.i.bf16 %v790_v28, %v620_v16  ;;  %v1202_v1 = vpack.i.bf16 %v807_v31, %v637_v19  ;;  %v628_v16 = vld [vmem:[%s1383_s27 + $0x68] sm:$0xff]  ;;  %v645_v19 = vld [vmem:[%s1383_s27 + $0xf0] sm:$0xff] }
 0x15f   : > { %v531_v2 = vpop.xlane.xlu1 %530  ;;  %v565_v3 = vpop.xlane.xlu0 %564 }
 0x160   : > { %v791_v6 = vmul.f32 %v621_v32, %v531_v2  ;;  %589 = vst.msk [vmem:[%s1388_s30 + $0x30] sm:$0xff] %vm582_vm1, %v531_v2  ;;  %1238 = vxpose.xlu1.b32.cont [6/16] (narrow) %v1237_v47, 8  ;;  %v808_v9 = vmul.f32 %v638_v35, %v565_v3  ;;  %606 = vst.msk [vmem:[%s1388_s30 + $0xb8] sm:$0xff] %vm582_vm1, %v565_v3  ;;  %1203 = vxpose.xlu0.b32.cont [7/16] (narrow) %v1202_v1, 8 }
 0x162   : > { %v1239_v14 = vpack.i.bf16 %v791_v6, %v621_v32  ;;  %v1204_v17 = vpack.i.bf16 %v808_v9, %v638_v35  ;;  %v629_v32 = vld [vmem:[%s1383_s27 + $0x70] sm:$0xff]  ;;  %v646_v35 = vld [vmem:[%s1383_s27 + $0xf8] sm:$0xff] }
 0x163   : > { %v533_v18 = vpop.xlane.xlu1 %532  ;;  %v567_v21 = vpop.xlane.xlu0 %566 }
 0x164   : > { %v792_v22 = vmul.f32 %v622_v10, %v533_v18  ;;  %590 = vst.msk [vmem:[%s1388_s30 + $0x38] sm:$0xff] %vm582_vm1, %v533_v18  ;;  %1240 = vxpose.xlu1.b32.cont [7/16] (narrow) %v1239_v14, 8  ;;  %v809_v25 = vmul.f32 %v639_v13, %v567_v21  ;;  %607 = vst.msk [vmem:[%s1388_s30 + $0xc0] sm:$0xff] %vm582_vm1, %v567_v21  ;;  %1205 = vxpose.xlu0.b32.cont [8/16] (narrow) %v1204_v17, 8 }
 0x166   : > { %v1241_v30 = vpack.i.bf16 %v792_v22, %v622_v10  ;;  %v1206_v33 = vpack.i.bf16 %v809_v25, %v639_v13  ;;  %v630_v10 = vld [vmem:[%s1383_s27 + $0x78] sm:$0xff] }
 0x167   : > { %v535_v34 = vpop.xlane.xlu1 %534  ;;  %v569_v37 = vpop.xlane.xlu0 %568 }
 0x168   : > { %v793_v38 = vmul.f32 %v623_v26, %v535_v34  ;;  %591 = vst.msk [vmem:[%s1388_s30 + $0x40] sm:$0xff] %vm582_vm1, %v535_v34  ;;  %1242 = vxpose.xlu1.b32.cont [8/16] (narrow) %v1241_v30, 8  ;;  %v810_v41 = vmul.f32 %v640_v29, %v569_v37  ;;  %608 = vst.msk [vmem:[%s1388_s30 + $0xc8] sm:$0xff] %vm582_vm1, %v569_v37  ;;  %1207 = vxpose.xlu0.b32.cont [9/16] (narrow) %v1206_v33, 8 }
 0x16a   : > { %v1243_v46 = vpack.i.bf16 %v793_v38, %v623_v26  ;;  %v1208_v49 = vpack.i.bf16 %v810_v41, %v640_v29  ;;  %v647_v38 = vld [vmem:[%s1772_s4] sm:$0x3] }
 0x16b   : > { %v537_v50 = vpop.xlane.xlu1 %536  ;;  %v571_v53 = vpop.xlane.xlu0 %570 }
 0x16c   : > { %v794_v54 = vmul.f32 %v624_v42, %v537_v50  ;;  %592 = vst.msk [vmem:[%s1388_s30 + $0x48] sm:$0xff] %vm582_vm1, %v537_v50  ;;  %1244 = vxpose.xlu1.b32.cont [9/16] (narrow) %v1243_v46, 8  ;;  %v811_v57 = vmul.f32 %v641_v45, %v571_v53  ;;  %609 = vst.msk [vmem:[%s1388_s30 + $0xd0] sm:$0xff] %vm582_vm1, %v571_v53  ;;  %1209 = vxpose.xlu0.b32.cont [10/16] (narrow) %v1208_v49, 8 }
 0x16e   : > { %v1245_v62 = vpack.i.bf16 %v794_v54, %v624_v42  ;;  %v1210_v36 = vpack.i.bf16 %v811_v57, %v641_v45  ;;  %v784_v42 = vld [vmem:[%s1773_s5] sm:$0x3] }
 0x16f   : > { %v539_v39 = vpop.xlane.xlu1 %538  ;;  %v573_v40 = vpop.xlane.xlu0 %572 }
 0x170   : > { %v795_v43 = vmul.f32 %v625_v61, %v539_v39  ;;  %593 = vst.msk [vmem:[%s1388_s30 + $0x50] sm:$0xff] %vm582_vm1, %v539_v39  ;;  %1246 = vxpose.xlu1.b32.cont [10/16] (narrow) %v1245_v62, 8  ;;  %v812_v44 = vmul.f32 %v642_v58, %v573_v40  ;;  %610 = vst.msk [vmem:[%s1388_s30 + $0xd8] sm:$0xff] %vm582_vm1, %v573_v40  ;;  %1211 = vxpose.xlu0.b32.cont [11/16] (narrow) %v1210_v36, 8 }
 0x172   : > { %v1247_v52 = vpack.i.bf16 %v795_v43, %v625_v61  ;;  %v1212_v55 = vpack.i.bf16 %v812_v44, %v642_v58 }
 0x173   : > { %v541_v56 = vpop.xlane.xlu1 %540  ;;  %v575_v59 = vpop.xlane.xlu0 %574 }
 0x174   : > { %v796_v60 = vmul.f32 %v626_v48, %v541_v56  ;;  %594 = vst.msk [vmem:[%s1388_s30 + $0x58] sm:$0xff] %vm582_vm1, %v541_v56  ;;  %1248 = vxpose.xlu1.b32.cont [11/16] (narrow) %v1247_v52, 8  ;;  %v813_v63 = vmul.f32 %v643_v51, %v575_v59  ;;  %611 = vst.msk [vmem:[%s1388_s30 + $0xe0] sm:$0xff] %vm582_vm1, %v575_v59  ;;  %1213 = vxpose.xlu0.b32.cont [12/16] (narrow) %v1212_v55, 8 }
 0x176   : > { %v1249_v5 = vpack.i.bf16 %v796_v60, %v626_v48  ;;  %v1214_v7 = vpack.i.bf16 %v813_v63, %v643_v51 }
 0x177   : > { %v543_v8 = vpop.xlane.xlu1 %542  ;;  %v577_v11 = vpop.xlane.xlu0 %576 }
 0x178   : > { %v797_v12 = vmul.f32 %v627_v0, %v543_v8  ;;  %595 = vst.msk [vmem:[%s1388_s30 + $0x60] sm:$0xff] %vm582_vm1, %v543_v8  ;;  %1250 = vxpose.xlu1.b32.cont [12/16] (narrow) %v1249_v5, 8  ;;  %v814_v15 = vmul.f32 %v644_v4, %v577_v11  ;;  %612 = vst.msk [vmem:[%s1388_s30 + $0xe8] sm:$0xff] %vm582_vm1, %v577_v11  ;;  %1215 = vxpose.xlu0.b32.cont [13/16] (narrow) %v1214_v7, 8 }
 0x17a   : > { %v1251_v20 = vpack.i.bf16 %v797_v12, %v627_v0  ;;  %v1216_v23 = vpack.i.bf16 %v814_v15, %v644_v4 }
 0x17b   : > { %v545_v24 = vpop.xlane.xlu1 %544  ;;  %v579_v27 = vpop.xlane.xlu0 %578 }
 0x17c   : > { %v798_v28 = vmul.f32 %v628_v16, %v545_v24  ;;  %596 = vst.msk [vmem:[%s1388_s30 + $0x68] sm:$0xff] %vm582_vm1, %v545_v24  ;;  %1252 = vxpose.xlu1.b32.cont [13/16] (narrow) %v1251_v20, 8  ;;  %v815_v31 = vmul.f32 %v645_v19, %v579_v27  ;;  %613 = vst.msk [vmem:[%s1388_s30 + $0xf0] sm:$0xff] %vm582_vm1, %v579_v27  ;;  %1217 = vxpose.xlu0.b32.cont [14/16] (narrow) %v1216_v23, 8 }
 0x17e   : > { %v1253_v47 = vpack.i.bf16 %v798_v28, %v628_v16  ;;  %v1218_v1 = vpack.i.bf16 %v815_v31, %v645_v19 }
 0x17f   : > { %v547_v2 = vpop.xlane.xlu1 %546  ;;  %v581_v3 = vpop.xlane.xlu0 %580 }
 0x180   : > { %v799_v6 = vmul.f32 %v629_v32, %v547_v2  ;;  %597 = vst.msk [vmem:[%s1388_s30 + $0x70] sm:$0xff] %vm582_vm1, %v547_v2  ;;  %1254 = vxpose.xlu1.b32.cont [14/16] (narrow) %v1253_v47, 8  ;;  %v816_v9 = vmul.f32 %v646_v35, %v581_v3  ;;  %614 = vst.msk [vmem:[%s1388_s30 + $0xf8] sm:$0xff] %vm582_vm1, %v581_v3  ;;  %1219 = vxpose.xlu0.b32.cont [15/16] (narrow) %v1218_v1, 8 }
 0x182   : > { %v1255_v13 = vpack.i.bf16 %v799_v6, %v629_v32  ;;  %v1220_v14 = vpack.i.bf16 %v816_v9, %v646_v35 }
 0x183   : > { %v549_v17 = vpop.xlane.xlu1 %548 }
 0x184   : > { %v800_v18 = vmul.f32 %v630_v10, %v549_v17  ;;  %598 = vst.msk [vmem:[%s1388_s30 + $0x78] sm:$0xff] %vm582_vm1, %v549_v17  ;;  %1256 = vxpose.xlu1.b32.cont [15/16] (narrow) %v1255_v13, 8  ;;  %1221 = vxpose.xlu0.b32.end [16/16] (narrow) %v1220_v14, 8 }
 0x186   : > { %v1257_v21 = vpack.i.bf16 %v800_v18, %v630_v10 }
 0x188   : > { %1258 = vxpose.xlu1.b32.end [16/16] (narrow) %v1257_v21, 8 }
 0x1c8   : > { %v1222_v22 = vpop.trf.xlu0 }
 0x1c9   : > { %v1223_v25 = vunpack.i.l.bf16 %v1222_v22  ;;  %v1226_v26 = vunpack.i.h.bf16 %v1222_v22 }
 0x1cb   : > { %776 = vmatprep.mubr.f32.mxu0 %v1223_v25  ;;  %945 = vmatprep.mubr.f32.mxu1 %v1226_v26 }
 0x1cc   : > { %v1259_v29 = vpop.trf.xlu1 }
 0x1cd   : > { %v1263_v30 = vunpack.i.h.bf16 %v1259_v29  ;;  %v1260_v33 = vunpack.i.l.bf16 %v1259_v29 }
 0x1cf   : > { %777 = vmatmul.mubr.f32.vlgmr.msra.gmra.mrb[0].mxu0 %v1260_v33  ;;  %946 = vmatmul.mubr.f32.vlgmr.msra.gmra.mrb[0].mxu1 %v1263_v30 }
 0x2a2   : > { %v1079_v34 = vpop.f32.mrb[0].mxu0  ;;  %v1114_v37 = vpop.f32.mrb[0].mxu1 }
 0x2a3   : > { %v1080_v41 = vpop.f32.mrb[1].mxu0  ;;  %v1115_v45 = vpop.f32.mrb[1].mxu1 }
 0x2a4   : > { %v1081_v46 = vadd.f32 %v1080_v41, %v1079_v34  ;;  %v1116_v49 = vadd.f32 %v1115_v45, %v1114_v37 }
 0x2a6   : > { %v782_v50 = vadd.f32 %v1081_v46, %v647_v38  ;;  %v951_v53 = vadd.f32 %v1116_v49, %v784_v42 }
 0x2a8   : > { %783 = vst [vmem:[%s1772_s4] sm:$0x3] %v782_v50  ;;  %952 = vst [vmem:[%s1773_s5] sm:$0x3] %v951_v53 }
 0x2a9 PF: > { %s16_s18 = sadd.s32 1, %s1334_s18  }
 0x2aa   : > { %p13_p5 = scmp.ge.s32.totalorder %s16_s18, 4  }
 0x2ac   :  { %15 = sbr.rel (!%p13_p5) target bundleno = 1 (0x1), region = 85 }

// kernel: att_layer_forward.9
= control target key start
LH: loop header
LB: loop body
LE: loop exit
PB: predicated region body
PF: predicated region fallthrough
CT: control target
= control target key end

     0   :  { %8 = vsyncpa [#allocation3], 0  ;;  %s1045_s0 = inlined_call_operand.vmem [shape: f32[512,128], index: 0, kind: input, shape index: {}]   ;;  %s1046_s1 = inlined_call_operand.vmem [shape: f32[512,1], index: 1, kind: input, shape index: {}]   ;;  %s1047_s2 = inlined_call_operand.vmem [shape: f32[1,128], index: 2, kind: input, shape index: {}]   ;;  %s1048_s3 = inlined_call_operand.hbm [shape: f32[512,128], index: 3, kind: output, shape index: {}]  }
   0x1   :  { %10 = vsyncpa [#allocation3 + $0x1], 0  ;;  %s789_s12 = smov 0   ;;  %s791_s13 = smov 0  }
   0x2   :  { %s793_s14 = smov 0   ;;  %s795_s15 = smov 0  }
   0x3 LB: > { %s810_s16 = sadd.s32 4294967295, %s763_s15   ;;  %s641_s17 = sadd.s32 4294967294, %s763_s15   ;;  %s763_s15 = sphi %s795_s15, %s1054_s15   ;;  %s759_s14 = sphi %s793_s14, %s1053_s14   ;;  %s755_s13 = sphi %s791_s13, %s1052_s13   ;;  %s751_s12 = sphi %s789_s12, %s1051_s12  }
   0x4   : > { %s814_s18 = sadd.s32 1, %s763_s15   ;;  %s96_s19 = sadd.s32 1, %s759_s14 }
   0x5   : > { %s93_s20 = ssub.s32 %s763_s15, %s814_s18  ;;  %p106_p0 = scmp.ne.s32.totalorder %s759_s14, %s755_s13 }
   0x6   : > { %p94_p1 = scmp.eq.s32.totalorder %s93_s20, 0  ;;  %p107_p2 = scmp.eq.s32.totalorder %s810_s16, 1 }
   0x7   : > { %p112_p3 = scmp.ne.s32.totalorder %s755_s13, %s751_s12  ;;  %p113_p4 = scmp.eq.s32.totalorder %s641_s17, 1 }
   0x8   : > { %s825_s21 = scalar_select %p94_p1, %s759_s14, %s96_s19  }
   0x9   : > { %p827_p5 = por %p107_p2, %p106_p0  ;;  %p831_p6 = por %p113_p4, %p112_p3 }
   0xa   : > { %p644_p7 = scmp.ge.s32.totalorder %s763_s15, 1  ;;  %p152_p8 = scmp.lt.s32.totalorder %s763_s15, 3 }
   0xc   : > { %p153_p9 = pnand %p644_p7, %p152_p8 }
   0xd   : > { %s646_s24 = sshll.u32 (!%p153_p9), %s810_s16, 5  ;;  %v765_v0 = vmov (!%p153_p9), 0   ;;  %v890_v33 = vld [vmem:[%s1047_s2] ss:$0 sm:$0xff] (!%p153_p9)  ;;  %s178_s7 = sand.u32 (!%p153_p9), 1, %s755_s13  }
   0xe   : > { %156 = sbr.rel (%p153_p9) target bundleno = 232 (0xe8), region = 32  ;;  %700 = vset.pattern.permute.xlu1 (!%p153_p9), %v765_v0  ;;  %699 = vset.pattern.permute.xlu0 (!%p153_p9), %v765_v0  ;;  %p182_p10 = scmp.lt.s32.totalorder (!%p153_p9), %s646_s24, 63 }
   0xf   : > { %s645_s8 = sshll.u32 (!%p153_p9), %s178_s7, 8  ;;  %s656_s10 = sshll.u32 (!%p153_p9), %s810_s16, 12 }
  0x10   : > { %s905_s9 = scalar_lea.vmem (!%p153_p9), [#allocation2], %s645_s8  ;;  %s996_s20 = scalar_lea.hbm (!%p153_p9), %s1048_s3, %s656_s10 }
  0x11   : > { %s567_s11 = sshll.u32 (!%p153_p9), %s905_s9, 4  ;;  %s1004_s16 = scalar_lea.sflag (!%p153_p9), [#allocation3], %s178_s7  ;;  %s998_s11 = int_to_ptr.vmem [resolvable:$true] %s567_s11 }
  0x15   : > { %s1056_s24 = smov (!%p182_p10, %s646_s24), 63 }
  0x16   : > { %s647_s25 = sshll.u32 %s1056_s24, 3  ;;  %s701_s24 = scalar_lea.vmem %s998_s11, 4096 }
  0x17   : > { %s846_s28 = scalar_lea.vmem %s1046_s1, %s647_s25  ;;  %s885_s4 = scalar_lea.vmem %s1045_s0, %s647_s25 }
  0x18   : > { %v267_v1 = vld [vmem:[%s846_s28 + $0x10] sm:$0xff]  ;;  %v265_v2 = vld [vmem:[%s846_s28] sm:$0xff]  ;;  %v268_v3 = vld [vmem:[%s846_s28 + $0x18] sm:$0xff]  ;;  %p702_p11 = scmp.ne.s32.totalorder %s998_s11, %s701_s24  ;;  %s766_s25 = smov [#allocation2]  }
  0x19   : > { %309 = vperm.xlu1 %700, %v267_v1   ;;  %299 = vperm.xlu0 %699, %v265_v2   ;;  %v266_v4 = vld [vmem:[%s846_s28 + $0x8] sm:$0xff]  ;;  %v269_v6 = vld [vmem:[%s846_s28 + $0x20] sm:$0xff]  ;;  %v272_v7 = vld [vmem:[%s846_s28 + $0x38] sm:$0xff]  ;;  %s705_s26 = sshll.u32 %s766_s25, 4  ;;  %s706_s26 = int_to_ptr.vmem [resolvable:$false] %s705_s26 }
  0x1a   : > { %v270_v5 = vld [vmem:[%s846_s28 + $0x28] sm:$0xff]  ;;  %v271_v8 = vld [vmem:[%s846_s28 + $0x30] sm:$0xff]  ;;  %v273_v10 = vld [vmem:[%s846_s28 + $0x40] sm:$0xff]  ;;  %p703_p12 = pnand %p702_p11, %p827_p5  ;;  %s707_s27 = scalar_lea.vmem %s706_s26, 8192 }
  0x1b   : > { %v274_v9 = vld [vmem:[%s846_s28 + $0x48] sm:$0xff]  ;;  %v276_v11 = vld [vmem:[%s846_s28 + $0x58] sm:$0xff]  ;;  %v275_v12 = vld [vmem:[%s846_s28 + $0x50] sm:$0xff]  ;;  %p708_p0 = scmp.lt.s32.totalorder %s998_s11, %s706_s26  ;;  %p709_p1 = scmp.lt.s32.totalorder %s707_s27, %s701_s24 }
  0x1c   : > { %v278_v13 = vld [vmem:[%s846_s28 + $0x68] sm:$0xff]  ;;  %v277_v14 = vld [vmem:[%s846_s28 + $0x60] sm:$0xff]  ;;  %v280_v15 = vld [vmem:[%s846_s28 + $0x78] sm:$0xff]  ;;  %p704_p13 = pneg %p703_p12 }
  0x1d   : > { %314 = vperm.xlu1 %700, %v268_v3   ;;  %304 = vperm.xlu0 %699, %v266_v4   ;;  %v279_v16 = vld [vmem:[%s846_s28 + $0x70] sm:$0xff]  ;;  %v282_v17 = vld [vmem:[%s846_s28 + $0x88] sm:$0xff]  ;;  %v281_v18 = vld [vmem:[%s846_s28 + $0x80] sm:$0xff]  ;;  %p710_p2 = por %p709_p1, %p708_p0 }
  0x1e   : > { %v284_v19 = vld [vmem:[%s846_s28 + $0x98] sm:$0xff]  ;;  %v283_v20 = vld [vmem:[%s846_s28 + $0x90] sm:$0xff]  ;;  %v286_v21 = vld [vmem:[%s846_s28 + $0xa8] sm:$0xff] }
  0x1f   : > { %v285_v22 = vld [vmem:[%s846_s28 + $0xa0] sm:$0xff]  ;;  %v288_v23 = vld [vmem:[%s846_s28 + $0xb8] sm:$0xff]  ;;  %v287_v24 = vld [vmem:[%s846_s28 + $0xb0] sm:$0xff]  ;;  %p711_p3 = pnand %p710_p2, %p704_p13 }
  0x20   : > { %v290_v25 = vld [vmem:[%s846_s28 + $0xc8] sm:$0xff]  ;;  %v289_v26 = vld [vmem:[%s846_s28 + $0xc0] sm:$0xff]  ;;  %v292_v27 = vld [vmem:[%s846_s28 + $0xd8] sm:$0xff] }
  0x21   : > { %324 = vperm.xlu1 %700, %v270_v5   ;;  %319 = vperm.xlu0 %699, %v269_v6   ;;  %v291_v28 = vld [vmem:[%s846_s28 + $0xd0] sm:$0xff]  ;;  %v294_v29 = vld [vmem:[%s846_s28 + $0xe8] sm:$0xff]  ;;  %v293_v30 = vld [vmem:[%s846_s28 + $0xe0] sm:$0xff] }
  0x22   : > { %v296_v31 = vld [vmem:[%s846_s28 + $0xf8] sm:$0xff]  ;;  %v295_v32 = vld [vmem:[%s846_s28 + $0xf0] sm:$0xff]  ;;  %v194_v35 = vld [vmem:[%s885_s4] sm:$0xff] }
  0x23   : > { %v196_v34 = vld [vmem:[%s885_s4 + $0x10] sm:$0xff]  ;;  %v233_v37 = vmul.f32 %v890_v33, %v194_v35  ;;  %v197_v40 = vld [vmem:[%s885_s4 + $0x18] sm:$0xff]  ;;  %v195_v41 = vld [vmem:[%s885_s4 + $0x8] sm:$0xff] }
  0x24   : > { %v235_v36 = vmul.f32 %v890_v33, %v196_v34  ;;  %v236_v46 = vmul.f32 %v890_v33, %v197_v40  ;;  %v234_v47 = vmul.f32 %v890_v33, %v195_v41  ;;  %v199_v50 = vld [vmem:[%s885_s4 + $0x28] sm:$0xff]  ;;  %v198_v51 = vld [vmem:[%s885_s4 + $0x20] sm:$0xff]  ;;  %v201_v60 = vld [vmem:[%s885_s4 + $0x38] sm:$0xff] }
  0x25   : > { %334 = vperm.xlu1 %700, %v272_v7   ;;  %329 = vperm.xlu0 %699, %v271_v8   ;;  %v238_v56 = vmul.f32 %v890_v33, %v199_v50  ;;  %v237_v57 = vmul.f32 %v890_v33, %v198_v51  ;;  %v200_v61 = vld [vmem:[%s885_s4 + $0x30] sm:$0xff]  ;;  %v240_v2 = vmul.f32 %v890_v33, %v201_v60  ;;  %v203_v6 = vld [vmem:[%s885_s4 + $0x48] sm:$0xff]  ;;  %v202_v7 = vld [vmem:[%s885_s4 + $0x40] sm:$0xff] }
  0x26   : > { %v239_v3 = vmul.f32 %v890_v33, %v200_v61 }
  0x29   : > { %344 = vperm.xlu1 %700, %v274_v9   ;;  %339 = vperm.xlu0 %699, %v273_v10  }
  0x2d   : > { %354 = vperm.xlu1 %700, %v276_v11   ;;  %349 = vperm.xlu0 %699, %v275_v12   ;;  %v242_v12 = vmul.f32 %v890_v33, %v203_v6 }
  0x31   : > { %364 = vperm.xlu1 %700, %v278_v13   ;;  %359 = vperm.xlu0 %699, %v277_v14   ;;  %v241_v13 = vmul.f32 %v890_v33, %v202_v7 }
  0x35   : > { %374 = vperm.xlu1 %700, %v280_v15   ;;  %369 = vperm.xlu0 %699, %v279_v16   ;;  %v205_v16 = vld [vmem:[%s885_s4 + $0x58] sm:$0xff] }
  0x39   : > { %384 = vperm.xlu1 %700, %v282_v17   ;;  %379 = vperm.xlu0 %699, %v281_v18   ;;  %v204_v17 = vld [vmem:[%s885_s4 + $0x50] sm:$0xff] }
  0x3d   : > { %394 = vperm.xlu1 %700, %v284_v19   ;;  %389 = vperm.xlu0 %699, %v283_v20  }
  0x41   : > { %404 = vperm.xlu1 %700, %v286_v21   ;;  %399 = vperm.xlu0 %699, %v285_v22   ;;  %v244_v22 = vmul.f32 %v890_v33, %v205_v16 }
  0x45   : > { %414 = vperm.xlu1 %700, %v288_v23   ;;  %409 = vperm.xlu0 %699, %v287_v24   ;;  %v243_v23 = vmul.f32 %v890_v33, %v204_v17 }
  0x49   : > { %424 = vperm.xlu1 %700, %v290_v25   ;;  %419 = vperm.xlu0 %699, %v289_v26   ;;  %v207_v26 = vld [vmem:[%s885_s4 + $0x68] sm:$0xff] }
  0x4d   : > { %434 = vperm.xlu1 %700, %v292_v27   ;;  %429 = vperm.xlu0 %699, %v291_v28   ;;  %v206_v27 = vld [vmem:[%s885_s4 + $0x60] sm:$0xff] }
  0x51   : > { %444 = vperm.xlu1 %700, %v294_v29   ;;  %439 = vperm.xlu0 %699, %v293_v30  }
  0x55   : > { %454 = vperm.xlu1 %700, %v296_v31   ;;  %449 = vperm.xlu0 %699, %v295_v32   ;;  %v246_v32 = vmul.f32 %v890_v33, %v207_v26 }
  0x98   : > { %v310_v38 = vpop.permute.xlu1 %309  ;;  %v300_v39 = vpop.permute.xlu0 %299 }
  0x99   : > { %v459_v42 = vmul.f32 %v310_v38, %v196_v34  ;;  %v457_v43 = vmul.f32 %v300_v39, %v194_v35  ;;  %v245_v34 = vmul.f32 %v890_v33, %v206_v27  ;;  %v208_v38 = vld [vmem:[%s885_s4 + $0x70] sm:$0xff] }
  0x9b   : > { %v491_v44 = vadd.f32 %v459_v42, %v235_v36  ;;  %v489_v45 = vadd.f32 %v457_v43, %v233_v37  ;;  %v209_v37 = vld [vmem:[%s885_s4 + $0x78] sm:$0xff] }
  0x9c   : > { %v315_v48 = vpop.permute.xlu1 %314  ;;  %v305_v49 = vpop.permute.xlu0 %304  ;;  %v248_v43 = vmul.f32 %v890_v33, %v209_v37 }
  0x9d   : > { %523 = vst [vmem:[%s905_s9 + $0x10] sm:$0xff] %v491_v44  ;;  %521 = vst [vmem:[%s905_s9] sm:$0xff] %v489_v45  ;;  %v460_v52 = vmul.f32 %v315_v48, %v197_v40  ;;  %v458_v53 = vmul.f32 %v305_v49, %v195_v41  ;;  %v247_v44 = vmul.f32 %v890_v33, %v208_v38  ;;  %v210_v48 = vld [vmem:[%s885_s4 + $0x80] sm:$0xff] }
  0x9f   : > { %v492_v54 = vadd.f32 %v460_v52, %v236_v46  ;;  %v490_v55 = vadd.f32 %v458_v53, %v234_v47  ;;  %v211_v47 = vld [vmem:[%s885_s4 + $0x88] sm:$0xff] }
  0xa0   : > { %v325_v58 = vpop.permute.xlu1 %324  ;;  %v320_v59 = vpop.permute.xlu0 %319  ;;  %v250_v53 = vmul.f32 %v890_v33, %v211_v47 }
  0xa1   : > { %524 = vst [vmem:[%s905_s9 + $0x18] sm:$0xff] %v492_v54  ;;  %522 = vst [vmem:[%s905_s9 + $0x8] sm:$0xff] %v490_v55  ;;  %v462_v62 = vmul.f32 %v325_v58, %v199_v50  ;;  %v461_v63 = vmul.f32 %v320_v59, %v198_v51  ;;  %v249_v54 = vmul.f32 %v890_v33, %v210_v48  ;;  %v212_v58 = vld [vmem:[%s885_s4 + $0x90] sm:$0xff] }
  0xa3   : > { %v494_v0 = vadd.f32 %v462_v62, %v238_v56  ;;  %v493_v1 = vadd.f32 %v461_v63, %v237_v57  ;;  %v213_v57 = vld [vmem:[%s885_s4 + $0x98] sm:$0xff] }
  0xa4   : > { %v335_v4 = vpop.permute.xlu1 %334  ;;  %v330_v5 = vpop.permute.xlu0 %329  ;;  %v252_v63 = vmul.f32 %v890_v33, %v213_v57 }
  0xa5   : > { %526 = vst [vmem:[%s905_s9 + $0x28] sm:$0xff] %v494_v0  ;;  %525 = vst [vmem:[%s905_s9 + $0x20] sm:$0xff] %v493_v1  ;;  %v464_v8 = vmul.f32 %v335_v4, %v201_v60  ;;  %v463_v9 = vmul.f32 %v330_v5, %v200_v61  ;;  %v251_v0 = vmul.f32 %v890_v33, %v212_v58  ;;  %v214_v4 = vld [vmem:[%s885_s4 + $0xa0] sm:$0xff] }
  0xa7   : > { %v496_v10 = vadd.f32 %v464_v8, %v240_v2  ;;  %v495_v11 = vadd.f32 %v463_v9, %v239_v3  ;;  %v215_v3 = vld [vmem:[%s885_s4 + $0xa8] sm:$0xff] }
  0xa8   : > { %v345_v14 = vpop.permute.xlu1 %344  ;;  %v340_v15 = vpop.permute.xlu0 %339  ;;  %v254_v9 = vmul.f32 %v890_v33, %v215_v3 }
  0xa9   : > { %528 = vst [vmem:[%s905_s9 + $0x38] sm:$0xff] %v496_v10  ;;  %527 = vst [vmem:[%s905_s9 + $0x30] sm:$0xff] %v495_v11  ;;  %v466_v18 = vmul.f32 %v345_v14, %v203_v6  ;;  %v465_v19 = vmul.f32 %v340_v15, %v202_v7  ;;  %v253_v10 = vmul.f32 %v890_v33, %v214_v4  ;;  %v216_v14 = vld [vmem:[%s885_s4 + $0xb0] sm:$0xff] }
  0xab   : > { %v498_v20 = vadd.f32 %v466_v18, %v242_v12  ;;  %v497_v21 = vadd.f32 %v465_v19, %v241_v13  ;;  %v217_v13 = vld [vmem:[%s885_s4 + $0xb8] sm:$0xff] }
  0xac   : > { %v355_v24 = vpop.permute.xlu1 %354  ;;  %v350_v25 = vpop.permute.xlu0 %349  ;;  %v256_v19 = vmul.f32 %v890_v33, %v217_v13 }
  0xad   : > { %530 = vst [vmem:[%s905_s9 + $0x48] sm:$0xff] %v498_v20  ;;  %529 = vst [vmem:[%s905_s9 + $0x40] sm:$0xff] %v497_v21  ;;  %v468_v28 = vmul.f32 %v355_v24, %v205_v16  ;;  %v467_v29 = vmul.f32 %v350_v25, %v204_v17  ;;  %v255_v20 = vmul.f32 %v890_v33, %v216_v14  ;;  %v218_v24 = vld [vmem:[%s885_s4 + $0xc0] sm:$0xff] }
  0xaf   : > { %v500_v30 = vadd.f32 %v468_v28, %v244_v22  ;;  %v499_v31 = vadd.f32 %v467_v29, %v243_v23  ;;  %v219_v23 = vld [vmem:[%s885_s4 + $0xc8] sm:$0xff] }
  0xb0   : > { %v365_v35 = vpop.permute.xlu1 %364  ;;  %v360_v36 = vpop.permute.xlu0 %359  ;;  %v258_v29 = vmul.f32 %v890_v33, %v219_v23 }
  0xb1   : > { %532 = vst [vmem:[%s905_s9 + $0x58] sm:$0xff] %v500_v30  ;;  %531 = vst [vmem:[%s905_s9 + $0x50] sm:$0xff] %v499_v31  ;;  %v470_v39 = vmul.f32 %v365_v35, %v207_v26  ;;  %v469_v40 = vmul.f32 %v360_v36, %v206_v27  ;;  %v257_v30 = vmul.f32 %v890_v33, %v218_v24  ;;  %v220_v35 = vld [vmem:[%s885_s4 + $0xd0] sm:$0xff] }
  0xb3   : > { %v502_v41 = vadd.f32 %v470_v39, %v246_v32  ;;  %v501_v42 = vadd.f32 %v469_v40, %v245_v34  ;;  %v221_v34 = vld [vmem:[%s885_s4 + $0xd8] sm:$0xff] }
  0xb4   : > { %v375_v45 = vpop.permute.xlu1 %374  ;;  %v370_v46 = vpop.permute.xlu0 %369  ;;  %v260_v40 = vmul.f32 %v890_v33, %v221_v34 }
  0xb5   : > { %534 = vst [vmem:[%s905_s9 + $0x68] sm:$0xff] %v502_v41  ;;  %533 = vst [vmem:[%s905_s9 + $0x60] sm:$0xff] %v501_v42  ;;  %v472_v49 = vmul.f32 %v375_v45, %v209_v37  ;;  %v471_v50 = vmul.f32 %v370_v46, %v208_v38  ;;  %v259_v41 = vmul.f32 %v890_v33, %v220_v35  ;;  %v222_v45 = vld [vmem:[%s885_s4 + $0xe0] sm:$0xff] }
  0xb7   : > { %v504_v51 = vadd.f32 %v472_v49, %v248_v43  ;;  %v503_v52 = vadd.f32 %v471_v50, %v247_v44  ;;  %v223_v44 = vld [vmem:[%s885_s4 + $0xe8] sm:$0xff] }
  0xb8   : > { %v385_v55 = vpop.permute.xlu1 %384  ;;  %v380_v56 = vpop.permute.xlu0 %379  ;;  %v262_v50 = vmul.f32 %v890_v33, %v223_v44 }
  0xb9   : > { %536 = vst [vmem:[%s905_s9 + $0x78] sm:$0xff] %v504_v51  ;;  %535 = vst [vmem:[%s905_s9 + $0x70] sm:$0xff] %v503_v52  ;;  %v474_v59 = vmul.f32 %v385_v55, %v211_v47  ;;  %v473_v60 = vmul.f32 %v380_v56, %v210_v48  ;;  %v261_v51 = vmul.f32 %v890_v33, %v222_v45  ;;  %v224_v55 = vld [vmem:[%s885_s4 + $0xf0] sm:$0xff] }
  0xbb   : > { %v506_v61 = vadd.f32 %v474_v59, %v250_v53  ;;  %v505_v62 = vadd.f32 %v473_v60, %v249_v54  ;;  %v225_v54 = vld [vmem:[%s885_s4 + $0xf8] sm:$0xff] }
  0xbc   : > { %v395_v1 = vpop.permute.xlu1 %394  ;;  %v390_v2 = vpop.permute.xlu0 %389  ;;  %v264_v60 = vmul.f32 %v890_v33, %v225_v54 }
  0xbd   : > { %538 = vst [vmem:[%s905_s9 + $0x88] sm:$0xff] %v506_v61  ;;  %537 = vst [vmem:[%s905_s9 + $0x80] sm:$0xff] %v505_v62  ;;  %v476_v5 = vmul.f32 %v395_v1, %v213_v57  ;;  %v475_v6 = vmul.f32 %v390_v2, %v212_v58  ;;  %v263_v61 = vmul.f32 %v890_v33, %v224_v55 }
  0xbf   : > { %v508_v7 = vadd.f32 %v476_v5, %v252_v63  ;;  %v507_v8 = vadd.f32 %v475_v6, %v251_v0 }
  0xc0   : > { %v405_v11 = vpop.permute.xlu1 %404  ;;  %v400_v12 = vpop.permute.xlu0 %399 }
  0xc1   : > { %540 = vst [vmem:[%s905_s9 + $0x98] sm:$0xff] %v508_v7  ;;  %539 = vst [vmem:[%s905_s9 + $0x90] sm:$0xff] %v507_v8  ;;  %v478_v15 = vmul.f32 %v405_v11, %v215_v3  ;;  %v477_v16 = vmul.f32 %v400_v12, %v214_v4 }
  0xc3   : > { %v510_v17 = vadd.f32 %v478_v15, %v254_v9  ;;  %v509_v18 = vadd.f32 %v477_v16, %v253_v10 }
  0xc4   : > { %v415_v21 = vpop.permute.xlu1 %414  ;;  %v410_v22 = vpop.permute.xlu0 %409 }
  0xc5   : > { %542 = vst [vmem:[%s905_s9 + $0xa8] sm:$0xff] %v510_v17  ;;  %541 = vst [vmem:[%s905_s9 + $0xa0] sm:$0xff] %v509_v18  ;;  %v480_v25 = vmul.f32 %v415_v21, %v217_v13  ;;  %v479_v26 = vmul.f32 %v410_v22, %v216_v14 }
  0xc7   : > { %v512_v27 = vadd.f32 %v480_v25, %v256_v19  ;;  %v511_v28 = vadd.f32 %v479_v26, %v255_v20 }
  0xc8   : > { %v425_v31 = vpop.permute.xlu1 %424  ;;  %v420_v32 = vpop.permute.xlu0 %419 }
  0xc9   : > { %544 = vst [vmem:[%s905_s9 + $0xb8] sm:$0xff] %v512_v27  ;;  %543 = vst [vmem:[%s905_s9 + $0xb0] sm:$0xff] %v511_v28  ;;  %v482_v36 = vmul.f32 %v425_v31, %v219_v23  ;;  %v481_v37 = vmul.f32 %v420_v32, %v218_v24 }
  0xcb   : > { %v514_v38 = vadd.f32 %v482_v36, %v258_v29  ;;  %v513_v39 = vadd.f32 %v481_v37, %v257_v30 }
  0xcc   : > { %v435_v42 = vpop.permute.xlu1 %434  ;;  %v430_v43 = vpop.permute.xlu0 %429 }
  0xcd   : > { %546 = vst [vmem:[%s905_s9 + $0xc8] sm:$0xff] %v514_v38  ;;  %545 = vst [vmem:[%s905_s9 + $0xc0] sm:$0xff] %v513_v39  ;;  %v484_v46 = vmul.f32 %v435_v42, %v221_v34  ;;  %v483_v47 = vmul.f32 %v430_v43, %v220_v35 }
  0xcf   : > { %v516_v48 = vadd.f32 %v484_v46, %v260_v40  ;;  %v515_v49 = vadd.f32 %v483_v47, %v259_v41 }
  0xd0   : > { %v445_v52 = vpop.permute.xlu1 %444  ;;  %v440_v53 = vpop.permute.xlu0 %439 }
  0xd1   : > { %548 = vst [vmem:[%s905_s9 + $0xd8] sm:$0xff] %v516_v48  ;;  %547 = vst [vmem:[%s905_s9 + $0xd0] sm:$0xff] %v515_v49  ;;  %v486_v56 = vmul.f32 %v445_v52, %v223_v44  ;;  %v485_v57 = vmul.f32 %v440_v53, %v222_v45 }
  0xd3   : > { %v518_v58 = vadd.f32 %v486_v56, %v262_v50  ;;  %v517_v59 = vadd.f32 %v485_v57, %v261_v51 }
  0xd4   : > { %v455_v62 = vpop.permute.xlu1 %454  ;;  %v450_v63 = vpop.permute.xlu0 %449 }
  0xd5   : > { %550 = vst [vmem:[%s905_s9 + $0xe8] sm:$0xff] %v518_v58  ;;  %549 = vst [vmem:[%s905_s9 + $0xe0] sm:$0xff] %v517_v59  ;;  %v488_v0 = vmul.f32 %v455_v62, %v225_v54  ;;  %v487_v1 = vmul.f32 %v450_v63, %v224_v55 }
  0xd7   : > { %v520_v33 = vadd.f32 %v488_v0, %v264_v60  ;;  %v519_v2 = vadd.f32 %v487_v1, %v263_v61 }
  0xd9   : > { %552 = vst [vmem:[%s905_s9 + $0xf8] sm:$0xff] %v520_v33  ;;  %551 = vst [vmem:[%s905_s9 + $0xf0] sm:$0xff] %v519_v2 }
  0xda   : > { %714 = shalt.err (!%p711_p3)
}
  0xdb   : > { %s715_s28 = scalar_lea.hbm %s996_s20, 4096  ;;  %s719_s4 = scalar_lea.hbm %s1048_s3, 8192 }
  0xdc   : > { %p716_p4 = scmp.ne.s32.totalorder %s996_s20, %s715_s28  ;;  %p720_p9 = scmp.lt.u32.totalorder %s996_s20, %s1048_s3 }
  0xdd   : > { %p721_p10 = scmp.lt.u32.totalorder %s719_s4, %s715_s28  ;;  %p723_p12 = scmp.lt.u32.totalorder %s715_s28, %s996_s20 }
  0xde   : > { %p717_p7 = pnand %p716_p4, %p827_p5 }
  0xdf   : > { %p722_p11 = por %p721_p10, %p720_p9 }
  0xe0   : > { %p718_p8 = pneg %p717_p7 }
  0xe1   : > { %p724_p13 = por %p723_p12, %p722_p11 }
  0xe3   : > { %p725_p0 = pnand %p724_p13, %p718_p8 }
  0xe5   : > { %728 = shalt.err (!%p725_p0)
}
  0xe6   : > { %s767_s7 = smov 128   ;;  %s768_s8 = smov 8  }
  0xe7   : > { %657 = dma.vmem_to_hbm [thread:$0]  (%p827_p5), %s998_s11, 4096, %s996_s20, %s1004_s16, %s767_s7, %s767_s7, %s768_s8  }
  0xe8 PF: > { %p663_p1 = scmp.ge.s32.totalorder %s763_s15, 2  ;;  %s582_s9 = sand.u32 1, %s751_s12  }
  0xe9   : > { %s583_s10 = scalar_lea.sflag [#allocation3], %s582_s9 }
  0xea   : > { %p660_p2 = pnand %p663_p1, %p831_p6 }
  0xec   : > { %746 = dma.done.wait (!%p660_p2), %s583_s10, 4096  }
  0xed   : > { %748 = vsyncadd (!%p660_p2), %s583_s10, 4294963200  ;;  %p13_p3 = scmp.ge.s32.totalorder %s814_s18, 4   ;;  %s1051_s12 = smov %s755_s13 }
  0xee   : > { %s1052_s13 = smov %s759_s14  ;;  %s1053_s14 = smov %s825_s21 }
  0xef   : > { %s1054_s15 = smov %s814_s18  ;;  %15 = sbr.rel (!%p13_p3) target bundleno = 3 (0x3), region = 70 }
  0xf6   :  { %588 = vsyncpa [#allocation3], 1 }
  0xf7   :  { %590 = vsyncpa [#allocation3 + $0x1], 1 }

</bundles_post_ra>
